<compile_context>
chip_gen: v7x
topology: tpu7x:2x2x1
jax: 0.10.0
libtpu: 0.0.40
codegen_flags: <defaults>
</compile_context>

<pallas_src>
import functools

import numpy as np
import jax
import jax.numpy as jnp
from jax.experimental import pallas as pl
from jax.experimental.pallas import tpu as pltpu

K1 = 5                      # first conv kernel size (module default kernel=5)
K2 = 3                      # second conv kernel size (fixed in the module)
PAD = (K1 - 1) // 2 + 1     # ReplicationPad1d amount for odd kernel -> 3
NEG_SLOPE = 0.01            # LeakyReLU negative slope


# ----------------------------------------------------------------------------
# Fused tree kernel: full SCINet tree for a block of batch rows.
# Per-level state layout: rows = position within segment, lanes = node-major
# channels (node n occupies lanes [n*C, (n+1)*C)).
# ----------------------------------------------------------------------------
def tree_kernel(x_ref, w1_ref, b1_ref, w2_ref, b2_ref, o_ref, st_ref, *,
                num_levels, C, H, split_strided):
    Bblk = x_ref.shape[0]
    T = x_ref.shape[1]

    def mm(lhs, w):
        # lhs: (Bblk, r, I); w: (I, O) -> (Bblk, r, O).  MXU, f32 accumulation.
        r, i = lhs.shape[1], lhs.shape[2]
        out = jnp.dot(lhs.reshape(Bblk * r, i), w,
                      preferred_element_type=jnp.float32)
        return out.reshape(Bblk, r, out.shape[-1])

    def branch_pair(ab, st, n_nodes):
        # branch = ReplicationPad1d -> Conv1d(k=5) -> LeakyReLU -> Dropout(eval=id)
        #          -> Conv1d(k=3) -> Tanh, applied per node to both lane halves of
        # ab = [inA | inB] (node-major channels per half) using the level's
        # block-diagonally packed stage weights -> one conv chain serves all nodes.
        h = ab.shape[1]
        ci = 2 * n_nodes * C
        ch = 2 * n_nodes * H
        # in-kernel replication pad along time (single sublane concat per stage)
        abp = jnp.concatenate(
            [ab[:, :1, :]] * PAD + [ab] + [ab[:, h - 1:h, :]] * PAD, axis=1)
        w1s = w1_ref[st]                                   # (K1, Imax, Hmax)
        w2s = w2_ref[st]                                   # (K2, Hmax, Imax)

        # conv1: K1 accumulated per-tap matmuls (no im2col lane concat)
        m1 = h + 2 * PAD - (K1 - 1)
        hid = None
        for k in range(K1):
            t = mm(abp[:, k:k + m1, :], w1s[k, :ci, :ch])
            hid = t if hid is None else hid + t
        hid = hid + b1_ref[st:st + 1, :][:, :ch]
        hid = jnp.where(hid > 0, hid, NEG_SLOPE * hid)     # LeakyReLU(0.01)
        # TODO(synk): nn.Dropout is stochastic in train mode; eval-mode identity here.

        # conv2: K2 accumulated per-tap matmuls, back to length h
        m2 = m1 - (K2 - 1)
        out = None
        for k in range(K2):
            t = mm(hid[:, k:k + m2, :], w2s[k, :ch, :ci])
            out = t if out is None else out + t
        return jnp.tanh(out + b2_ref[st:st + 1, :][:, :ci])   # (Bblk, h, ci)

    n_nodes, m = 1, T
    for lvl in range(num_levels):
        h = m // 2
        nc = n_nodes * C
        src = x_ref if lvl == 0 else st_ref
        # Even/odd split along time as pure data movement (no selection matmuls).
        if split_strided:
            xe = src[:, pl.ds(0, h, 2), :nc]
            xo = src[:, pl.ds(1, h, 2), :nc]
        else:  # fallback if strided pl.ds loads are unavailable
            xe = jnp.concatenate([src[:, i:i + 1, :nc] for i in range(0, m, 2)],
                                 axis=1)
            xo = jnp.concatenate([src[:, i:i + 1, :nc] for i in range(1, m, 2)],
                                 axis=1)

        # Interactor (INN=True): all 2^lvl nodes of this level batched on lanes.
        f = branch_pair(jnp.concatenate([xe, xo], axis=-1), 2 * lvl, n_nodes)
        d = xo * jnp.exp(f[..., :nc])          # d = x_odd  * exp(phi(x_even))
        c = xe * jnp.exp(f[..., nc:])          # c = x_even * exp(psi(x_odd))
        g = branch_pair(jnp.concatenate([d, c], axis=-1), 2 * lvl + 1, n_nodes)
        eu = c + g[..., :nc]                   # x_even_update = c + U(d)
        ou = d - g[..., nc:]                   # x_odd_update  = d - P(c)

        if lvl + 1 < num_levels:
            # Children: even child of node n -> n, odd child -> n + n_nodes, so the
            # next level's state is [eu | ou] on lanes; park it in VMEM scratch so
            # the next split is again a strided sublane read.
            st_ref[:, :h, :nc] = eu
            st_ref[:, :h, nc:2 * nc] = ou
        else:
            # zip_up_the_pants over the whole tree is a fixed permutation: output
            # position t = (pos << L) + child with child lanes ordered [eu | ou].
            # Emit one lane-dense (1, T*C) row per batch element.
            pieces = []
            for p in range(h):
                pieces.append(eu[:, p:p + 1, :])
                pieces.append(ou[:, p:p + 1, :])
            o_ref[...] = jnp.concatenate(pieces, axis=-1).astype(o_ref.dtype)
        n_nodes, m = 2 * n_nodes, h


# ----------------------------------------------------------------------------
# Wrapper: single pallas_call for the whole tree, grid over batch blocks.
# ----------------------------------------------------------------------------
def encoder_tree(x, packed, num_levels):
    B, T, C = x.shape
    assert T % (2 ** num_levels) == 0, "seq len must be divisible by 2**num_levels"
    W1, B1, W2, B2 = packed['w1'], packed['b1'], packed['w2'], packed['b2']
    assert W1.shape[0] == 2 * num_levels
    H = W1.shape[-1] // (2 ** num_levels)

    # Keep >=2 grid steps (both v7x TensorCores busy) while folding extra batch
    # rows into the matmul rows when B allows it.
    bblk = B // 2 if (B % 2 == 0 and B >= 2) else 1
    grid = (B // bblk,)

    kern = functools.partial(tree_kernel, num_levels=num_levels, C=C, H=H)

    def run(weight_pmode, split_strided):
        wkw = {} if weight_pmode is None else dict(pipeline_mode=weight_pmode)
        in_specs = [
            pl.BlockSpec((bblk, T, C), lambda b: (b, 0, 0)),            # x rows
            pl.BlockSpec(W1.shape, lambda b: (0, 0, 0, 0), **wkw),      # conv1 taps
            pl.BlockSpec(B1.shape, lambda b: (0, 0), **wkw),            # conv1 bias
            pl.BlockSpec(W2.shape, lambda b: (0, 0, 0, 0), **wkw),      # conv2 taps
            pl.BlockSpec(B2.shape, lambda b: (0, 0), **wkw),            # conv2 bias
        ]
        f = pl.pallas_call(
            functools.partial(kern, split_strided=split_strided),
            out_shape=jax.ShapeDtypeStruct((B, 1, T * C), jnp.float32),
            grid=grid,
            in_specs=in_specs,
            out_specs=pl.BlockSpec((bblk, 1, T * C), lambda b: (b, 0, 0)),
            scratch_shapes=[pltpu.VMEM(
                (bblk, T // 2, C * 2 ** (num_levels - 1)), jnp.float32)],
            compiler_params=pltpu.CompilerParams(
                dimension_semantics=("parallel",)),
        )
        return jax.block_until_ready(f(x, W1, B1, W2, B2))

    attempts = []
    if hasattr(pl, "Buffered"):
        attempts.append((pl.Buffered(1), True))   # single-buffer constant weights
    attempts += [(None, True), (None, False)]
    err = None
    for pmode, strided in attempts:
        try:
            out = run(pmode, strided)
            break
        except Exception as e:   # fall back (e.g. Buffered(1)/strided ds unsupported)
            err = e
    else:
        raise err
    return out.reshape(B, T, C)


# ----------------------------------------------------------------------------
# Deterministic synthetic parameters + per-level block-diagonal packing
# ----------------------------------------------------------------------------
def init_branch(key, C, H):
    k1, k2, k3, k4 = jax.random.split(key, 4)
    return dict(
        w1=0.1 * jax.random.normal(k1, (K1, C, H), jnp.float32),   # Conv1d(C->H,k=5)
        b1=0.1 * jax.random.normal(k2, (H,), jnp.float32),
        w2=0.1 * jax.random.normal(k3, (K2, H, C), jnp.float32),   # Conv1d(H->C,k=3)
        b2=0.1 * jax.random.normal(k4, (C,), jnp.float32),
    )


def init_block(key, C, H):
    keys = jax.random.split(key, 4)
    return {name: init_branch(k, C, H)
            for name, k in zip(('phi', 'psi', 'U', 'P'), keys)}


def init_tree(key, C, H, level):
    kb, ke, ko = jax.random.split(key, 3)
    node = {'block': init_block(kb, C, H)}
    if level != 0:
        node['even'] = init_tree(ke, C, H, level - 1)
        node['odd'] = init_tree(ko, C, H, level - 1)
    return node


def pack_params(tree, num_levels, C, H):
    """Per-LEVEL, per-tap block-diagonal packing of every node's (phi,psi)/(U,P).

    Stage index st = 2*level + {0: (phi, psi), 1: (U, P)}.
    Node n at a level follows the tree path: bit i of n -> 'even'(0)/'odd'(1).
    Smaller levels are zero-padded to the deepest level's lane width (unread).
    """
    L = num_levels
    n_max = 2 ** (L - 1)
    i_max, h_max = 2 * n_max * C, 2 * n_max * H
    w1 = np.zeros((2 * L, K1, i_max, h_max), np.float32)
    b1 = np.zeros((2 * L, h_max), np.float32)
    w2 = np.zeros((2 * L, K2, h_max, i_max), np.float32)
    b2 = np.zeros((2 * L, i_max), np.float32)

    def node_block(n, level):
        node = tree
        for i in range(level):
            node = node['odd'] if (n >> i) & 1 else node['even']
        return node['block']

    for lvl in range(L):
        n_nodes = 2 ** lvl
        for n in range(n_nodes):
            blk = node_block(n, lvl)
            for s, (name_a, name_b) in enumerate((('phi', 'psi'), ('U', 'P'))):
                st = 2 * lvl + s
                pa, pb = blk[name_a], blk[name_b]
                ac, ah = n * C, n * H                                  # branch-A half
                bc, bh = n_nodes * C + n * C, n_nodes * H + n * H      # branch-B half
                w1[st, :, ac:ac + C, ah:ah + H] = np.asarray(pa['w1'])
                w1[st, :, bc:bc + C, bh:bh + H] = np.asarray(pb['w1'])
                b1[st, ah:ah + H] = np.asarray(pa['b1'])
                b1[st, bh:bh + H] = np.asarray(pb['b1'])
                w2[st, :, ah:ah + H, ac:ac + C] = np.asarray(pa['w2'])
                w2[st, :, bh:bh + H, bc:bc + C] = np.asarray(pb['w2'])
                b2[st, ac:ac + C] = np.asarray(pa['b2'])
                b2[st, bc:bc + C] = np.asarray(pb['b2'])
    return dict(w1=jnp.asarray(w1), b1=jnp.asarray(b1),
                w2=jnp.asarray(w2), b2=jnp.asarray(b2))


# ----------------------------------------------------------------------------
# Pure-JAX reference (mirrors the PyTorch module) for a correctness cross-check.
# ----------------------------------------------------------------------------
def _ref_branch(z, p):
    h = z.shape[0]
    zp = jnp.concatenate([jnp.repeat(z[:1], PAD, 0), z, jnp.repeat(z[-1:], PAD, 0)], 0)
    m1 = h + 2 * PAD - (K1 - 1)
    hid = sum(zp[k:k + m1] @ p['w1'][k] for k in range(K1)) + p['b1']
    hid = jnp.where(hid > 0, hid, NEG_SLOPE * hid)
    m2 = m1 - (K2 - 1)
    out = sum(hid[k:k + m2] @ p['w2'][k] for k in range(K2)) + p['b2']
    return jnp.tanh(out)


def _ref_tree(z, node, level):
    xe, xo = z[::2], z[1::2]
    blk = node['block']
    d = xo * jnp.exp(_ref_branch(xe, blk['phi']))
    c = xe * jnp.exp(_ref_branch(xo, blk['psi']))
    eu = c + _ref_branch(d, blk['U'])
    ou = d - _ref_branch(c, blk['P'])
    if level != 0:
        eu = _ref_tree(eu, node['even'], level - 1)
        ou = _ref_tree(ou, node['odd'], level - 1)
    out = jnp.zeros((eu.shape[0] + ou.shape[0], eu.shape[1]), eu.dtype)
    return out.at[0::2].set(eu).at[1::2].set(ou)


def encoder_tree_reference(x, tree, num_levels):
    return jnp.stack([_ref_tree(x[b], tree, num_levels - 1)
                      for b in range(x.shape[0])])


# ----------------------------------------------------------------------------
if __name__ == "__main__":
    # Small shapes consistent with EncoderTree: x is (batch, seq_len, in_planes)
    B, T, C = 2, 16, 4
    hidden_size = 2
    H = C * hidden_size            # int(in_planes * hidden_size)
    num_levels = 2                 # tree depth (current_level = num_levels - 1)

    key = jax.random.PRNGKey(0)
    kx, kp = jax.random.split(key)
    x = jax.random.normal(kx, (B, T, C), jnp.float32)
    params = init_tree(kp, C, H, num_levels - 1)
    packed = pack_params(params, num_levels, C, H)

    out = encoder_tree(x, packed, num_levels)
    out = jax.block_until_ready(out)
    assert out.shape == (B, T, C), out.shape
    assert bool(jnp.all(jnp.isfinite(out)))

    ref = encoder_tree_reference(x, params, num_levels)
    max_err = float(jnp.max(jnp.abs(out - ref)))
    assert max_err < 1e-1, f"mismatch vs reference: max_err={max_err}"
    print("KERNEL_OK")
</pallas_src>

<mosaic_0001>
module attributes {stable_mosaic.version = 11 : i64} {
  func.func @tree_kernel(%arg0: i32, %arg1: memref<1x16x4xf32, #tpu.memory_space<vmem>>, %arg2: memref<4x5x16x32xf32, #tpu.memory_space<vmem>>, %arg3: memref<4x32xf32, #tpu.memory_space<vmem>>, %arg4: memref<4x3x32x16xf32, #tpu.memory_space<vmem>>, %arg5: memref<4x16xf32, #tpu.memory_space<vmem>>, %arg6: memref<1x1x64xf32, #tpu.memory_space<vmem>>, %arg7: memref<1x8x8xf32, #tpu.memory_space<vmem>>) attributes {dimension_semantics = [#tpu.dimension_semantics<parallel>], iteration_bounds = array<i64: 2>, scalar_prefetch = 0 : i64, scratch_operands = 1 : i64, tpu.core_type = #tpu.core_type<tc>, window_params = [{transform_indices = @transform_0, window_bounds = array<i64: 1, 16, 4>}, {pipeline_mode = #tpu.pipeline_mode<synchronous>, transform_indices = @transform_1, window_bounds = array<i64: 4, 5, 16, 32>}, {pipeline_mode = #tpu.pipeline_mode<synchronous>, transform_indices = @transform_2, window_bounds = array<i64: 4, 32>}, {pipeline_mode = #tpu.pipeline_mode<synchronous>, transform_indices = @transform_3, window_bounds = array<i64: 4, 3, 32, 16>}, {pipeline_mode = #tpu.pipeline_mode<synchronous>, transform_indices = @transform_4, window_bounds = array<i64: 4, 16>}, {transform_indices = @transform_5, window_bounds = array<i64: 1, 1, 64>}]} {
    %c0 = arith.constant 0 : index
    %c0_0 = arith.constant 0 : index
    %c0_1 = arith.constant 0 : index
    %0 = tpu.strided_load %arg1[%c0, %c0_0, %c0_1] {strides = array<i32: 1, 2, 1>} : memref<1x16x4xf32, #tpu.memory_space<vmem>>, vector<1x8x4xf32>
    %c0_2 = arith.constant 0 : index
    %c1 = arith.constant 1 : index
    %c0_3 = arith.constant 0 : index
    %1 = tpu.strided_load %arg1[%c0_2, %c1, %c0_3] {strides = array<i32: 1, 2, 1>} : memref<1x16x4xf32, #tpu.memory_space<vmem>>, vector<1x8x4xf32>
    %2 = tpu.concatenate %0, %1 in 2 : vector<1x8x4xf32>, vector<1x8x4xf32> -> vector<1x8x8xf32>
    %3 = vector.extract_strided_slice %2 {offsets = [0, 0, 0], sizes = [1, 1, 8], strides = [1, 1, 1]} : vector<1x8x8xf32> to vector<1x1x8xf32>
    %4 = vector.extract_strided_slice %2 {offsets = [0, 7, 0], sizes = [1, 1, 8], strides = [1, 1, 1]} : vector<1x8x8xf32> to vector<1x1x8xf32>
    %5 = tpu.concatenate %3, %3, %3, %2, %4, %4, %4 in 1 : vector<1x1x8xf32>, vector<1x1x8xf32>, vector<1x1x8xf32>, vector<1x8x8xf32>, vector<1x1x8xf32>, vector<1x1x8xf32>, vector<1x1x8xf32> -> vector<1x14x8xf32>
    %c0_4 = arith.constant 0 : index
    %c0_5 = arith.constant 0 : index
    %c0_6 = arith.constant 0 : index
    %c0_7 = arith.constant 0 : index
    %6 = vector.load %arg2[%c0_4, %c0_5, %c0_6, %c0_7] : memref<4x5x16x32xf32, #tpu.memory_space<vmem>>, vector<1x5x16x32xf32>
    %7 = vector.shape_cast %6 : vector<1x5x16x32xf32> to vector<5x16x32xf32>
    %c0_8 = arith.constant 0 : index
    %c0_9 = arith.constant 0 : index
    %c0_10 = arith.constant 0 : index
    %c0_11 = arith.constant 0 : index
    %8 = vector.load %arg4[%c0_8, %c0_9, %c0_10, %c0_11] : memref<4x3x32x16xf32, #tpu.memory_space<vmem>>, vector<1x3x32x16xf32>
    %9 = vector.shape_cast %8 : vector<1x3x32x16xf32> to vector<3x32x16xf32>
    %10 = vector.extract_strided_slice %5 {offsets = [0, 0, 0], sizes = [1, 10, 8], strides = [1, 1, 1]} : vector<1x14x8xf32> to vector<1x10x8xf32>
    %11 = vector.extract_strided_slice %7 {offsets = [0, 0, 0], sizes = [1, 8, 16], strides = [1, 1, 1]} : vector<5x16x32xf32> to vector<1x8x16xf32>
    %12 = vector.shape_cast %11 : vector<1x8x16xf32> to vector<8x16xf32>
    %13 = vector.shape_cast %10 : vector<1x10x8xf32> to vector<10x8xf32>
    %cst = arith.constant dense<0.000000e+00> : vector<10x16xf32>
    %14 = tpu.matmul %13, %12, %cst {dimension_numbers = #tpu.dot_dimension_numbers<[1], [0], [0], [1], [0, 0, 1, 1], [], []>} : vector<10x8xf32>, vector<8x16xf32>, vector<10x16xf32> -> vector<10x16xf32>
    %15 = vector.shape_cast %14 : vector<10x16xf32> to vector<1x10x16xf32>
    %16 = vector.extract_strided_slice %5 {offsets = [0, 1, 0], sizes = [1, 10, 8], strides = [1, 1, 1]} : vector<1x14x8xf32> to vector<1x10x8xf32>
    %17 = vector.extract_strided_slice %7 {offsets = [1, 0, 0], sizes = [1, 8, 16], strides = [1, 1, 1]} : vector<5x16x32xf32> to vector<1x8x16xf32>
    %18 = vector.shape_cast %17 : vector<1x8x16xf32> to vector<8x16xf32>
    %19 = vector.shape_cast %16 : vector<1x10x8xf32> to vector<10x8xf32>
    %cst_12 = arith.constant dense<0.000000e+00> : vector<10x16xf32>
    %20 = tpu.matmul %19, %18, %cst_12 {dimension_numbers = #tpu.dot_dimension_numbers<[1], [0], [0], [1], [0, 0, 1, 1], [], []>} : vector<10x8xf32>, vector<8x16xf32>, vector<10x16xf32> -> vector<10x16xf32>
    %21 = vector.shape_cast %20 : vector<10x16xf32> to vector<1x10x16xf32>
    %22 = arith.addf %15, %21 : vector<1x10x16xf32>
    %23 = vector.extract_strided_slice %5 {offsets = [0, 2, 0], sizes = [1, 10, 8], strides = [1, 1, 1]} : vector<1x14x8xf32> to vector<1x10x8xf32>
    %24 = vector.extract_strided_slice %7 {offsets = [2, 0, 0], sizes = [1, 8, 16], strides = [1, 1, 1]} : vector<5x16x32xf32> to vector<1x8x16xf32>
    %25 = vector.shape_cast %24 : vector<1x8x16xf32> to vector<8x16xf32>
    %26 = vector.shape_cast %23 : vector<1x10x8xf32> to vector<10x8xf32>
    %cst_13 = arith.constant dense<0.000000e+00> : vector<10x16xf32>
    %27 = tpu.matmul %26, %25, %cst_13 {dimension_numbers = #tpu.dot_dimension_numbers<[1], [0], [0], [1], [0, 0, 1, 1], [], []>} : vector<10x8xf32>, vector<8x16xf32>, vector<10x16xf32> -> vector<10x16xf32>
    %28 = vector.shape_cast %27 : vector<10x16xf32> to vector<1x10x16xf32>
    %29 = arith.addf %22, %28 : vector<1x10x16xf32>
    %30 = vector.extract_strided_slice %5 {offsets = [0, 3, 0], sizes = [1, 10, 8], strides = [1, 1, 1]} : vector<1x14x8xf32> to vector<1x10x8xf32>
    %31 = vector.extract_strided_slice %7 {offsets = [3, 0, 0], sizes = [1, 8, 16], strides = [1, 1, 1]} : vector<5x16x32xf32> to vector<1x8x16xf32>
    %32 = vector.shape_cast %31 : vector<1x8x16xf32> to vector<8x16xf32>
    %33 = vector.shape_cast %30 : vector<1x10x8xf32> to vector<10x8xf32>
    %cst_14 = arith.constant dense<0.000000e+00> : vector<10x16xf32>
    %34 = tpu.matmul %33, %32, %cst_14 {dimension_numbers = #tpu.dot_dimension_numbers<[1], [0], [0], [1], [0, 0, 1, 1], [], []>} : vector<10x8xf32>, vector<8x16xf32>, vector<10x16xf32> -> vector<10x16xf32>
    %35 = vector.shape_cast %34 : vector<10x16xf32> to vector<1x10x16xf32>
    %36 = arith.addf %29, %35 : vector<1x10x16xf32>
    %37 = vector.extract_strided_slice %5 {offsets = [0, 4, 0], sizes = [1, 10, 8], strides = [1, 1, 1]} : vector<1x14x8xf32> to vector<1x10x8xf32>
    %38 = vector.extract_strided_slice %7 {offsets = [4, 0, 0], sizes = [1, 8, 16], strides = [1, 1, 1]} : vector<5x16x32xf32> to vector<1x8x16xf32>
    %39 = vector.shape_cast %38 : vector<1x8x16xf32> to vector<8x16xf32>
    %40 = vector.shape_cast %37 : vector<1x10x8xf32> to vector<10x8xf32>
    %cst_15 = arith.constant dense<0.000000e+00> : vector<10x16xf32>
    %41 = tpu.matmul %40, %39, %cst_15 {dimension_numbers = #tpu.dot_dimension_numbers<[1], [0], [0], [1], [0, 0, 1, 1], [], []>} : vector<10x8xf32>, vector<8x16xf32>, vector<10x16xf32> -> vector<10x16xf32>
    %42 = vector.shape_cast %41 : vector<10x16xf32> to vector<1x10x16xf32>
    %43 = arith.addf %36, %42 : vector<1x10x16xf32>
    %c0_16 = arith.constant 0 : index
    %c0_17 = arith.constant 0 : index
    %44 = vector.load %arg3[%c0_16, %c0_17] : memref<4x32xf32, #tpu.memory_space<vmem>>, vector<1x32xf32>
    %45 = vector.extract_strided_slice %44 {offsets = [0, 0], sizes = [1, 16], strides = [1, 1]} : vector<1x32xf32> to vector<1x16xf32>
    %46 = vector.shape_cast %45 : vector<1x16xf32> to vector<1x1x16xf32>
    %47 = vector.broadcast %46 : vector<1x1x16xf32> to vector<1x10x16xf32>
    %48 = arith.addf %43, %47 : vector<1x10x16xf32>
    %cst_18 = arith.constant 0.000000e+00 : f32
    %49 = vector.broadcast %cst_18 : f32 to vector<1x10x16xf32>
    %50 = arith.cmpf ogt, %48, %49 : vector<1x10x16xf32>
    %cst_19 = arith.constant 0.00999999977 : f32
    %51 = vector.broadcast %cst_19 : f32 to vector<1x10x16xf32>
    %52 = arith.mulf %51, %48 : vector<1x10x16xf32>
    %53 = arith.select %50, %48, %52 : vector<1x10x16xi1>, vector<1x10x16xf32>
    %54 = vector.extract_strided_slice %53 {offsets = [0, 0, 0], sizes = [1, 8, 16], strides = [1, 1, 1]} : vector<1x10x16xf32> to vector<1x8x16xf32>
    %55 = vector.extract_strided_slice %9 {offsets = [0, 0, 0], sizes = [1, 16, 8], strides = [1, 1, 1]} : vector<3x32x16xf32> to vector<1x16x8xf32>
    %56 = vector.shape_cast %55 : vector<1x16x8xf32> to vector<16x8xf32>
    %57 = vector.shape_cast %54 : vector<1x8x16xf32> to vector<8x16xf32>
    %cst_20 = arith.constant dense<0.000000e+00> : vector<8x8xf32>
    %58 = tpu.matmul %57, %56, %cst_20 {dimension_numbers = #tpu.dot_dimension_numbers<[1], [0], [0], [1], [0, 0, 1, 1], [], []>} : vector<8x16xf32>, vector<16x8xf32>, vector<8x8xf32> -> vector<8x8xf32>
    %59 = vector.shape_cast %58 : vector<8x8xf32> to vector<1x8x8xf32>
    %60 = vector.extract_strided_slice %53 {offsets = [0, 1, 0], sizes = [1, 8, 16], strides = [1, 1, 1]} : vector<1x10x16xf32> to vector<1x8x16xf32>
    %61 = vector.extract_strided_slice %9 {offsets = [1, 0, 0], sizes = [1, 16, 8], strides = [1, 1, 1]} : vector<3x32x16xf32> to vector<1x16x8xf32>
    %62 = vector.shape_cast %61 : vector<1x16x8xf32> to vector<16x8xf32>
    %63 = vector.shape_cast %60 : vector<1x8x16xf32> to vector<8x16xf32>
    %cst_21 = arith.constant dense<0.000000e+00> : vector<8x8xf32>
    %64 = tpu.matmul %63, %62, %cst_21 {dimension_numbers = #tpu.dot_dimension_numbers<[1], [0], [0], [1], [0, 0, 1, 1], [], []>} : vector<8x16xf32>, vector<16x8xf32>, vector<8x8xf32> -> vector<8x8xf32>
    %65 = vector.shape_cast %64 : vector<8x8xf32> to vector<1x8x8xf32>
    %66 = arith.addf %59, %65 : vector<1x8x8xf32>
    %67 = vector.extract_strided_slice %53 {offsets = [0, 2, 0], sizes = [1, 8, 16], strides = [1, 1, 1]} : vector<1x10x16xf32> to vector<1x8x16xf32>
    %68 = vector.extract_strided_slice %9 {offsets = [2, 0, 0], sizes = [1, 16, 8], strides = [1, 1, 1]} : vector<3x32x16xf32> to vector<1x16x8xf32>
    %69 = vector.shape_cast %68 : vector<1x16x8xf32> to vector<16x8xf32>
    %70 = vector.shape_cast %67 : vector<1x8x16xf32> to vector<8x16xf32>
    %cst_22 = arith.constant dense<0.000000e+00> : vector<8x8xf32>
    %71 = tpu.matmul %70, %69, %cst_22 {dimension_numbers = #tpu.dot_dimension_numbers<[1], [0], [0], [1], [0, 0, 1, 1], [], []>} : vector<8x16xf32>, vector<16x8xf32>, vector<8x8xf32> -> vector<8x8xf32>
    %72 = vector.shape_cast %71 : vector<8x8xf32> to vector<1x8x8xf32>
    %73 = arith.addf %66, %72 : vector<1x8x8xf32>
    %c0_23 = arith.constant 0 : index
    %c0_24 = arith.constant 0 : index
    %74 = vector.load %arg5[%c0_23, %c0_24] : memref<4x16xf32, #tpu.memory_space<vmem>>, vector<1x16xf32>
    %75 = vector.extract_strided_slice %74 {offsets = [0, 0], sizes = [1, 8], strides = [1, 1]} : vector<1x16xf32> to vector<1x8xf32>
    %76 = vector.shape_cast %75 : vector<1x8xf32> to vector<1x1x8xf32>
    %77 = vector.broadcast %76 : vector<1x1x8xf32> to vector<1x8x8xf32>
    %78 = arith.addf %73, %77 : vector<1x8x8xf32>
    %79 = math.tanh %78 : vector<1x8x8xf32>
    %80 = vector.extract_strided_slice %79 {offsets = [0, 0, 0], sizes = [1, 8, 4], strides = [1, 1, 1]} : vector<1x8x8xf32> to vector<1x8x4xf32>
    %81 = math.exp %80 : vector<1x8x4xf32>
    %82 = arith.mulf %1, %81 : vector<1x8x4xf32>
    %83 = vector.extract_strided_slice %79 {offsets = [0, 0, 4], sizes = [1, 8, 4], strides = [1, 1, 1]} : vector<1x8x8xf32> to vector<1x8x4xf32>
    %84 = math.exp %83 : vector<1x8x4xf32>
    %85 = arith.mulf %0, %84 : vector<1x8x4xf32>
    %86 = tpu.concatenate %82, %85 in 2 : vector<1x8x4xf32>, vector<1x8x4xf32> -> vector<1x8x8xf32>
    %87 = vector.extract_strided_slice %86 {offsets = [0, 0, 0], sizes = [1, 1, 8], strides = [1, 1, 1]} : vector<1x8x8xf32> to vector<1x1x8xf32>
    %88 = vector.extract_strided_slice %86 {offsets = [0, 7, 0], sizes = [1, 1, 8], strides = [1, 1, 1]} : vector<1x8x8xf32> to vector<1x1x8xf32>
    %89 = tpu.concatenate %87, %87, %87, %86, %88, %88, %88 in 1 : vector<1x1x8xf32>, vector<1x1x8xf32>, vector<1x1x8xf32>, vector<1x8x8xf32>, vector<1x1x8xf32>, vector<1x1x8xf32>, vector<1x1x8xf32> -> vector<1x14x8xf32>
    %c1_25 = arith.constant 1 : index
    %c0_26 = arith.constant 0 : index
    %c0_27 = arith.constant 0 : index
    %c0_28 = arith.constant 0 : index
    %90 = vector.load %arg2[%c1_25, %c0_26, %c0_27, %c0_28] : memref<4x5x16x32xf32, #tpu.memory_space<vmem>>, vector<1x5x16x32xf32>
    %91 = vector.shape_cast %90 : vector<1x5x16x32xf32> to vector<5x16x32xf32>
    %c1_29 = arith.constant 1 : index
    %c0_30 = arith.constant 0 : index
    %c0_31 = arith.constant 0 : index
    %c0_32 = arith.constant 0 : index
    %92 = vector.load %arg4[%c1_29, %c0_30, %c0_31, %c0_32] : memref<4x3x32x16xf32, #tpu.memory_space<vmem>>, vector<1x3x32x16xf32>
    %93 = vector.shape_cast %92 : vector<1x3x32x16xf32> to vector<3x32x16xf32>
    %94 = vector.extract_strided_slice %89 {offsets = [0, 0, 0], sizes = [1, 10, 8], strides = [1, 1, 1]} : vector<1x14x8xf32> to vector<1x10x8xf32>
    %95 = vector.extract_strided_slice %91 {offsets = [0, 0, 0], sizes = [1, 8, 16], strides = [1, 1, 1]} : vector<5x16x32xf32> to vector<1x8x16xf32>
    %96 = vector.shape_cast %95 : vector<1x8x16xf32> to vector<8x16xf32>
    %97 = vector.shape_cast %94 : vector<1x10x8xf32> to vector<10x8xf32>
    %cst_33 = arith.constant dense<0.000000e+00> : vector<10x16xf32>
    %98 = tpu.matmul %97, %96, %cst_33 {dimension_numbers = #tpu.dot_dimension_numbers<[1], [0], [0], [1], [0, 0, 1, 1], [], []>} : vector<10x8xf32>, vector<8x16xf32>, vector<10x16xf32> -> vector<10x16xf32>
    %99 = vector.shape_cast %98 : vector<10x16xf32> to vector<1x10x16xf32>
    %100 = vector.extract_strided_slice %89 {offsets = [0, 1, 0], sizes = [1, 10, 8], strides = [1, 1, 1]} : vector<1x14x8xf32> to vector<1x10x8xf32>
    %101 = vector.extract_strided_slice %91 {offsets = [1, 0, 0], sizes = [1, 8, 16], strides = [1, 1, 1]} : vector<5x16x32xf32> to vector<1x8x16xf32>
    %102 = vector.shape_cast %101 : vector<1x8x16xf32> to vector<8x16xf32>
    %103 = vector.shape_cast %100 : vector<1x10x8xf32> to vector<10x8xf32>
    %cst_34 = arith.constant dense<0.000000e+00> : vector<10x16xf32>
    %104 = tpu.matmul %103, %102, %cst_34 {dimension_numbers = #tpu.dot_dimension_numbers<[1], [0], [0], [1], [0, 0, 1, 1], [], []>} : vector<10x8xf32>, vector<8x16xf32>, vector<10x16xf32> -> vector<10x16xf32>
    %105 = vector.shape_cast %104 : vector<10x16xf32> to vector<1x10x16xf32>
    %106 = arith.addf %99, %105 : vector<1x10x16xf32>
    %107 = vector.extract_strided_slice %89 {offsets = [0, 2, 0], sizes = [1, 10, 8], strides = [1, 1, 1]} : vector<1x14x8xf32> to vector<1x10x8xf32>
    %108 = vector.extract_strided_slice %91 {offsets = [2, 0, 0], sizes = [1, 8, 16], strides = [1, 1, 1]} : vector<5x16x32xf32> to vector<1x8x16xf32>
    %109 = vector.shape_cast %108 : vector<1x8x16xf32> to vector<8x16xf32>
    %110 = vector.shape_cast %107 : vector<1x10x8xf32> to vector<10x8xf32>
    %cst_35 = arith.constant dense<0.000000e+00> : vector<10x16xf32>
    %111 = tpu.matmul %110, %109, %cst_35 {dimension_numbers = #tpu.dot_dimension_numbers<[1], [0], [0], [1], [0, 0, 1, 1], [], []>} : vector<10x8xf32>, vector<8x16xf32>, vector<10x16xf32> -> vector<10x16xf32>
    %112 = vector.shape_cast %111 : vector<10x16xf32> to vector<1x10x16xf32>
    %113 = arith.addf %106, %112 : vector<1x10x16xf32>
    %114 = vector.extract_strided_slice %89 {offsets = [0, 3, 0], sizes = [1, 10, 8], strides = [1, 1, 1]} : vector<1x14x8xf32> to vector<1x10x8xf32>
    %115 = vector.extract_strided_slice %91 {offsets = [3, 0, 0], sizes = [1, 8, 16], strides = [1, 1, 1]} : vector<5x16x32xf32> to vector<1x8x16xf32>
    %116 = vector.shape_cast %115 : vector<1x8x16xf32> to vector<8x16xf32>
    %117 = vector.shape_cast %114 : vector<1x10x8xf32> to vector<10x8xf32>
    %cst_36 = arith.constant dense<0.000000e+00> : vector<10x16xf32>
    %118 = tpu.matmul %117, %116, %cst_36 {dimension_numbers = #tpu.dot_dimension_numbers<[1], [0], [0], [1], [0, 0, 1, 1], [], []>} : vector<10x8xf32>, vector<8x16xf32>, vector<10x16xf32> -> vector<10x16xf32>
    %119 = vector.shape_cast %118 : vector<10x16xf32> to vector<1x10x16xf32>
    %120 = arith.addf %113, %119 : vector<1x10x16xf32>
    %121 = vector.extract_strided_slice %89 {offsets = [0, 4, 0], sizes = [1, 10, 8], strides = [1, 1, 1]} : vector<1x14x8xf32> to vector<1x10x8xf32>
    %122 = vector.extract_strided_slice %91 {offsets = [4, 0, 0], sizes = [1, 8, 16], strides = [1, 1, 1]} : vector<5x16x32xf32> to vector<1x8x16xf32>
    %123 = vector.shape_cast %122 : vector<1x8x16xf32> to vector<8x16xf32>
    %124 = vector.shape_cast %121 : vector<1x10x8xf32> to vector<10x8xf32>
    %cst_37 = arith.constant dense<0.000000e+00> : vector<10x16xf32>
    %125 = tpu.matmul %124, %123, %cst_37 {dimension_numbers = #tpu.dot_dimension_numbers<[1], [0], [0], [1], [0, 0, 1, 1], [], []>} : vector<10x8xf32>, vector<8x16xf32>, vector<10x16xf32> -> vector<10x16xf32>
    %126 = vector.shape_cast %125 : vector<10x16xf32> to vector<1x10x16xf32>
    %127 = arith.addf %120, %126 : vector<1x10x16xf32>
    %c1_38 = arith.constant 1 : index
    %c0_39 = arith.constant 0 : index
    %128 = vector.load %arg3[%c1_38, %c0_39] : memref<4x32xf32, #tpu.memory_space<vmem>>, vector<1x32xf32>
    %129 = vector.extract_strided_slice %128 {offsets = [0, 0], sizes = [1, 16], strides = [1, 1]} : vector<1x32xf32> to vector<1x16xf32>
    %130 = vector.shape_cast %129 : vector<1x16xf32> to vector<1x1x16xf32>
    %131 = vector.broadcast %130 : vector<1x1x16xf32> to vector<1x10x16xf32>
    %132 = arith.addf %127, %131 : vector<1x10x16xf32>
    %cst_40 = arith.constant 0.000000e+00 : f32
    %133 = vector.broadcast %cst_40 : f32 to vector<1x10x16xf32>
    %134 = arith.cmpf ogt, %132, %133 : vector<1x10x16xf32>
    %cst_41 = arith.constant 0.00999999977 : f32
    %135 = vector.broadcast %cst_41 : f32 to vector<1x10x16xf32>
    %136 = arith.mulf %135, %132 : vector<1x10x16xf32>
    %137 = arith.select %134, %132, %136 : vector<1x10x16xi1>, vector<1x10x16xf32>
    %138 = vector.extract_strided_slice %137 {offsets = [0, 0, 0], sizes = [1, 8, 16], strides = [1, 1, 1]} : vector<1x10x16xf32> to vector<1x8x16xf32>
    %139 = vector.extract_strided_slice %93 {offsets = [0, 0, 0], sizes = [1, 16, 8], strides = [1, 1, 1]} : vector<3x32x16xf32> to vector<1x16x8xf32>
    %140 = vector.shape_cast %139 : vector<1x16x8xf32> to vector<16x8xf32>
    %141 = vector.shape_cast %138 : vector<1x8x16xf32> to vector<8x16xf32>
    %cst_42 = arith.constant dense<0.000000e+00> : vector<8x8xf32>
    %142 = tpu.matmul %141, %140, %cst_42 {dimension_numbers = #tpu.dot_dimension_numbers<[1], [0], [0], [1], [0, 0, 1, 1], [], []>} : vector<8x16xf32>, vector<16x8xf32>, vector<8x8xf32> -> vector<8x8xf32>
    %143 = vector.shape_cast %142 : vector<8x8xf32> to vector<1x8x8xf32>
    %144 = vector.extract_strided_slice %137 {offsets = [0, 1, 0], sizes = [1, 8, 16], strides = [1, 1, 1]} : vector<1x10x16xf32> to vector<1x8x16xf32>
    %145 = vector.extract_strided_slice %93 {offsets = [1, 0, 0], sizes = [1, 16, 8], strides = [1, 1, 1]} : vector<3x32x16xf32> to vector<1x16x8xf32>
    %146 = vector.shape_cast %145 : vector<1x16x8xf32> to vector<16x8xf32>
    %147 = vector.shape_cast %144 : vector<1x8x16xf32> to vector<8x16xf32>
    %cst_43 = arith.constant dense<0.000000e+00> : vector<8x8xf32>
    %148 = tpu.matmul %147, %146, %cst_43 {dimension_numbers = #tpu.dot_dimension_numbers<[1], [0], [0], [1], [0, 0, 1, 1], [], []>} : vector<8x16xf32>, vector<16x8xf32>, vector<8x8xf32> -> vector<8x8xf32>
    %149 = vector.shape_cast %148 : vector<8x8xf32> to vector<1x8x8xf32>
    %150 = arith.addf %143, %149 : vector<1x8x8xf32>
    %151 = vector.extract_strided_slice %137 {offsets = [0, 2, 0], sizes = [1, 8, 16], strides = [1, 1, 1]} : vector<1x10x16xf32> to vector<1x8x16xf32>
    %152 = vector.extract_strided_slice %93 {offsets = [2, 0, 0], sizes = [1, 16, 8], strides = [1, 1, 1]} : vector<3x32x16xf32> to vector<1x16x8xf32>
    %153 = vector.shape_cast %152 : vector<1x16x8xf32> to vector<16x8xf32>
    %154 = vector.shape_cast %151 : vector<1x8x16xf32> to vector<8x16xf32>
    %cst_44 = arith.constant dense<0.000000e+00> : vector<8x8xf32>
    %155 = tpu.matmul %154, %153, %cst_44 {dimension_numbers = #tpu.dot_dimension_numbers<[1], [0], [0], [1], [0, 0, 1, 1], [], []>} : vector<8x16xf32>, vector<16x8xf32>, vector<8x8xf32> -> vector<8x8xf32>
    %156 = vector.shape_cast %155 : vector<8x8xf32> to vector<1x8x8xf32>
    %157 = arith.addf %150, %156 : vector<1x8x8xf32>
    %c1_45 = arith.constant 1 : index
    %c0_46 = arith.constant 0 : index
    %158 = vector.load %arg5[%c1_45, %c0_46] : memref<4x16xf32, #tpu.memory_space<vmem>>, vector<1x16xf32>
    %159 = vector.extract_strided_slice %158 {offsets = [0, 0], sizes = [1, 8], strides = [1, 1]} : vector<1x16xf32> to vector<1x8xf32>
    %160 = vector.shape_cast %159 : vector<1x8xf32> to vector<1x1x8xf32>
    %161 = vector.broadcast %160 : vector<1x1x8xf32> to vector<1x8x8xf32>
    %162 = arith.addf %157, %161 : vector<1x8x8xf32>
    %163 = math.tanh %162 : vector<1x8x8xf32>
    %164 = vector.extract_strided_slice %163 {offsets = [0, 0, 0], sizes = [1, 8, 4], strides = [1, 1, 1]} : vector<1x8x8xf32> to vector<1x8x4xf32>
    %165 = arith.addf %85, %164 : vector<1x8x4xf32>
    %166 = vector.extract_strided_slice %163 {offsets = [0, 0, 4], sizes = [1, 8, 4], strides = [1, 1, 1]} : vector<1x8x8xf32> to vector<1x8x4xf32>
    %167 = arith.subf %82, %166 : vector<1x8x4xf32>
    %c0_47 = arith.constant 0 : index
    %c0_48 = arith.constant 0 : index
    %c0_49 = arith.constant 0 : index
    %168 = vector.load %arg7[%c0_47, %c0_48, %c0_49] : memref<1x8x8xf32, #tpu.memory_space<vmem>>, vector<1x8x4xf32>
    tpu.vector_store %arg7[%c0_47, %c0_48, %c0_49], %165 {strides = array<i32>} : memref<1x8x8xf32, #tpu.memory_space<vmem>>, vector<1x8x4xf32>,
    %c0_50 = arith.constant 0 : index
    %c0_51 = arith.constant 0 : index
    %c4 = arith.constant 4 : index
    %169 = vector.load %arg7[%c0_50, %c0_51, %c4] : memref<1x8x8xf32, #tpu.memory_space<vmem>>, vector<1x8x4xf32>
    tpu.vector_store %arg7[%c0_50, %c0_51, %c4], %167 {strides = array<i32>} : memref<1x8x8xf32, #tpu.memory_space<vmem>>, vector<1x8x4xf32>,
    %c0_52 = arith.constant 0 : index
    %c0_53 = arith.constant 0 : index
    %c0_54 = arith.constant 0 : index
    %170 = tpu.strided_load %arg7[%c0_52, %c0_53, %c0_54] {strides = array<i32: 1, 2, 1>} : memref<1x8x8xf32, #tpu.memory_space<vmem>>, vector<1x4x8xf32>
    %c0_55 = arith.constant 0 : index
    %c1_56 = arith.constant 1 : index
    %c0_57 = arith.constant 0 : index
    %171 = tpu.strided_load %arg7[%c0_55, %c1_56, %c0_57] {strides = array<i32: 1, 2, 1>} : memref<1x8x8xf32, #tpu.memory_space<vmem>>, vector<1x4x8xf32>
    %172 = tpu.concatenate %170, %171 in 2 : vector<1x4x8xf32>, vector<1x4x8xf32> -> vector<1x4x16xf32>
    %173 = vector.extract_strided_slice %172 {offsets = [0, 0, 0], sizes = [1, 1, 16], strides = [1, 1, 1]} : vector<1x4x16xf32> to vector<1x1x16xf32>
    %174 = vector.extract_strided_slice %172 {offsets = [0, 3, 0], sizes = [1, 1, 16], strides = [1, 1, 1]} : vector<1x4x16xf32> to vector<1x1x16xf32>
    %175 = tpu.concatenate %173, %173, %173, %172, %174, %174, %174 in 1 : vector<1x1x16xf32>, vector<1x1x16xf32>, vector<1x1x16xf32>, vector<1x4x16xf32>, vector<1x1x16xf32>, vector<1x1x16xf32>, vector<1x1x16xf32> -> vector<1x10x16xf32>
    %c2 = arith.constant 2 : index
    %c0_58 = arith.constant 0 : index
    %c0_59 = arith.constant 0 : index
    %c0_60 = arith.constant 0 : index
    %176 = vector.load %arg2[%c2, %c0_58, %c0_59, %c0_60] : memref<4x5x16x32xf32, #tpu.memory_space<vmem>>, vector<1x5x16x32xf32>
    %177 = vector.shape_cast %176 : vector<1x5x16x32xf32> to vector<5x16x32xf32>
    %c2_61 = arith.constant 2 : index
    %c0_62 = arith.constant 0 : index
    %c0_63 = arith.constant 0 : index
    %c0_64 = arith.constant 0 : index
    %178 = vector.load %arg4[%c2_61, %c0_62, %c0_63, %c0_64] : memref<4x3x32x16xf32, #tpu.memory_space<vmem>>, vector<1x3x32x16xf32>
    %179 = vector.shape_cast %178 : vector<1x3x32x16xf32> to vector<3x32x16xf32>
    %180 = vector.extract_strided_slice %175 {offsets = [0, 0, 0], sizes = [1, 6, 16], strides = [1, 1, 1]} : vector<1x10x16xf32> to vector<1x6x16xf32>
    %181 = vector.extract_strided_slice %177 {offsets = [0, 0, 0], sizes = [1, 16, 32], strides = [1, 1, 1]} : vector<5x16x32xf32> to vector<1x16x32xf32>
    %182 = vector.shape_cast %181 : vector<1x16x32xf32> to vector<16x32xf32>
    %183 = vector.shape_cast %180 : vector<1x6x16xf32> to vector<6x16xf32>
    %cst_65 = arith.constant dense<0.000000e+00> : vector<6x32xf32>
    %184 = tpu.matmul %183, %182, %cst_65 {dimension_numbers = #tpu.dot_dimension_numbers<[1], [0], [0], [1], [0, 0, 1, 1], [], []>} : vector<6x16xf32>, vector<16x32xf32>, vector<6x32xf32> -> vector<6x32xf32>
    %185 = vector.shape_cast %184 : vector<6x32xf32> to vector<1x6x32xf32>
    %186 = vector.extract_strided_slice %175 {offsets = [0, 1, 0], sizes = [1, 6, 16], strides = [1, 1, 1]} : vector<1x10x16xf32> to vector<1x6x16xf32>
    %187 = vector.extract_strided_slice %177 {offsets = [1, 0, 0], sizes = [1, 16, 32], strides = [1, 1, 1]} : vector<5x16x32xf32> to vector<1x16x32xf32>
    %188 = vector.shape_cast %187 : vector<1x16x32xf32> to vector<16x32xf32>
    %189 = vector.shape_cast %186 : vector<1x6x16xf32> to vector<6x16xf32>
    %cst_66 = arith.constant dense<0.000000e+00> : vector<6x32xf32>
    %190 = tpu.matmul %189, %188, %cst_66 {dimension_numbers = #tpu.dot_dimension_numbers<[1], [0], [0], [1], [0, 0, 1, 1], [], []>} : vector<6x16xf32>, vector<16x32xf32>, vector<6x32xf32> -> vector<6x32xf32>
    %191 = vector.shape_cast %190 : vector<6x32xf32> to vector<1x6x32xf32>
    %192 = arith.addf %185, %191 : vector<1x6x32xf32>
    %193 = vector.extract_strided_slice %175 {offsets = [0, 2, 0], sizes = [1, 6, 16], strides = [1, 1, 1]} : vector<1x10x16xf32> to vector<1x6x16xf32>
    %194 = vector.extract_strided_slice %177 {offsets = [2, 0, 0], sizes = [1, 16, 32], strides = [1, 1, 1]} : vector<5x16x32xf32> to vector<1x16x32xf32>
    %195 = vector.shape_cast %194 : vector<1x16x32xf32> to vector<16x32xf32>
    %196 = vector.shape_cast %193 : vector<1x6x16xf32> to vector<6x16xf32>
    %cst_67 = arith.constant dense<0.000000e+00> : vector<6x32xf32>
    %197 = tpu.matmul %196, %195, %cst_67 {dimension_numbers = #tpu.dot_dimension_numbers<[1], [0], [0], [1], [0, 0, 1, 1], [], []>} : vector<6x16xf32>, vector<16x32xf32>, vector<6x32xf32> -> vector<6x32xf32>
    %198 = vector.shape_cast %197 : vector<6x32xf32> to vector<1x6x32xf32>
    %199 = arith.addf %192, %198 : vector<1x6x32xf32>
    %200 = vector.extract_strided_slice %175 {offsets = [0, 3, 0], sizes = [1, 6, 16], strides = [1, 1, 1]} : vector<1x10x16xf32> to vector<1x6x16xf32>
    %201 = vector.extract_strided_slice %177 {offsets = [3, 0, 0], sizes = [1, 16, 32], strides = [1, 1, 1]} : vector<5x16x32xf32> to vector<1x16x32xf32>
    %202 = vector.shape_cast %201 : vector<1x16x32xf32> to vector<16x32xf32>
    %203 = vector.shape_cast %200 : vector<1x6x16xf32> to vector<6x16xf32>
    %cst_68 = arith.constant dense<0.000000e+00> : vector<6x32xf32>
    %204 = tpu.matmul %203, %202, %cst_68 {dimension_numbers = #tpu.dot_dimension_numbers<[1], [0], [0], [1], [0, 0, 1, 1], [], []>} : vector<6x16xf32>, vector<16x32xf32>, vector<6x32xf32> -> vector<6x32xf32>
    %205 = vector.shape_cast %204 : vector<6x32xf32> to vector<1x6x32xf32>
    %206 = arith.addf %199, %205 : vector<1x6x32xf32>
    %207 = vector.extract_strided_slice %175 {offsets = [0, 4, 0], sizes = [1, 6, 16], strides = [1, 1, 1]} : vector<1x10x16xf32> to vector<1x6x16xf32>
    %208 = vector.extract_strided_slice %177 {offsets = [4, 0, 0], sizes = [1, 16, 32], strides = [1, 1, 1]} : vector<5x16x32xf32> to vector<1x16x32xf32>
    %209 = vector.shape_cast %208 : vector<1x16x32xf32> to vector<16x32xf32>
    %210 = vector.shape_cast %207 : vector<1x6x16xf32> to vector<6x16xf32>
    %cst_69 = arith.constant dense<0.000000e+00> : vector<6x32xf32>
    %211 = tpu.matmul %210, %209, %cst_69 {dimension_numbers = #tpu.dot_dimension_numbers<[1], [0], [0], [1], [0, 0, 1, 1], [], []>} : vector<6x16xf32>, vector<16x32xf32>, vector<6x32xf32> -> vector<6x32xf32>
    %212 = vector.shape_cast %211 : vector<6x32xf32> to vector<1x6x32xf32>
    %213 = arith.addf %206, %212 : vector<1x6x32xf32>
    %c2_70 = arith.constant 2 : index
    %c0_71 = arith.constant 0 : index
    %214 = vector.load %arg3[%c2_70, %c0_71] : memref<4x32xf32, #tpu.memory_space<vmem>>, vector<1x32xf32>
    %215 = vector.shape_cast %214 : vector<1x32xf32> to vector<1x1x32xf32>
    %216 = vector.broadcast %215 : vector<1x1x32xf32> to vector<1x6x32xf32>
    %217 = arith.addf %213, %216 : vector<1x6x32xf32>
    %cst_72 = arith.constant 0.000000e+00 : f32
    %218 = vector.broadcast %cst_72 : f32 to vector<1x6x32xf32>
    %219 = arith.cmpf ogt, %217, %218 : vector<1x6x32xf32>
    %cst_73 = arith.constant 0.00999999977 : f32
    %220 = vector.broadcast %cst_73 : f32 to vector<1x6x32xf32>
    %221 = arith.mulf %220, %217 : vector<1x6x32xf32>
    %222 = arith.select %219, %217, %221 : vector<1x6x32xi1>, vector<1x6x32xf32>
    %223 = vector.extract_strided_slice %222 {offsets = [0, 0, 0], sizes = [1, 4, 32], strides = [1, 1, 1]} : vector<1x6x32xf32> to vector<1x4x32xf32>
    %224 = vector.extract_strided_slice %179 {offsets = [0, 0, 0], sizes = [1, 32, 16], strides = [1, 1, 1]} : vector<3x32x16xf32> to vector<1x32x16xf32>
    %225 = vector.shape_cast %224 : vector<1x32x16xf32> to vector<32x16xf32>
    %226 = vector.shape_cast %223 : vector<1x4x32xf32> to vector<4x32xf32>
    %cst_74 = arith.constant dense<0.000000e+00> : vector<4x16xf32>
    %227 = tpu.matmul %226, %225, %cst_74 {dimension_numbers = #tpu.dot_dimension_numbers<[1], [0], [0], [1], [0, 0, 1, 1], [], []>} : vector<4x32xf32>, vector<32x16xf32>, vector<4x16xf32> -> vector<4x16xf32>
    %228 = vector.shape_cast %227 : vector<4x16xf32> to vector<1x4x16xf32>
    %229 = vector.extract_strided_slice %222 {offsets = [0, 1, 0], sizes = [1, 4, 32], strides = [1, 1, 1]} : vector<1x6x32xf32> to vector<1x4x32xf32>
    %230 = vector.extract_strided_slice %179 {offsets = [1, 0, 0], sizes = [1, 32, 16], strides = [1, 1, 1]} : vector<3x32x16xf32> to vector<1x32x16xf32>
    %231 = vector.shape_cast %230 : vector<1x32x16xf32> to vector<32x16xf32>
    %232 = vector.shape_cast %229 : vector<1x4x32xf32> to vector<4x32xf32>
    %cst_75 = arith.constant dense<0.000000e+00> : vector<4x16xf32>
    %233 = tpu.matmul %232, %231, %cst_75 {dimension_numbers = #tpu.dot_dimension_numbers<[1], [0], [0], [1], [0, 0, 1, 1], [], []>} : vector<4x32xf32>, vector<32x16xf32>, vector<4x16xf32> -> vector<4x16xf32>
    %234 = vector.shape_cast %233 : vector<4x16xf32> to vector<1x4x16xf32>
    %235 = arith.addf %228, %234 : vector<1x4x16xf32>
    %236 = vector.extract_strided_slice %222 {offsets = [0, 2, 0], sizes = [1, 4, 32], strides = [1, 1, 1]} : vector<1x6x32xf32> to vector<1x4x32xf32>
    %237 = vector.extract_strided_slice %179 {offsets = [2, 0, 0], sizes = [1, 32, 16], strides = [1, 1, 1]} : vector<3x32x16xf32> to vector<1x32x16xf32>
    %238 = vector.shape_cast %237 : vector<1x32x16xf32> to vector<32x16xf32>
    %239 = vector.shape_cast %236 : vector<1x4x32xf32> to vector<4x32xf32>
    %cst_76 = arith.constant dense<0.000000e+00> : vector<4x16xf32>
    %240 = tpu.matmul %239, %238, %cst_76 {dimension_numbers = #tpu.dot_dimension_numbers<[1], [0], [0], [1], [0, 0, 1, 1], [], []>} : vector<4x32xf32>, vector<32x16xf32>, vector<4x16xf32> -> vector<4x16xf32>
    %241 = vector.shape_cast %240 : vector<4x16xf32> to vector<1x4x16xf32>
    %242 = arith.addf %235, %241 : vector<1x4x16xf32>
    %c2_77 = arith.constant 2 : index
    %c0_78 = arith.constant 0 : index
    %243 = vector.load %arg5[%c2_77, %c0_78] : memref<4x16xf32, #tpu.memory_space<vmem>>, vector<1x16xf32>
    %244 = vector.shape_cast %243 : vector<1x16xf32> to vector<1x1x16xf32>
    %245 = vector.broadcast %244 : vector<1x1x16xf32> to vector<1x4x16xf32>
    %246 = arith.addf %242, %245 : vector<1x4x16xf32>
    %247 = math.tanh %246 : vector<1x4x16xf32>
    %248 = vector.extract_strided_slice %247 {offsets = [0, 0, 0], sizes = [1, 4, 8], strides = [1, 1, 1]} : vector<1x4x16xf32> to vector<1x4x8xf32>
    %249 = math.exp %248 : vector<1x4x8xf32>
    %250 = arith.mulf %171, %249 : vector<1x4x8xf32>
    %251 = vector.extract_strided_slice %247 {offsets = [0, 0, 8], sizes = [1, 4, 8], strides = [1, 1, 1]} : vector<1x4x16xf32> to vector<1x4x8xf32>
    %252 = math.exp %251 : vector<1x4x8xf32>
    %253 = arith.mulf %170, %252 : vector<1x4x8xf32>
    %254 = tpu.concatenate %250, %253 in 2 : vector<1x4x8xf32>, vector<1x4x8xf32> -> vector<1x4x16xf32>
    %255 = vector.extract_strided_slice %254 {offsets = [0, 0, 0], sizes = [1, 1, 16], strides = [1, 1, 1]} : vector<1x4x16xf32> to vector<1x1x16xf32>
    %256 = vector.extract_strided_slice %254 {offsets = [0, 3, 0], sizes = [1, 1, 16], strides = [1, 1, 1]} : vector<1x4x16xf32> to vector<1x1x16xf32>
    %257 = tpu.concatenate %255, %255, %255, %254, %256, %256, %256 in 1 : vector<1x1x16xf32>, vector<1x1x16xf32>, vector<1x1x16xf32>, vector<1x4x16xf32>, vector<1x1x16xf32>, vector<1x1x16xf32>, vector<1x1x16xf32> -> vector<1x10x16xf32>
    %c3 = arith.constant 3 : index
    %c0_79 = arith.constant 0 : index
    %c0_80 = arith.constant 0 : index
    %c0_81 = arith.constant 0 : index
    %258 = vector.load %arg2[%c3, %c0_79, %c0_80, %c0_81] : memref<4x5x16x32xf32, #tpu.memory_space<vmem>>, vector<1x5x16x32xf32>
    %259 = vector.shape_cast %258 : vector<1x5x16x32xf32> to vector<5x16x32xf32>
    %c3_82 = arith.constant 3 : index
    %c0_83 = arith.constant 0 : index
    %c0_84 = arith.constant 0 : index
    %c0_85 = arith.constant 0 : index
    %260 = vector.load %arg4[%c3_82, %c0_83, %c0_84, %c0_85] : memref<4x3x32x16xf32, #tpu.memory_space<vmem>>, vector<1x3x32x16xf32>
    %261 = vector.shape_cast %260 : vector<1x3x32x16xf32> to vector<3x32x16xf32>
    %262 = vector.extract_strided_slice %257 {offsets = [0, 0, 0], sizes = [1, 6, 16], strides = [1, 1, 1]} : vector<1x10x16xf32> to vector<1x6x16xf32>
    %263 = vector.extract_strided_slice %259 {offsets = [0, 0, 0], sizes = [1, 16, 32], strides = [1, 1, 1]} : vector<5x16x32xf32> to vector<1x16x32xf32>
    %264 = vector.shape_cast %263 : vector<1x16x32xf32> to vector<16x32xf32>
    %265 = vector.shape_cast %262 : vector<1x6x16xf32> to vector<6x16xf32>
    %cst_86 = arith.constant dense<0.000000e+00> : vector<6x32xf32>
    %266 = tpu.matmul %265, %264, %cst_86 {dimension_numbers = #tpu.dot_dimension_numbers<[1], [0], [0], [1], [0, 0, 1, 1], [], []>} : vector<6x16xf32>, vector<16x32xf32>, vector<6x32xf32> -> vector<6x32xf32>
    %267 = vector.shape_cast %266 : vector<6x32xf32> to vector<1x6x32xf32>
    %268 = vector.extract_strided_slice %257 {offsets = [0, 1, 0], sizes = [1, 6, 16], strides = [1, 1, 1]} : vector<1x10x16xf32> to vector<1x6x16xf32>
    %269 = vector.extract_strided_slice %259 {offsets = [1, 0, 0], sizes = [1, 16, 32], strides = [1, 1, 1]} : vector<5x16x32xf32> to vector<1x16x32xf32>
    %270 = vector.shape_cast %269 : vector<1x16x32xf32> to vector<16x32xf32>
    %271 = vector.shape_cast %268 : vector<1x6x16xf32> to vector<6x16xf32>
    %cst_87 = arith.constant dense<0.000000e+00> : vector<6x32xf32>
    %272 = tpu.matmul %271, %270, %cst_87 {dimension_numbers = #tpu.dot_dimension_numbers<[1], [0], [0], [1], [0, 0, 1, 1], [], []>} : vector<6x16xf32>, vector<16x32xf32>, vector<6x32xf32> -> vector<6x32xf32>
    %273 = vector.shape_cast %272 : vector<6x32xf32> to vector<1x6x32xf32>
    %274 = arith.addf %267, %273 : vector<1x6x32xf32>
    %275 = vector.extract_strided_slice %257 {offsets = [0, 2, 0], sizes = [1, 6, 16], strides = [1, 1, 1]} : vector<1x10x16xf32> to vector<1x6x16xf32>
    %276 = vector.extract_strided_slice %259 {offsets = [2, 0, 0], sizes = [1, 16, 32], strides = [1, 1, 1]} : vector<5x16x32xf32> to vector<1x16x32xf32>
    %277 = vector.shape_cast %276 : vector<1x16x32xf32> to vector<16x32xf32>
    %278 = vector.shape_cast %275 : vector<1x6x16xf32> to vector<6x16xf32>
    %cst_88 = arith.constant dense<0.000000e+00> : vector<6x32xf32>
    %279 = tpu.matmul %278, %277, %cst_88 {dimension_numbers = #tpu.dot_dimension_numbers<[1], [0], [0], [1], [0, 0, 1, 1], [], []>} : vector<6x16xf32>, vector<16x32xf32>, vector<6x32xf32> -> vector<6x32xf32>
    %280 = vector.shape_cast %279 : vector<6x32xf32> to vector<1x6x32xf32>
    %281 = arith.addf %274, %280 : vector<1x6x32xf32>
    %282 = vector.extract_strided_slice %257 {offsets = [0, 3, 0], sizes = [1, 6, 16], strides = [1, 1, 1]} : vector<1x10x16xf32> to vector<1x6x16xf32>
    %283 = vector.extract_strided_slice %259 {offsets = [3, 0, 0], sizes = [1, 16, 32], strides = [1, 1, 1]} : vector<5x16x32xf32> to vector<1x16x32xf32>
    %284 = vector.shape_cast %283 : vector<1x16x32xf32> to vector<16x32xf32>
    %285 = vector.shape_cast %282 : vector<1x6x16xf32> to vector<6x16xf32>
    %cst_89 = arith.constant dense<0.000000e+00> : vector<6x32xf32>
    %286 = tpu.matmul %285, %284, %cst_89 {dimension_numbers = #tpu.dot_dimension_numbers<[1], [0], [0], [1], [0, 0, 1, 1], [], []>} : vector<6x16xf32>, vector<16x32xf32>, vector<6x32xf32> -> vector<6x32xf32>
    %287 = vector.shape_cast %286 : vector<6x32xf32> to vector<1x6x32xf32>
    %288 = arith.addf %281, %287 : vector<1x6x32xf32>
    %289 = vector.extract_strided_slice %257 {offsets = [0, 4, 0], sizes = [1, 6, 16], strides = [1, 1, 1]} : vector<1x10x16xf32> to vector<1x6x16xf32>
    %290 = vector.extract_strided_slice %259 {offsets = [4, 0, 0], sizes = [1, 16, 32], strides = [1, 1, 1]} : vector<5x16x32xf32> to vector<1x16x32xf32>
    %291 = vector.shape_cast %290 : vector<1x16x32xf32> to vector<16x32xf32>
    %292 = vector.shape_cast %289 : vector<1x6x16xf32> to vector<6x16xf32>
    %cst_90 = arith.constant dense<0.000000e+00> : vector<6x32xf32>
    %293 = tpu.matmul %292, %291, %cst_90 {dimension_numbers = #tpu.dot_dimension_numbers<[1], [0], [0], [1], [0, 0, 1, 1], [], []>} : vector<6x16xf32>, vector<16x32xf32>, vector<6x32xf32> -> vector<6x32xf32>
    %294 = vector.shape_cast %293 : vector<6x32xf32> to vector<1x6x32xf32>
    %295 = arith.addf %288, %294 : vector<1x6x32xf32>
    %c3_91 = arith.constant 3 : index
    %c0_92 = arith.constant 0 : index
    %296 = vector.load %arg3[%c3_91, %c0_92] : memref<4x32xf32, #tpu.memory_space<vmem>>, vector<1x32xf32>
    %297 = vector.shape_cast %296 : vector<1x32xf32> to vector<1x1x32xf32>
    %298 = vector.broadcast %297 : vector<1x1x32xf32> to vector<1x6x32xf32>
    %299 = arith.addf %295, %298 : vector<1x6x32xf32>
    %cst_93 = arith.constant 0.000000e+00 : f32
    %300 = vector.broadcast %cst_93 : f32 to vector<1x6x32xf32>
    %301 = arith.cmpf ogt, %299, %300 : vector<1x6x32xf32>
    %cst_94 = arith.constant 0.00999999977 : f32
    %302 = vector.broadcast %cst_94 : f32 to vector<1x6x32xf32>
    %303 = arith.mulf %302, %299 : vector<1x6x32xf32>
    %304 = arith.select %301, %299, %303 : vector<1x6x32xi1>, vector<1x6x32xf32>
    %305 = vector.extract_strided_slice %304 {offsets = [0, 0, 0], sizes = [1, 4, 32], strides = [1, 1, 1]} : vector<1x6x32xf32> to vector<1x4x32xf32>
    %306 = vector.extract_strided_slice %261 {offsets = [0, 0, 0], sizes = [1, 32, 16], strides = [1, 1, 1]} : vector<3x32x16xf32> to vector<1x32x16xf32>
    %307 = vector.shape_cast %306 : vector<1x32x16xf32> to vector<32x16xf32>
    %308 = vector.shape_cast %305 : vector<1x4x32xf32> to vector<4x32xf32>
    %cst_95 = arith.constant dense<0.000000e+00> : vector<4x16xf32>
    %309 = tpu.matmul %308, %307, %cst_95 {dimension_numbers = #tpu.dot_dimension_numbers<[1], [0], [0], [1], [0, 0, 1, 1], [], []>} : vector<4x32xf32>, vector<32x16xf32>, vector<4x16xf32> -> vector<4x16xf32>
    %310 = vector.shape_cast %309 : vector<4x16xf32> to vector<1x4x16xf32>
    %311 = vector.extract_strided_slice %304 {offsets = [0, 1, 0], sizes = [1, 4, 32], strides = [1, 1, 1]} : vector<1x6x32xf32> to vector<1x4x32xf32>
    %312 = vector.extract_strided_slice %261 {offsets = [1, 0, 0], sizes = [1, 32, 16], strides = [1, 1, 1]} : vector<3x32x16xf32> to vector<1x32x16xf32>
    %313 = vector.shape_cast %312 : vector<1x32x16xf32> to vector<32x16xf32>
    %314 = vector.shape_cast %311 : vector<1x4x32xf32> to vector<4x32xf32>
    %cst_96 = arith.constant dense<0.000000e+00> : vector<4x16xf32>
    %315 = tpu.matmul %314, %313, %cst_96 {dimension_numbers = #tpu.dot_dimension_numbers<[1], [0], [0], [1], [0, 0, 1, 1], [], []>} : vector<4x32xf32>, vector<32x16xf32>, vector<4x16xf32> -> vector<4x16xf32>
    %316 = vector.shape_cast %315 : vector<4x16xf32> to vector<1x4x16xf32>
    %317 = arith.addf %310, %316 : vector<1x4x16xf32>
    %318 = vector.extract_strided_slice %304 {offsets = [0, 2, 0], sizes = [1, 4, 32], strides = [1, 1, 1]} : vector<1x6x32xf32> to vector<1x4x32xf32>
    %319 = vector.extract_strided_slice %261 {offsets = [2, 0, 0], sizes = [1, 32, 16], strides = [1, 1, 1]} : vector<3x32x16xf32> to vector<1x32x16xf32>
    %320 = vector.shape_cast %319 : vector<1x32x16xf32> to vector<32x16xf32>
    %321 = vector.shape_cast %318 : vector<1x4x32xf32> to vector<4x32xf32>
    %cst_97 = arith.constant dense<0.000000e+00> : vector<4x16xf32>
    %322 = tpu.matmul %321, %320, %cst_97 {dimension_numbers = #tpu.dot_dimension_numbers<[1], [0], [0], [1], [0, 0, 1, 1], [], []>} : vector<4x32xf32>, vector<32x16xf32>, vector<4x16xf32> -> vector<4x16xf32>
    %323 = vector.shape_cast %322 : vector<4x16xf32> to vector<1x4x16xf32>
    %324 = arith.addf %317, %323 : vector<1x4x16xf32>
    %c3_98 = arith.constant 3 : index
    %c0_99 = arith.constant 0 : index
    %325 = vector.load %arg5[%c3_98, %c0_99] : memref<4x16xf32, #tpu.memory_space<vmem>>, vector<1x16xf32>
    %326 = vector.shape_cast %325 : vector<1x16xf32> to vector<1x1x16xf32>
    %327 = vector.broadcast %326 : vector<1x1x16xf32> to vector<1x4x16xf32>
    %328 = arith.addf %324, %327 : vector<1x4x16xf32>
    %329 = math.tanh %328 : vector<1x4x16xf32>
    %330 = vector.extract_strided_slice %329 {offsets = [0, 0, 0], sizes = [1, 4, 8], strides = [1, 1, 1]} : vector<1x4x16xf32> to vector<1x4x8xf32>
    %331 = arith.addf %253, %330 : vector<1x4x8xf32>
    %332 = vector.extract_strided_slice %329 {offsets = [0, 0, 8], sizes = [1, 4, 8], strides = [1, 1, 1]} : vector<1x4x16xf32> to vector<1x4x8xf32>
    %333 = arith.subf %250, %332 : vector<1x4x8xf32>
    %334 = vector.extract_strided_slice %331 {offsets = [0, 0, 0], sizes = [1, 1, 8], strides = [1, 1, 1]} : vector<1x4x8xf32> to vector<1x1x8xf32>
    %335 = vector.extract_strided_slice %333 {offsets = [0, 0, 0], sizes = [1, 1, 8], strides = [1, 1, 1]} : vector<1x4x8xf32> to vector<1x1x8xf32>
    %336 = vector.extract_strided_slice %331 {offsets = [0, 1, 0], sizes = [1, 1, 8], strides = [1, 1, 1]} : vector<1x4x8xf32> to vector<1x1x8xf32>
    %337 = vector.extract_strided_slice %333 {offsets = [0, 1, 0], sizes = [1, 1, 8], strides = [1, 1, 1]} : vector<1x4x8xf32> to vector<1x1x8xf32>
    %338 = vector.extract_strided_slice %331 {offsets = [0, 2, 0], sizes = [1, 1, 8], strides = [1, 1, 1]} : vector<1x4x8xf32> to vector<1x1x8xf32>
    %339 = vector.extract_strided_slice %333 {offsets = [0, 2, 0], sizes = [1, 1, 8], strides = [1, 1, 1]} : vector<1x4x8xf32> to vector<1x1x8xf32>
    %340 = vector.extract_strided_slice %331 {offsets = [0, 3, 0], sizes = [1, 1, 8], strides = [1, 1, 1]} : vector<1x4x8xf32> to vector<1x1x8xf32>
    %341 = vector.extract_strided_slice %333 {offsets = [0, 3, 0], sizes = [1, 1, 8], strides = [1, 1, 1]} : vector<1x4x8xf32> to vector<1x1x8xf32>
    %342 = tpu.concatenate %334, %335, %336, %337, %338, %339, %340, %341 in 2 : vector<1x1x8xf32>, vector<1x1x8xf32>, vector<1x1x8xf32>, vector<1x1x8xf32>, vector<1x1x8xf32>, vector<1x1x8xf32>, vector<1x1x8xf32>, vector<1x1x8xf32> -> vector<1x1x64xf32>
    %c0_100 = arith.constant 0 : index
    %c0_101 = arith.constant 0 : index
    %c0_102 = arith.constant 0 : index
    %343 = vector.load %arg6[%c0_100, %c0_101, %c0_102] : memref<1x1x64xf32, #tpu.memory_space<vmem>>, vector<1x1x64xf32>
    tpu.vector_store %arg6[%c0_100, %c0_101, %c0_102], %342 {strides = array<i32>} : memref<1x1x64xf32, #tpu.memory_space<vmem>>, vector<1x1x64xf32>,
    return
  }
  func.func @transform_0(%arg0: i32) -> (i32, i32, i32) {
    %c0_i32 = arith.constant 0 : i32
    %c0_i32_0 = arith.constant 0 : i32
    %c0_i32_1 = arith.constant 0 : i32
    return %arg0, %c0_i32, %c0_i32_0 : i32, i32, i32
  }
  func.func @transform_1(%arg0: i32) -> (i32, i32, i32, i32) {
    %c0_i32 = arith.constant 0 : i32
    %c0_i32_0 = arith.constant 0 : i32
    %c0_i32_1 = arith.constant 0 : i32
    %c0_i32_2 = arith.constant 0 : i32
    %c0_i32_3 = arith.constant 0 : i32
    return %c0_i32, %c0_i32_0, %c0_i32_1, %c0_i32_2 : i32, i32, i32, i32
  }
  func.func @transform_2(%arg0: i32) -> (i32, i32) {
    %c0_i32 = arith.constant 0 : i32
    %c0_i32_0 = arith.constant 0 : i32
    %c0_i32_1 = arith.constant 0 : i32
    return %c0_i32, %c0_i32_0 : i32, i32
  }
  func.func @transform_3(%arg0: i32) -> (i32, i32, i32, i32) {
    %c0_i32 = arith.constant 0 : i32
    %c0_i32_0 = arith.constant 0 : i32
    %c0_i32_1 = arith.constant 0 : i32
    %c0_i32_2 = arith.constant 0 : i32
    %c0_i32_3 = arith.constant 0 : i32
    return %c0_i32, %c0_i32_0, %c0_i32_1, %c0_i32_2 : i32, i32, i32, i32
  }
  func.func @transform_4(%arg0: i32) -> (i32, i32) {
    %c0_i32 = arith.constant 0 : i32
    %c0_i32_0 = arith.constant 0 : i32
    %c0_i32_1 = arith.constant 0 : i32
    return %c0_i32, %c0_i32_0 : i32, i32
  }
  func.func @transform_5(%arg0: i32) -> (i32, i32, i32) {
    %c0_i32 = arith.constant 0 : i32
    %c0_i32_0 = arith.constant 0 : i32
    %c0_i32_1 = arith.constant 0 : i32
    return %arg0, %c0_i32, %c0_i32_0 : i32, i32, i32
  }
}

module attributes {stable_mosaic.version = 11 : i64} {
  func.func @tree_kernel(%arg0: i32, %arg1: memref<1x16x4xf32, #tpu.memory_space<vmem>>, %arg2: memref<4x5x16x32xf32, #tpu.memory_space<vmem>>, %arg3: memref<4x32xf32, #tpu.memory_space<vmem>>, %arg4: memref<4x3x32x16xf32, #tpu.memory_space<vmem>>, %arg5: memref<4x16xf32, #tpu.memory_space<vmem>>, %arg6: memref<1x1x64xf32, #tpu.memory_space<vmem>>, %arg7: memref<1x8x8xf32, #tpu.memory_space<vmem>>) attributes {dimension_semantics = [#tpu.dimension_semantics<parallel>], iteration_bounds = array<i64: 2>, scalar_prefetch = 0 : i64, scratch_operands = 1 : i64, tpu.core_type = #tpu.core_type<tc>, window_params = [{transform_indices = @transform_0, window_bounds = array<i64: 1, 16, 4>}, {pipeline_mode = #tpu.pipeline_mode<synchronous>, transform_indices = @transform_1, window_bounds = array<i64: 4, 5, 16, 32>}, {pipeline_mode = #tpu.pipeline_mode<synchronous>, transform_indices = @transform_2, window_bounds = array<i64: 4, 32>}, {pipeline_mode = #tpu.pipeline_mode<synchronous>, transform_indices = @transform_3, window_bounds = array<i64: 4, 3, 32, 16>}, {pipeline_mode = #tpu.pipeline_mode<synchronous>, transform_indices = @transform_4, window_bounds = array<i64: 4, 16>}, {transform_indices = @transform_5, window_bounds = array<i64: 1, 1, 64>}]} {
    %c0 = arith.constant 0 : index
    %c0_0 = arith.constant 0 : index
    %c0_1 = arith.constant 0 : index
    %0 = tpu.strided_load %arg1[%c0, %c0_0, %c0_1] {strides = array<i32: 1, 2, 1>} : memref<1x16x4xf32, #tpu.memory_space<vmem>>, vector<1x8x4xf32>
    %c0_2 = arith.constant 0 : index
    %c1 = arith.constant 1 : index
    %c0_3 = arith.constant 0 : index
    %1 = tpu.strided_load %arg1[%c0_2, %c1, %c0_3] {strides = array<i32: 1, 2, 1>} : memref<1x16x4xf32, #tpu.memory_space<vmem>>, vector<1x8x4xf32>
    %2 = tpu.concatenate %0, %1 in 2 : vector<1x8x4xf32>, vector<1x8x4xf32> -> vector<1x8x8xf32>
    %3 = vector.extract_strided_slice %2 {offsets = [0, 0, 0], sizes = [1, 1, 8], strides = [1, 1, 1]} : vector<1x8x8xf32> to vector<1x1x8xf32>
    %4 = vector.extract_strided_slice %2 {offsets = [0, 7, 0], sizes = [1, 1, 8], strides = [1, 1, 1]} : vector<1x8x8xf32> to vector<1x1x8xf32>
    %5 = tpu.concatenate %3, %3, %3, %2, %4, %4, %4 in 1 : vector<1x1x8xf32>, vector<1x1x8xf32>, vector<1x1x8xf32>, vector<1x8x8xf32>, vector<1x1x8xf32>, vector<1x1x8xf32>, vector<1x1x8xf32> -> vector<1x14x8xf32>
    %c0_4 = arith.constant 0 : index
    %c0_5 = arith.constant 0 : index
    %c0_6 = arith.constant 0 : index
    %c0_7 = arith.constant 0 : index
    %6 = vector.load %arg2[%c0_4, %c0_5, %c0_6, %c0_7] : memref<4x5x16x32xf32, #tpu.memory_space<vmem>>, vector<1x5x16x32xf32>
    %7 = vector.shape_cast %6 : vector<1x5x16x32xf32> to vector<5x16x32xf32>
    %c0_8 = arith.constant 0 : index
    %c0_9 = arith.constant 0 : index
    %c0_10 = arith.constant 0 : index
    %c0_11 = arith.constant 0 : index
    %8 = vector.load %arg4[%c0_8, %c0_9, %c0_10, %c0_11] : memref<4x3x32x16xf32, #tpu.memory_space<vmem>>, vector<1x3x32x16xf32>
    %9 = vector.shape_cast %8 : vector<1x3x32x16xf32> to vector<3x32x16xf32>
    %10 = vector.extract_strided_slice %5 {offsets = [0, 0, 0], sizes = [1, 10, 8], strides = [1, 1, 1]} : vector<1x14x8xf32> to vector<1x10x8xf32>
    %11 = vector.extract_strided_slice %7 {offsets = [0, 0, 0], sizes = [1, 8, 16], strides = [1, 1, 1]} : vector<5x16x32xf32> to vector<1x8x16xf32>
    %12 = vector.shape_cast %11 : vector<1x8x16xf32> to vector<8x16xf32>
    %13 = vector.shape_cast %10 : vector<1x10x8xf32> to vector<10x8xf32>
    %cst = arith.constant dense<0.000000e+00> : vector<10x16xf32>
    %14 = tpu.matmul %13, %12, %cst {dimension_numbers = #tpu.dot_dimension_numbers<[1], [0], [0], [1], [0, 0, 1, 1], [], []>} : vector<10x8xf32>, vector<8x16xf32>, vector<10x16xf32> -> vector<10x16xf32>
    %15 = vector.shape_cast %14 : vector<10x16xf32> to vector<1x10x16xf32>
    %16 = vector.extract_strided_slice %5 {offsets = [0, 1, 0], sizes = [1, 10, 8], strides = [1, 1, 1]} : vector<1x14x8xf32> to vector<1x10x8xf32>
    %17 = vector.extract_strided_slice %7 {offsets = [1, 0, 0], sizes = [1, 8, 16], strides = [1, 1, 1]} : vector<5x16x32xf32> to vector<1x8x16xf32>
    %18 = vector.shape_cast %17 : vector<1x8x16xf32> to vector<8x16xf32>
    %19 = vector.shape_cast %16 : vector<1x10x8xf32> to vector<10x8xf32>
    %cst_12 = arith.constant dense<0.000000e+00> : vector<10x16xf32>
    %20 = tpu.matmul %19, %18, %cst_12 {dimension_numbers = #tpu.dot_dimension_numbers<[1], [0], [0], [1], [0, 0, 1, 1], [], []>} : vector<10x8xf32>, vector<8x16xf32>, vector<10x16xf32> -> vector<10x16xf32>
    %21 = vector.shape_cast %20 : vector<10x16xf32> to vector<1x10x16xf32>
    %22 = arith.addf %15, %21 : vector<1x10x16xf32>
    %23 = vector.extract_strided_slice %5 {offsets = [0, 2, 0], sizes = [1, 10, 8], strides = [1, 1, 1]} : vector<1x14x8xf32> to vector<1x10x8xf32>
    %24 = vector.extract_strided_slice %7 {offsets = [2, 0, 0], sizes = [1, 8, 16], strides = [1, 1, 1]} : vector<5x16x32xf32> to vector<1x8x16xf32>
    %25 = vector.shape_cast %24 : vector<1x8x16xf32> to vector<8x16xf32>
    %26 = vector.shape_cast %23 : vector<1x10x8xf32> to vector<10x8xf32>
    %cst_13 = arith.constant dense<0.000000e+00> : vector<10x16xf32>
    %27 = tpu.matmul %26, %25, %cst_13 {dimension_numbers = #tpu.dot_dimension_numbers<[1], [0], [0], [1], [0, 0, 1, 1], [], []>} : vector<10x8xf32>, vector<8x16xf32>, vector<10x16xf32> -> vector<10x16xf32>
    %28 = vector.shape_cast %27 : vector<10x16xf32> to vector<1x10x16xf32>
    %29 = arith.addf %22, %28 : vector<1x10x16xf32>
    %30 = vector.extract_strided_slice %5 {offsets = [0, 3, 0], sizes = [1, 10, 8], strides = [1, 1, 1]} : vector<1x14x8xf32> to vector<1x10x8xf32>
    %31 = vector.extract_strided_slice %7 {offsets = [3, 0, 0], sizes = [1, 8, 16], strides = [1, 1, 1]} : vector<5x16x32xf32> to vector<1x8x16xf32>
    %32 = vector.shape_cast %31 : vector<1x8x16xf32> to vector<8x16xf32>
    %33 = vector.shape_cast %30 : vector<1x10x8xf32> to vector<10x8xf32>
    %cst_14 = arith.constant dense<0.000000e+00> : vector<10x16xf32>
    %34 = tpu.matmul %33, %32, %cst_14 {dimension_numbers = #tpu.dot_dimension_numbers<[1], [0], [0], [1], [0, 0, 1, 1], [], []>} : vector<10x8xf32>, vector<8x16xf32>, vector<10x16xf32> -> vector<10x16xf32>
    %35 = vector.shape_cast %34 : vector<10x16xf32> to vector<1x10x16xf32>
    %36 = arith.addf %29, %35 : vector<1x10x16xf32>
    %37 = vector.extract_strided_slice %5 {offsets = [0, 4, 0], sizes = [1, 10, 8], strides = [1, 1, 1]} : vector<1x14x8xf32> to vector<1x10x8xf32>
    %38 = vector.extract_strided_slice %7 {offsets = [4, 0, 0], sizes = [1, 8, 16], strides = [1, 1, 1]} : vector<5x16x32xf32> to vector<1x8x16xf32>
    %39 = vector.shape_cast %38 : vector<1x8x16xf32> to vector<8x16xf32>
    %40 = vector.shape_cast %37 : vector<1x10x8xf32> to vector<10x8xf32>
    %cst_15 = arith.constant dense<0.000000e+00> : vector<10x16xf32>
    %41 = tpu.matmul %40, %39, %cst_15 {dimension_numbers = #tpu.dot_dimension_numbers<[1], [0], [0], [1], [0, 0, 1, 1], [], []>} : vector<10x8xf32>, vector<8x16xf32>, vector<10x16xf32> -> vector<10x16xf32>
    %42 = vector.shape_cast %41 : vector<10x16xf32> to vector<1x10x16xf32>
    %43 = arith.addf %36, %42 : vector<1x10x16xf32>
    %c0_16 = arith.constant 0 : index
    %c0_17 = arith.constant 0 : index
    %44 = vector.load %arg3[%c0_16, %c0_17] : memref<4x32xf32, #tpu.memory_space<vmem>>, vector<1x32xf32>
    %45 = vector.extract_strided_slice %44 {offsets = [0, 0], sizes = [1, 16], strides = [1, 1]} : vector<1x32xf32> to vector<1x16xf32>
    %46 = vector.shape_cast %45 : vector<1x16xf32> to vector<1x1x16xf32>
    %47 = vector.broadcast %46 : vector<1x1x16xf32> to vector<1x10x16xf32>
    %48 = arith.addf %43, %47 : vector<1x10x16xf32>
    %cst_18 = arith.constant 0.000000e+00 : f32
    %49 = vector.broadcast %cst_18 : f32 to vector<1x10x16xf32>
    %50 = arith.cmpf ogt, %48, %49 : vector<1x10x16xf32>
    %cst_19 = arith.constant 0.00999999977 : f32
    %51 = vector.broadcast %cst_19 : f32 to vector<1x10x16xf32>
    %52 = arith.mulf %51, %48 : vector<1x10x16xf32>
    %53 = arith.select %50, %48, %52 : vector<1x10x16xi1>, vector<1x10x16xf32>
    %54 = vector.extract_strided_slice %53 {offsets = [0, 0, 0], sizes = [1, 8, 16], strides = [1, 1, 1]} : vector<1x10x16xf32> to vector<1x8x16xf32>
    %55 = vector.extract_strided_slice %9 {offsets = [0, 0, 0], sizes = [1, 16, 8], strides = [1, 1, 1]} : vector<3x32x16xf32> to vector<1x16x8xf32>
    %56 = vector.shape_cast %55 : vector<1x16x8xf32> to vector<16x8xf32>
    %57 = vector.shape_cast %54 : vector<1x8x16xf32> to vector<8x16xf32>
    %cst_20 = arith.constant dense<0.000000e+00> : vector<8x8xf32>
    %58 = tpu.matmul %57, %56, %cst_20 {dimension_numbers = #tpu.dot_dimension_numbers<[1], [0], [0], [1], [0, 0, 1, 1], [], []>} : vector<8x16xf32>, vector<16x8xf32>, vector<8x8xf32> -> vector<8x8xf32>
    %59 = vector.shape_cast %58 : vector<8x8xf32> to vector<1x8x8xf32>
    %60 = vector.extract_strided_slice %53 {offsets = [0, 1, 0], sizes = [1, 8, 16], strides = [1, 1, 1]} : vector<1x10x16xf32> to vector<1x8x16xf32>
    %61 = vector.extract_strided_slice %9 {offsets = [1, 0, 0], sizes = [1, 16, 8], strides = [1, 1, 1]} : vector<3x32x16xf32> to vector<1x16x8xf32>
    %62 = vector.shape_cast %61 : vector<1x16x8xf32> to vector<16x8xf32>
    %63 = vector.shape_cast %60 : vector<1x8x16xf32> to vector<8x16xf32>
    %cst_21 = arith.constant dense<0.000000e+00> : vector<8x8xf32>
    %64 = tpu.matmul %63, %62, %cst_21 {dimension_numbers = #tpu.dot_dimension_numbers<[1], [0], [0], [1], [0, 0, 1, 1], [], []>} : vector<8x16xf32>, vector<16x8xf32>, vector<8x8xf32> -> vector<8x8xf32>
    %65 = vector.shape_cast %64 : vector<8x8xf32> to vector<1x8x8xf32>
    %66 = arith.addf %59, %65 : vector<1x8x8xf32>
    %67 = vector.extract_strided_slice %53 {offsets = [0, 2, 0], sizes = [1, 8, 16], strides = [1, 1, 1]} : vector<1x10x16xf32> to vector<1x8x16xf32>
    %68 = vector.extract_strided_slice %9 {offsets = [2, 0, 0], sizes = [1, 16, 8], strides = [1, 1, 1]} : vector<3x32x16xf32> to vector<1x16x8xf32>
    %69 = vector.shape_cast %68 : vector<1x16x8xf32> to vector<16x8xf32>
    %70 = vector.shape_cast %67 : vector<1x8x16xf32> to vector<8x16xf32>
    %cst_22 = arith.constant dense<0.000000e+00> : vector<8x8xf32>
    %71 = tpu.matmul %70, %69, %cst_22 {dimension_numbers = #tpu.dot_dimension_numbers<[1], [0], [0], [1], [0, 0, 1, 1], [], []>} : vector<8x16xf32>, vector<16x8xf32>, vector<8x8xf32> -> vector<8x8xf32>
    %72 = vector.shape_cast %71 : vector<8x8xf32> to vector<1x8x8xf32>
    %73 = arith.addf %66, %72 : vector<1x8x8xf32>
    %c0_23 = arith.constant 0 : index
    %c0_24 = arith.constant 0 : index
    %74 = vector.load %arg5[%c0_23, %c0_24] : memref<4x16xf32, #tpu.memory_space<vmem>>, vector<1x16xf32>
    %75 = vector.extract_strided_slice %74 {offsets = [0, 0], sizes = [1, 8], strides = [1, 1]} : vector<1x16xf32> to vector<1x8xf32>
    %76 = vector.shape_cast %75 : vector<1x8xf32> to vector<1x1x8xf32>
    %77 = vector.broadcast %76 : vector<1x1x8xf32> to vector<1x8x8xf32>
    %78 = arith.addf %73, %77 : vector<1x8x8xf32>
    %79 = math.tanh %78 : vector<1x8x8xf32>
    %80 = vector.extract_strided_slice %79 {offsets = [0, 0, 0], sizes = [1, 8, 4], strides = [1, 1, 1]} : vector<1x8x8xf32> to vector<1x8x4xf32>
    %81 = math.exp %80 : vector<1x8x4xf32>
    %82 = arith.mulf %1, %81 : vector<1x8x4xf32>
    %83 = vector.extract_strided_slice %79 {offsets = [0, 0, 4], sizes = [1, 8, 4], strides = [1, 1, 1]} : vector<1x8x8xf32> to vector<1x8x4xf32>
    %84 = math.exp %83 : vector<1x8x4xf32>
    %85 = arith.mulf %0, %84 : vector<1x8x4xf32>
    %86 = tpu.concatenate %82, %85 in 2 : vector<1x8x4xf32>, vector<1x8x4xf32> -> vector<1x8x8xf32>
    %87 = vector.extract_strided_slice %86 {offsets = [0, 0, 0], sizes = [1, 1, 8], strides = [1, 1, 1]} : vector<1x8x8xf32> to vector<1x1x8xf32>
    %88 = vector.extract_strided_slice %86 {offsets = [0, 7, 0], sizes = [1, 1, 8], strides = [1, 1, 1]} : vector<1x8x8xf32> to vector<1x1x8xf32>
    %89 = tpu.concatenate %87, %87, %87, %86, %88, %88, %88 in 1 : vector<1x1x8xf32>, vector<1x1x8xf32>, vector<1x1x8xf32>, vector<1x8x8xf32>, vector<1x1x8xf32>, vector<1x1x8xf32>, vector<1x1x8xf32> -> vector<1x14x8xf32>
    %c1_25 = arith.constant 1 : index
    %c0_26 = arith.constant 0 : index
    %c0_27 = arith.constant 0 : index
    %c0_28 = arith.constant 0 : index
    %90 = vector.load %arg2[%c1_25, %c0_26, %c0_27, %c0_28] : memref<4x5x16x32xf32, #tpu.memory_space<vmem>>, vector<1x5x16x32xf32>
    %91 = vector.shape_cast %90 : vector<1x5x16x32xf32> to vector<5x16x32xf32>
    %c1_29 = arith.constant 1 : index
    %c0_30 = arith.constant 0 : index
    %c0_31 = arith.constant 0 : index
    %c0_32 = arith.constant 0 : index
    %92 = vector.load %arg4[%c1_29, %c0_30, %c0_31, %c0_32] : memref<4x3x32x16xf32, #tpu.memory_space<vmem>>, vector<1x3x32x16xf32>
    %93 = vector.shape_cast %92 : vector<1x3x32x16xf32> to vector<3x32x16xf32>
    %94 = vector.extract_strided_slice %89 {offsets = [0, 0, 0], sizes = [1, 10, 8], strides = [1, 1, 1]} : vector<1x14x8xf32> to vector<1x10x8xf32>
    %95 = vector.extract_strided_slice %91 {offsets = [0, 0, 0], sizes = [1, 8, 16], strides = [1, 1, 1]} : vector<5x16x32xf32> to vector<1x8x16xf32>
    %96 = vector.shape_cast %95 : vector<1x8x16xf32> to vector<8x16xf32>
    %97 = vector.shape_cast %94 : vector<1x10x8xf32> to vector<10x8xf32>
    %cst_33 = arith.constant dense<0.000000e+00> : vector<10x16xf32>
    %98 = tpu.matmul %97, %96, %cst_33 {dimension_numbers = #tpu.dot_dimension_numbers<[1], [0], [0], [1], [0, 0, 1, 1], [], []>} : vector<10x8xf32>, vector<8x16xf32>, vector<10x16xf32> -> vector<10x16xf32>
    %99 = vector.shape_cast %98 : vector<10x16xf32> to vector<1x10x16xf32>
    %100 = vector.extract_strided_slice %89 {offsets = [0, 1, 0], sizes = [1, 10, 8], strides = [1, 1, 1]} : vector<1x14x8xf32> to vector<1x10x8xf32>
    %101 = vector.extract_strided_slice %91 {offsets = [1, 0, 0], sizes = [1, 8, 16], strides = [1, 1, 1]} : vector<5x16x32xf32> to vector<1x8x16xf32>
    %102 = vector.shape_cast %101 : vector<1x8x16xf32> to vector<8x16xf32>
    %103 = vector.shape_cast %100 : vector<1x10x8xf32> to vector<10x8xf32>
    %cst_34 = arith.constant dense<0.000000e+00> : vector<10x16xf32>
    %104 = tpu.matmul %103, %102, %cst_34 {dimension_numbers = #tpu.dot_dimension_numbers<[1], [0], [0], [1], [0, 0, 1, 1], [], []>} : vector<10x8xf32>, vector<8x16xf32>, vector<10x16xf32> -> vector<10x16xf32>
    %105 = vector.shape_cast %104 : vector<10x16xf32> to vector<1x10x16xf32>
    %106 = arith.addf %99, %105 : vector<1x10x16xf32>
    %107 = vector.extract_strided_slice %89 {offsets = [0, 2, 0], sizes = [1, 10, 8], strides = [1, 1, 1]} : vector<1x14x8xf32> to vector<1x10x8xf32>
    %108 = vector.extract_strided_slice %91 {offsets = [2, 0, 0], sizes = [1, 8, 16], strides = [1, 1, 1]} : vector<5x16x32xf32> to vector<1x8x16xf32>
    %109 = vector.shape_cast %108 : vector<1x8x16xf32> to vector<8x16xf32>
    %110 = vector.shape_cast %107 : vector<1x10x8xf32> to vector<10x8xf32>
    %cst_35 = arith.constant dense<0.000000e+00> : vector<10x16xf32>
    %111 = tpu.matmul %110, %109, %cst_35 {dimension_numbers = #tpu.dot_dimension_numbers<[1], [0], [0], [1], [0, 0, 1, 1], [], []>} : vector<10x8xf32>, vector<8x16xf32>, vector<10x16xf32> -> vector<10x16xf32>
    %112 = vector.shape_cast %111 : vector<10x16xf32> to vector<1x10x16xf32>
    %113 = arith.addf %106, %112 : vector<1x10x16xf32>
    %114 = vector.extract_strided_slice %89 {offsets = [0, 3, 0], sizes = [1, 10, 8], strides = [1, 1, 1]} : vector<1x14x8xf32> to vector<1x10x8xf32>
    %115 = vector.extract_strided_slice %91 {offsets = [3, 0, 0], sizes = [1, 8, 16], strides = [1, 1, 1]} : vector<5x16x32xf32> to vector<1x8x16xf32>
    %116 = vector.shape_cast %115 : vector<1x8x16xf32> to vector<8x16xf32>
    %117 = vector.shape_cast %114 : vector<1x10x8xf32> to vector<10x8xf32>
    %cst_36 = arith.constant dense<0.000000e+00> : vector<10x16xf32>
    %118 = tpu.matmul %117, %116, %cst_36 {dimension_numbers = #tpu.dot_dimension_numbers<[1], [0], [0], [1], [0, 0, 1, 1], [], []>} : vector<10x8xf32>, vector<8x16xf32>, vector<10x16xf32> -> vector<10x16xf32>
    %119 = vector.shape_cast %118 : vector<10x16xf32> to vector<1x10x16xf32>
    %120 = arith.addf %113, %119 : vector<1x10x16xf32>
    %121 = vector.extract_strided_slice %89 {offsets = [0, 4, 0], sizes = [1, 10, 8], strides = [1, 1, 1]} : vector<1x14x8xf32> to vector<1x10x8xf32>
    %122 = vector.extract_strided_slice %91 {offsets = [4, 0, 0], sizes = [1, 8, 16], strides = [1, 1, 1]} : vector<5x16x32xf32> to vector<1x8x16xf32>
    %123 = vector.shape_cast %122 : vector<1x8x16xf32> to vector<8x16xf32>
    %124 = vector.shape_cast %121 : vector<1x10x8xf32> to vector<10x8xf32>
    %cst_37 = arith.constant dense<0.000000e+00> : vector<10x16xf32>
    %125 = tpu.matmul %124, %123, %cst_37 {dimension_numbers = #tpu.dot_dimension_numbers<[1], [0], [0], [1], [0, 0, 1, 1], [], []>} : vector<10x8xf32>, vector<8x16xf32>, vector<10x16xf32> -> vector<10x16xf32>
    %126 = vector.shape_cast %125 : vector<10x16xf32> to vector<1x10x16xf32>
    %127 = arith.addf %120, %126 : vector<1x10x16xf32>
    %c1_38 = arith.constant 1 : index
    %c0_39 = arith.constant 0 : index
    %128 = vector.load %arg3[%c1_38, %c0_39] : memref<4x32xf32, #tpu.memory_space<vmem>>, vector<1x32xf32>
    %129 = vector.extract_strided_slice %128 {offsets = [0, 0], sizes = [1, 16], strides = [1, 1]} : vector<1x32xf32> to vector<1x16xf32>
    %130 = vector.shape_cast %129 : vector<1x16xf32> to vector<1x1x16xf32>
    %131 = vector.broadcast %130 : vector<1x1x16xf32> to vector<1x10x16xf32>
    %132 = arith.addf %127, %131 : vector<1x10x16xf32>
    %cst_40 = arith.constant 0.000000e+00 : f32
    %133 = vector.broadcast %cst_40 : f32 to vector<1x10x16xf32>
    %134 = arith.cmpf ogt, %132, %133 : vector<1x10x16xf32>
    %cst_41 = arith.constant 0.00999999977 : f32
    %135 = vector.broadcast %cst_41 : f32 to vector<1x10x16xf32>
    %136 = arith.mulf %135, %132 : vector<1x10x16xf32>
    %137 = arith.select %134, %132, %136 : vector<1x10x16xi1>, vector<1x10x16xf32>
    %138 = vector.extract_strided_slice %137 {offsets = [0, 0, 0], sizes = [1, 8, 16], strides = [1, 1, 1]} : vector<1x10x16xf32> to vector<1x8x16xf32>
    %139 = vector.extract_strided_slice %93 {offsets = [0, 0, 0], sizes = [1, 16, 8], strides = [1, 1, 1]} : vector<3x32x16xf32> to vector<1x16x8xf32>
    %140 = vector.shape_cast %139 : vector<1x16x8xf32> to vector<16x8xf32>
    %141 = vector.shape_cast %138 : vector<1x8x16xf32> to vector<8x16xf32>
    %cst_42 = arith.constant dense<0.000000e+00> : vector<8x8xf32>
    %142 = tpu.matmul %141, %140, %cst_42 {dimension_numbers = #tpu.dot_dimension_numbers<[1], [0], [0], [1], [0, 0, 1, 1], [], []>} : vector<8x16xf32>, vector<16x8xf32>, vector<8x8xf32> -> vector<8x8xf32>
    %143 = vector.shape_cast %142 : vector<8x8xf32> to vector<1x8x8xf32>
    %144 = vector.extract_strided_slice %137 {offsets = [0, 1, 0], sizes = [1, 8, 16], strides = [1, 1, 1]} : vector<1x10x16xf32> to vector<1x8x16xf32>
    %145 = vector.extract_strided_slice %93 {offsets = [1, 0, 0], sizes = [1, 16, 8], strides = [1, 1, 1]} : vector<3x32x16xf32> to vector<1x16x8xf32>
    %146 = vector.shape_cast %145 : vector<1x16x8xf32> to vector<16x8xf32>
    %147 = vector.shape_cast %144 : vector<1x8x16xf32> to vector<8x16xf32>
    %cst_43 = arith.constant dense<0.000000e+00> : vector<8x8xf32>
    %148 = tpu.matmul %147, %146, %cst_43 {dimension_numbers = #tpu.dot_dimension_numbers<[1], [0], [0], [1], [0, 0, 1, 1], [], []>} : vector<8x16xf32>, vector<16x8xf32>, vector<8x8xf32> -> vector<8x8xf32>
    %149 = vector.shape_cast %148 : vector<8x8xf32> to vector<1x8x8xf32>
    %150 = arith.addf %143, %149 : vector<1x8x8xf32>
    %151 = vector.extract_strided_slice %137 {offsets = [0, 2, 0], sizes = [1, 8, 16], strides = [1, 1, 1]} : vector<1x10x16xf32> to vector<1x8x16xf32>
    %152 = vector.extract_strided_slice %93 {offsets = [2, 0, 0], sizes = [1, 16, 8], strides = [1, 1, 1]} : vector<3x32x16xf32> to vector<1x16x8xf32>
    %153 = vector.shape_cast %152 : vector<1x16x8xf32> to vector<16x8xf32>
    %154 = vector.shape_cast %151 : vector<1x8x16xf32> to vector<8x16xf32>
    %cst_44 = arith.constant dense<0.000000e+00> : vector<8x8xf32>
    %155 = tpu.matmul %154, %153, %cst_44 {dimension_numbers = #tpu.dot_dimension_numbers<[1], [0], [0], [1], [0, 0, 1, 1], [], []>} : vector<8x16xf32>, vector<16x8xf32>, vector<8x8xf32> -> vector<8x8xf32>
    %156 = vector.shape_cast %155 : vector<8x8xf32> to vector<1x8x8xf32>
    %157 = arith.addf %150, %156 : vector<1x8x8xf32>
    %c1_45 = arith.constant 1 : index
    %c0_46 = arith.constant 0 : index
    %158 = vector.load %arg5[%c1_45, %c0_46] : memref<4x16xf32, #tpu.memory_space<vmem>>, vector<1x16xf32>
    %159 = vector.extract_strided_slice %158 {offsets = [0, 0], sizes = [1, 8], strides = [1, 1]} : vector<1x16xf32> to vector<1x8xf32>
    %160 = vector.shape_cast %159 : vector<1x8xf32> to vector<1x1x8xf32>
    %161 = vector.broadcast %160 : vector<1x1x8xf32> to vector<1x8x8xf32>
    %162 = arith.addf %157, %161 : vector<1x8x8xf32>
    %163 = math.tanh %162 : vector<1x8x8xf32>
    %164 = vector.extract_strided_slice %163 {offsets = [0, 0, 0], sizes = [1, 8, 4], strides = [1, 1, 1]} : vector<1x8x8xf32> to vector<1x8x4xf32>
    %165 = arith.addf %85, %164 : vector<1x8x4xf32>
    %166 = vector.extract_strided_slice %163 {offsets = [0, 0, 4], sizes = [1, 8, 4], strides = [1, 1, 1]} : vector<1x8x8xf32> to vector<1x8x4xf32>
    %167 = arith.subf %82, %166 : vector<1x8x4xf32>
    %c0_47 = arith.constant 0 : index
    %c0_48 = arith.constant 0 : index
    %c0_49 = arith.constant 0 : index
    %168 = vector.load %arg7[%c0_47, %c0_48, %c0_49] : memref<1x8x8xf32, #tpu.memory_space<vmem>>, vector<1x8x4xf32>
    tpu.vector_store %arg7[%c0_47, %c0_48, %c0_49], %165 {strides = array<i32>} : memref<1x8x8xf32, #tpu.memory_space<vmem>>, vector<1x8x4xf32>,
    %c0_50 = arith.constant 0 : index
    %c0_51 = arith.constant 0 : index
    %c4 = arith.constant 4 : index
    %169 = vector.load %arg7[%c0_50, %c0_51, %c4] : memref<1x8x8xf32, #tpu.memory_space<vmem>>, vector<1x8x4xf32>
    tpu.vector_store %arg7[%c0_50, %c0_51, %c4], %167 {strides = array<i32>} : memref<1x8x8xf32, #tpu.memory_space<vmem>>, vector<1x8x4xf32>,
    %c0_52 = arith.constant 0 : index
    %c0_53 = arith.constant 0 : index
    %c0_54 = arith.constant 0 : index
    %170 = tpu.strided_load %arg7[%c0_52, %c0_53, %c0_54] {strides = array<i32: 1, 2, 1>} : memref<1x8x8xf32, #tpu.memory_space<vmem>>, vector<1x4x8xf32>
    %c0_55 = arith.constant 0 : index
    %c1_56 = arith.constant 1 : index
    %c0_57 = arith.constant 0 : index
    %171 = tpu.strided_load %arg7[%c0_55, %c1_56, %c0_57] {strides = array<i32: 1, 2, 1>} : memref<1x8x8xf32, #tpu.memory_space<vmem>>, vector<1x4x8xf32>
    %172 = tpu.concatenate %170, %171 in 2 : vector<1x4x8xf32>, vector<1x4x8xf32> -> vector<1x4x16xf32>
    %173 = vector.extract_strided_slice %172 {offsets = [0, 0, 0], sizes = [1, 1, 16], strides = [1, 1, 1]} : vector<1x4x16xf32> to vector<1x1x16xf32>
    %174 = vector.extract_strided_slice %172 {offsets = [0, 3, 0], sizes = [1, 1, 16], strides = [1, 1, 1]} : vector<1x4x16xf32> to vector<1x1x16xf32>
    %175 = tpu.concatenate %173, %173, %173, %172, %174, %174, %174 in 1 : vector<1x1x16xf32>, vector<1x1x16xf32>, vector<1x1x16xf32>, vector<1x4x16xf32>, vector<1x1x16xf32>, vector<1x1x16xf32>, vector<1x1x16xf32> -> vector<1x10x16xf32>
    %c2 = arith.constant 2 : index
    %c0_58 = arith.constant 0 : index
    %c0_59 = arith.constant 0 : index
    %c0_60 = arith.constant 0 : index
    %176 = vector.load %arg2[%c2, %c0_58, %c0_59, %c0_60] : memref<4x5x16x32xf32, #tpu.memory_space<vmem>>, vector<1x5x16x32xf32>
    %177 = vector.shape_cast %176 : vector<1x5x16x32xf32> to vector<5x16x32xf32>
    %c2_61 = arith.constant 2 : index
    %c0_62 = arith.constant 0 : index
    %c0_63 = arith.constant 0 : index
    %c0_64 = arith.constant 0 : index
    %178 = vector.load %arg4[%c2_61, %c0_62, %c0_63, %c0_64] : memref<4x3x32x16xf32, #tpu.memory_space<vmem>>, vector<1x3x32x16xf32>
    %179 = vector.shape_cast %178 : vector<1x3x32x16xf32> to vector<3x32x16xf32>
    %180 = vector.extract_strided_slice %175 {offsets = [0, 0, 0], sizes = [1, 6, 16], strides = [1, 1, 1]} : vector<1x10x16xf32> to vector<1x6x16xf32>
    %181 = vector.extract_strided_slice %177 {offsets = [0, 0, 0], sizes = [1, 16, 32], strides = [1, 1, 1]} : vector<5x16x32xf32> to vector<1x16x32xf32>
    %182 = vector.shape_cast %181 : vector<1x16x32xf32> to vector<16x32xf32>
    %183 = vector.shape_cast %180 : vector<1x6x16xf32> to vector<6x16xf32>
    %cst_65 = arith.constant dense<0.000000e+00> : vector<6x32xf32>
    %184 = tpu.matmul %183, %182, %cst_65 {dimension_numbers = #tpu.dot_dimension_numbers<[1], [0], [0], [1], [0, 0, 1, 1], [], []>} : vector<6x16xf32>, vector<16x32xf32>, vector<6x32xf32> -> vector<6x32xf32>
    %185 = vector.shape_cast %184 : vector<6x32xf32> to vector<1x6x32xf32>
    %186 = vector.extract_strided_slice %175 {offsets = [0, 1, 0], sizes = [1, 6, 16], strides = [1, 1, 1]} : vector<1x10x16xf32> to vector<1x6x16xf32>
    %187 = vector.extract_strided_slice %177 {offsets = [1, 0, 0], sizes = [1, 16, 32], strides = [1, 1, 1]} : vector<5x16x32xf32> to vector<1x16x32xf32>
    %188 = vector.shape_cast %187 : vector<1x16x32xf32> to vector<16x32xf32>
    %189 = vector.shape_cast %186 : vector<1x6x16xf32> to vector<6x16xf32>
    %cst_66 = arith.constant dense<0.000000e+00> : vector<6x32xf32>
    %190 = tpu.matmul %189, %188, %cst_66 {dimension_numbers = #tpu.dot_dimension_numbers<[1], [0], [0], [1], [0, 0, 1, 1], [], []>} : vector<6x16xf32>, vector<16x32xf32>, vector<6x32xf32> -> vector<6x32xf32>
    %191 = vector.shape_cast %190 : vector<6x32xf32> to vector<1x6x32xf32>
    %192 = arith.addf %185, %191 : vector<1x6x32xf32>
    %193 = vector.extract_strided_slice %175 {offsets = [0, 2, 0], sizes = [1, 6, 16], strides = [1, 1, 1]} : vector<1x10x16xf32> to vector<1x6x16xf32>
    %194 = vector.extract_strided_slice %177 {offsets = [2, 0, 0], sizes = [1, 16, 32], strides = [1, 1, 1]} : vector<5x16x32xf32> to vector<1x16x32xf32>
    %195 = vector.shape_cast %194 : vector<1x16x32xf32> to vector<16x32xf32>
    %196 = vector.shape_cast %193 : vector<1x6x16xf32> to vector<6x16xf32>
    %cst_67 = arith.constant dense<0.000000e+00> : vector<6x32xf32>
    %197 = tpu.matmul %196, %195, %cst_67 {dimension_numbers = #tpu.dot_dimension_numbers<[1], [0], [0], [1], [0, 0, 1, 1], [], []>} : vector<6x16xf32>, vector<16x32xf32>, vector<6x32xf32> -> vector<6x32xf32>
    %198 = vector.shape_cast %197 : vector<6x32xf32> to vector<1x6x32xf32>
    %199 = arith.addf %192, %198 : vector<1x6x32xf32>
    %200 = vector.extract_strided_slice %175 {offsets = [0, 3, 0], sizes = [1, 6, 16], strides = [1, 1, 1]} : vector<1x10x16xf32> to vector<1x6x16xf32>
    %201 = vector.extract_strided_slice %177 {offsets = [3, 0, 0], sizes = [1, 16, 32], strides = [1, 1, 1]} : vector<5x16x32xf32> to vector<1x16x32xf32>
    %202 = vector.shape_cast %201 : vector<1x16x32xf32> to vector<16x32xf32>
    %203 = vector.shape_cast %200 : vector<1x6x16xf32> to vector<6x16xf32>
    %cst_68 = arith.constant dense<0.000000e+00> : vector<6x32xf32>
    %204 = tpu.matmul %203, %202, %cst_68 {dimension_numbers = #tpu.dot_dimension_numbers<[1], [0], [0], [1], [0, 0, 1, 1], [], []>} : vector<6x16xf32>, vector<16x32xf32>, vector<6x32xf32> -> vector<6x32xf32>
    %205 = vector.shape_cast %204 : vector<6x32xf32> to vector<1x6x32xf32>
    %206 = arith.addf %199, %205 : vector<1x6x32xf32>
    %207 = vector.extract_strided_slice %175 {offsets = [0, 4, 0], sizes = [1, 6, 16], strides = [1, 1, 1]} : vector<1x10x16xf32> to vector<1x6x16xf32>
    %208 = vector.extract_strided_slice %177 {offsets = [4, 0, 0], sizes = [1, 16, 32], strides = [1, 1, 1]} : vector<5x16x32xf32> to vector<1x16x32xf32>
    %209 = vector.shape_cast %208 : vector<1x16x32xf32> to vector<16x32xf32>
    %210 = vector.shape_cast %207 : vector<1x6x16xf32> to vector<6x16xf32>
    %cst_69 = arith.constant dense<0.000000e+00> : vector<6x32xf32>
    %211 = tpu.matmul %210, %209, %cst_69 {dimension_numbers = #tpu.dot_dimension_numbers<[1], [0], [0], [1], [0, 0, 1, 1], [], []>} : vector<6x16xf32>, vector<16x32xf32>, vector<6x32xf32> -> vector<6x32xf32>
    %212 = vector.shape_cast %211 : vector<6x32xf32> to vector<1x6x32xf32>
    %213 = arith.addf %206, %212 : vector<1x6x32xf32>
    %c2_70 = arith.constant 2 : index
    %c0_71 = arith.constant 0 : index
    %214 = vector.load %arg3[%c2_70, %c0_71] : memref<4x32xf32, #tpu.memory_space<vmem>>, vector<1x32xf32>
    %215 = vector.shape_cast %214 : vector<1x32xf32> to vector<1x1x32xf32>
    %216 = vector.broadcast %215 : vector<1x1x32xf32> to vector<1x6x32xf32>
    %217 = arith.addf %213, %216 : vector<1x6x32xf32>
    %cst_72 = arith.constant 0.000000e+00 : f32
    %218 = vector.broadcast %cst_72 : f32 to vector<1x6x32xf32>
    %219 = arith.cmpf ogt, %217, %218 : vector<1x6x32xf32>
    %cst_73 = arith.constant 0.00999999977 : f32
    %220 = vector.broadcast %cst_73 : f32 to vector<1x6x32xf32>
    %221 = arith.mulf %220, %217 : vector<1x6x32xf32>
    %222 = arith.select %219, %217, %221 : vector<1x6x32xi1>, vector<1x6x32xf32>
    %223 = vector.extract_strided_slice %222 {offsets = [0, 0, 0], sizes = [1, 4, 32], strides = [1, 1, 1]} : vector<1x6x32xf32> to vector<1x4x32xf32>
    %224 = vector.extract_strided_slice %179 {offsets = [0, 0, 0], sizes = [1, 32, 16], strides = [1, 1, 1]} : vector<3x32x16xf32> to vector<1x32x16xf32>
    %225 = vector.shape_cast %224 : vector<1x32x16xf32> to vector<32x16xf32>
    %226 = vector.shape_cast %223 : vector<1x4x32xf32> to vector<4x32xf32>
    %cst_74 = arith.constant dense<0.000000e+00> : vector<4x16xf32>
    %227 = tpu.matmul %226, %225, %cst_74 {dimension_numbers = #tpu.dot_dimension_numbers<[1], [0], [0], [1], [0, 0, 1, 1], [], []>} : vector<4x32xf32>, vector<32x16xf32>, vector<4x16xf32> -> vector<4x16xf32>
    %228 = vector.shape_cast %227 : vector<4x16xf32> to vector<1x4x16xf32>
    %229 = vector.extract_strided_slice %222 {offsets = [0, 1, 0], sizes = [1, 4, 32], strides = [1, 1, 1]} : vector<1x6x32xf32> to vector<1x4x32xf32>
    %230 = vector.extract_strided_slice %179 {offsets = [1, 0, 0], sizes = [1, 32, 16], strides = [1, 1, 1]} : vector<3x32x16xf32> to vector<1x32x16xf32>
    %231 = vector.shape_cast %230 : vector<1x32x16xf32> to vector<32x16xf32>
    %232 = vector.shape_cast %229 : vector<1x4x32xf32> to vector<4x32xf32>
    %cst_75 = arith.constant dense<0.000000e+00> : vector<4x16xf32>
    %233 = tpu.matmul %232, %231, %cst_75 {dimension_numbers = #tpu.dot_dimension_numbers<[1], [0], [0], [1], [0, 0, 1, 1], [], []>} : vector<4x32xf32>, vector<32x16xf32>, vector<4x16xf32> -> vector<4x16xf32>
    %234 = vector.shape_cast %233 : vector<4x16xf32> to vector<1x4x16xf32>
    %235 = arith.addf %228, %234 : vector<1x4x16xf32>
    %236 = vector.extract_strided_slice %222 {offsets = [0, 2, 0], sizes = [1, 4, 32], strides = [1, 1, 1]} : vector<1x6x32xf32> to vector<1x4x32xf32>
    %237 = vector.extract_strided_slice %179 {offsets = [2, 0, 0], sizes = [1, 32, 16], strides = [1, 1, 1]} : vector<3x32x16xf32> to vector<1x32x16xf32>
    %238 = vector.shape_cast %237 : vector<1x32x16xf32> to vector<32x16xf32>
    %239 = vector.shape_cast %236 : vector<1x4x32xf32> to vector<4x32xf32>
    %cst_76 = arith.constant dense<0.000000e+00> : vector<4x16xf32>
    %240 = tpu.matmul %239, %238, %cst_76 {dimension_numbers = #tpu.dot_dimension_numbers<[1], [0], [0], [1], [0, 0, 1, 1], [], []>} : vector<4x32xf32>, vector<32x16xf32>, vector<4x16xf32> -> vector<4x16xf32>
    %241 = vector.shape_cast %240 : vector<4x16xf32> to vector<1x4x16xf32>
    %242 = arith.addf %235, %241 : vector<1x4x16xf32>
    %c2_77 = arith.constant 2 : index
    %c0_78 = arith.constant 0 : index
    %243 = vector.load %arg5[%c2_77, %c0_78] : memref<4x16xf32, #tpu.memory_space<vmem>>, vector<1x16xf32>
    %244 = vector.shape_cast %243 : vector<1x16xf32> to vector<1x1x16xf32>
    %245 = vector.broadcast %244 : vector<1x1x16xf32> to vector<1x4x16xf32>
    %246 = arith.addf %242, %245 : vector<1x4x16xf32>
    %247 = math.tanh %246 : vector<1x4x16xf32>
    %248 = vector.extract_strided_slice %247 {offsets = [0, 0, 0], sizes = [1, 4, 8], strides = [1, 1, 1]} : vector<1x4x16xf32> to vector<1x4x8xf32>
    %249 = math.exp %248 : vector<1x4x8xf32>
    %250 = arith.mulf %171, %249 : vector<1x4x8xf32>
    %251 = vector.extract_strided_slice %247 {offsets = [0, 0, 8], sizes = [1, 4, 8], strides = [1, 1, 1]} : vector<1x4x16xf32> to vector<1x4x8xf32>
    %252 = math.exp %251 : vector<1x4x8xf32>
    %253 = arith.mulf %170, %252 : vector<1x4x8xf32>
    %254 = tpu.concatenate %250, %253 in 2 : vector<1x4x8xf32>, vector<1x4x8xf32> -> vector<1x4x16xf32>
    %255 = vector.extract_strided_slice %254 {offsets = [0, 0, 0], sizes = [1, 1, 16], strides = [1, 1, 1]} : vector<1x4x16xf32> to vector<1x1x16xf32>
    %256 = vector.extract_strided_slice %254 {offsets = [0, 3, 0], sizes = [1, 1, 16], strides = [1, 1, 1]} : vector<1x4x16xf32> to vector<1x1x16xf32>
    %257 = tpu.concatenate %255, %255, %255, %254, %256, %256, %256 in 1 : vector<1x1x16xf32>, vector<1x1x16xf32>, vector<1x1x16xf32>, vector<1x4x16xf32>, vector<1x1x16xf32>, vector<1x1x16xf32>, vector<1x1x16xf32> -> vector<1x10x16xf32>
    %c3 = arith.constant 3 : index
    %c0_79 = arith.constant 0 : index
    %c0_80 = arith.constant 0 : index
    %c0_81 = arith.constant 0 : index
    %258 = vector.load %arg2[%c3, %c0_79, %c0_80, %c0_81] : memref<4x5x16x32xf32, #tpu.memory_space<vmem>>, vector<1x5x16x32xf32>
    %259 = vector.shape_cast %258 : vector<1x5x16x32xf32> to vector<5x16x32xf32>
    %c3_82 = arith.constant 3 : index
    %c0_83 = arith.constant 0 : index
    %c0_84 = arith.constant 0 : index
    %c0_85 = arith.constant 0 : index
    %260 = vector.load %arg4[%c3_82, %c0_83, %c0_84, %c0_85] : memref<4x3x32x16xf32, #tpu.memory_space<vmem>>, vector<1x3x32x16xf32>
    %261 = vector.shape_cast %260 : vector<1x3x32x16xf32> to vector<3x32x16xf32>
    %262 = vector.extract_strided_slice %257 {offsets = [0, 0, 0], sizes = [1, 6, 16], strides = [1, 1, 1]} : vector<1x10x16xf32> to vector<1x6x16xf32>
    %263 = vector.extract_strided_slice %259 {offsets = [0, 0, 0], sizes = [1, 16, 32], strides = [1, 1, 1]} : vector<5x16x32xf32> to vector<1x16x32xf32>
    %264 = vector.shape_cast %263 : vector<1x16x32xf32> to vector<16x32xf32>
    %265 = vector.shape_cast %262 : vector<1x6x16xf32> to vector<6x16xf32>
    %cst_86 = arith.constant dense<0.000000e+00> : vector<6x32xf32>
    %266 = tpu.matmul %265, %264, %cst_86 {dimension_numbers = #tpu.dot_dimension_numbers<[1], [0], [0], [1], [0, 0, 1, 1], [], []>} : vector<6x16xf32>, vector<16x32xf32>, vector<6x32xf32> -> vector<6x32xf32>
    %267 = vector.shape_cast %266 : vector<6x32xf32> to vector<1x6x32xf32>
    %268 = vector.extract_strided_slice %257 {offsets = [0, 1, 0], sizes = [1, 6, 16], strides = [1, 1, 1]} : vector<1x10x16xf32> to vector<1x6x16xf32>
    %269 = vector.extract_strided_slice %259 {offsets = [1, 0, 0], sizes = [1, 16, 32], strides = [1, 1, 1]} : vector<5x16x32xf32> to vector<1x16x32xf32>
    %270 = vector.shape_cast %269 : vector<1x16x32xf32> to vector<16x32xf32>
    %271 = vector.shape_cast %268 : vector<1x6x16xf32> to vector<6x16xf32>
    %cst_87 = arith.constant dense<0.000000e+00> : vector<6x32xf32>
    %272 = tpu.matmul %271, %270, %cst_87 {dimension_numbers = #tpu.dot_dimension_numbers<[1], [0], [0], [1], [0, 0, 1, 1], [], []>} : vector<6x16xf32>, vector<16x32xf32>, vector<6x32xf32> -> vector<6x32xf32>
    %273 = vector.shape_cast %272 : vector<6x32xf32> to vector<1x6x32xf32>
    %274 = arith.addf %267, %273 : vector<1x6x32xf32>
    %275 = vector.extract_strided_slice %257 {offsets = [0, 2, 0], sizes = [1, 6, 16], strides = [1, 1, 1]} : vector<1x10x16xf32> to vector<1x6x16xf32>
    %276 = vector.extract_strided_slice %259 {offsets = [2, 0, 0], sizes = [1, 16, 32], strides = [1, 1, 1]} : vector<5x16x32xf32> to vector<1x16x32xf32>
    %277 = vector.shape_cast %276 : vector<1x16x32xf32> to vector<16x32xf32>
    %278 = vector.shape_cast %275 : vector<1x6x16xf32> to vector<6x16xf32>
    %cst_88 = arith.constant dense<0.000000e+00> : vector<6x32xf32>
    %279 = tpu.matmul %278, %277, %cst_88 {dimension_numbers = #tpu.dot_dimension_numbers<[1], [0], [0], [1], [0, 0, 1, 1], [], []>} : vector<6x16xf32>, vector<16x32xf32>, vector<6x32xf32> -> vector<6x32xf32>
    %280 = vector.shape_cast %279 : vector<6x32xf32> to vector<1x6x32xf32>
    %281 = arith.addf %274, %280 : vector<1x6x32xf32>
    %282 = vector.extract_strided_slice %257 {offsets = [0, 3, 0], sizes = [1, 6, 16], strides = [1, 1, 1]} : vector<1x10x16xf32> to vector<1x6x16xf32>
    %283 = vector.extract_strided_slice %259 {offsets = [3, 0, 0], sizes = [1, 16, 32], strides = [1, 1, 1]} : vector<5x16x32xf32> to vector<1x16x32xf32>
    %284 = vector.shape_cast %283 : vector<1x16x32xf32> to vector<16x32xf32>
    %285 = vector.shape_cast %282 : vector<1x6x16xf32> to vector<6x16xf32>
    %cst_89 = arith.constant dense<0.000000e+00> : vector<6x32xf32>
    %286 = tpu.matmul %285, %284, %cst_89 {dimension_numbers = #tpu.dot_dimension_numbers<[1], [0], [0], [1], [0, 0, 1, 1], [], []>} : vector<6x16xf32>, vector<16x32xf32>, vector<6x32xf32> -> vector<6x32xf32>
    %287 = vector.shape_cast %286 : vector<6x32xf32> to vector<1x6x32xf32>
    %288 = arith.addf %281, %287 : vector<1x6x32xf32>
    %289 = vector.extract_strided_slice %257 {offsets = [0, 4, 0], sizes = [1, 6, 16], strides = [1, 1, 1]} : vector<1x10x16xf32> to vector<1x6x16xf32>
    %290 = vector.extract_strided_slice %259 {offsets = [4, 0, 0], sizes = [1, 16, 32], strides = [1, 1, 1]} : vector<5x16x32xf32> to vector<1x16x32xf32>
    %291 = vector.shape_cast %290 : vector<1x16x32xf32> to vector<16x32xf32>
    %292 = vector.shape_cast %289 : vector<1x6x16xf32> to vector<6x16xf32>
    %cst_90 = arith.constant dense<0.000000e+00> : vector<6x32xf32>
    %293 = tpu.matmul %292, %291, %cst_90 {dimension_numbers = #tpu.dot_dimension_numbers<[1], [0], [0], [1], [0, 0, 1, 1], [], []>} : vector<6x16xf32>, vector<16x32xf32>, vector<6x32xf32> -> vector<6x32xf32>
    %294 = vector.shape_cast %293 : vector<6x32xf32> to vector<1x6x32xf32>
    %295 = arith.addf %288, %294 : vector<1x6x32xf32>
    %c3_91 = arith.constant 3 : index
    %c0_92 = arith.constant 0 : index
    %296 = vector.load %arg3[%c3_91, %c0_92] : memref<4x32xf32, #tpu.memory_space<vmem>>, vector<1x32xf32>
    %297 = vector.shape_cast %296 : vector<1x32xf32> to vector<1x1x32xf32>
    %298 = vector.broadcast %297 : vector<1x1x32xf32> to vector<1x6x32xf32>
    %299 = arith.addf %295, %298 : vector<1x6x32xf32>
    %cst_93 = arith.constant 0.000000e+00 : f32
    %300 = vector.broadcast %cst_93 : f32 to vector<1x6x32xf32>
    %301 = arith.cmpf ogt, %299, %300 : vector<1x6x32xf32>
    %cst_94 = arith.constant 0.00999999977 : f32
    %302 = vector.broadcast %cst_94 : f32 to vector<1x6x32xf32>
    %303 = arith.mulf %302, %299 : vector<1x6x32xf32>
    %304 = arith.select %301, %299, %303 : vector<1x6x32xi1>, vector<1x6x32xf32>
    %305 = vector.extract_strided_slice %304 {offsets = [0, 0, 0], sizes = [1, 4, 32], strides = [1, 1, 1]} : vector<1x6x32xf32> to vector<1x4x32xf32>
    %306 = vector.extract_strided_slice %261 {offsets = [0, 0, 0], sizes = [1, 32, 16], strides = [1, 1, 1]} : vector<3x32x16xf32> to vector<1x32x16xf32>
    %307 = vector.shape_cast %306 : vector<1x32x16xf32> to vector<32x16xf32>
    %308 = vector.shape_cast %305 : vector<1x4x32xf32> to vector<4x32xf32>
    %cst_95 = arith.constant dense<0.000000e+00> : vector<4x16xf32>
    %309 = tpu.matmul %308, %307, %cst_95 {dimension_numbers = #tpu.dot_dimension_numbers<[1], [0], [0], [1], [0, 0, 1, 1], [], []>} : vector<4x32xf32>, vector<32x16xf32>, vector<4x16xf32> -> vector<4x16xf32>
    %310 = vector.shape_cast %309 : vector<4x16xf32> to vector<1x4x16xf32>
    %311 = vector.extract_strided_slice %304 {offsets = [0, 1, 0], sizes = [1, 4, 32], strides = [1, 1, 1]} : vector<1x6x32xf32> to vector<1x4x32xf32>
    %312 = vector.extract_strided_slice %261 {offsets = [1, 0, 0], sizes = [1, 32, 16], strides = [1, 1, 1]} : vector<3x32x16xf32> to vector<1x32x16xf32>
    %313 = vector.shape_cast %312 : vector<1x32x16xf32> to vector<32x16xf32>
    %314 = vector.shape_cast %311 : vector<1x4x32xf32> to vector<4x32xf32>
    %cst_96 = arith.constant dense<0.000000e+00> : vector<4x16xf32>
    %315 = tpu.matmul %314, %313, %cst_96 {dimension_numbers = #tpu.dot_dimension_numbers<[1], [0], [0], [1], [0, 0, 1, 1], [], []>} : vector<4x32xf32>, vector<32x16xf32>, vector<4x16xf32> -> vector<4x16xf32>
    %316 = vector.shape_cast %315 : vector<4x16xf32> to vector<1x4x16xf32>
    %317 = arith.addf %310, %316 : vector<1x4x16xf32>
    %318 = vector.extract_strided_slice %304 {offsets = [0, 2, 0], sizes = [1, 4, 32], strides = [1, 1, 1]} : vector<1x6x32xf32> to vector<1x4x32xf32>
    %319 = vector.extract_strided_slice %261 {offsets = [2, 0, 0], sizes = [1, 32, 16], strides = [1, 1, 1]} : vector<3x32x16xf32> to vector<1x32x16xf32>
    %320 = vector.shape_cast %319 : vector<1x32x16xf32> to vector<32x16xf32>
    %321 = vector.shape_cast %318 : vector<1x4x32xf32> to vector<4x32xf32>
    %cst_97 = arith.constant dense<0.000000e+00> : vector<4x16xf32>
    %322 = tpu.matmul %321, %320, %cst_97 {dimension_numbers = #tpu.dot_dimension_numbers<[1], [0], [0], [1], [0, 0, 1, 1], [], []>} : vector<4x32xf32>, vector<32x16xf32>, vector<4x16xf32> -> vector<4x16xf32>
    %323 = vector.shape_cast %322 : vector<4x16xf32> to vector<1x4x16xf32>
    %324 = arith.addf %317, %323 : vector<1x4x16xf32>
    %c3_98 = arith.constant 3 : index
    %c0_99 = arith.constant 0 : index
    %325 = vector.load %arg5[%c3_98, %c0_99] : memref<4x16xf32, #tpu.memory_space<vmem>>, vector<1x16xf32>
    %326 = vector.shape_cast %325 : vector<1x16xf32> to vector<1x1x16xf32>
    %327 = vector.broadcast %326 : vector<1x1x16xf32> to vector<1x4x16xf32>
    %328 = arith.addf %324, %327 : vector<1x4x16xf32>
    %329 = math.tanh %328 : vector<1x4x16xf32>
    %330 = vector.extract_strided_slice %329 {offsets = [0, 0, 0], sizes = [1, 4, 8], strides = [1, 1, 1]} : vector<1x4x16xf32> to vector<1x4x8xf32>
    %331 = arith.addf %253, %330 : vector<1x4x8xf32>
    %332 = vector.extract_strided_slice %329 {offsets = [0, 0, 8], sizes = [1, 4, 8], strides = [1, 1, 1]} : vector<1x4x16xf32> to vector<1x4x8xf32>
    %333 = arith.subf %250, %332 : vector<1x4x8xf32>
    %334 = vector.extract_strided_slice %331 {offsets = [0, 0, 0], sizes = [1, 1, 8], strides = [1, 1, 1]} : vector<1x4x8xf32> to vector<1x1x8xf32>
    %335 = vector.extract_strided_slice %333 {offsets = [0, 0, 0], sizes = [1, 1, 8], strides = [1, 1, 1]} : vector<1x4x8xf32> to vector<1x1x8xf32>
    %336 = vector.extract_strided_slice %331 {offsets = [0, 1, 0], sizes = [1, 1, 8], strides = [1, 1, 1]} : vector<1x4x8xf32> to vector<1x1x8xf32>
    %337 = vector.extract_strided_slice %333 {offsets = [0, 1, 0], sizes = [1, 1, 8], strides = [1, 1, 1]} : vector<1x4x8xf32> to vector<1x1x8xf32>
    %338 = vector.extract_strided_slice %331 {offsets = [0, 2, 0], sizes = [1, 1, 8], strides = [1, 1, 1]} : vector<1x4x8xf32> to vector<1x1x8xf32>
    %339 = vector.extract_strided_slice %333 {offsets = [0, 2, 0], sizes = [1, 1, 8], strides = [1, 1, 1]} : vector<1x4x8xf32> to vector<1x1x8xf32>
    %340 = vector.extract_strided_slice %331 {offsets = [0, 3, 0], sizes = [1, 1, 8], strides = [1, 1, 1]} : vector<1x4x8xf32> to vector<1x1x8xf32>
    %341 = vector.extract_strided_slice %333 {offsets = [0, 3, 0], sizes = [1, 1, 8], strides = [1, 1, 1]} : vector<1x4x8xf32> to vector<1x1x8xf32>
    %342 = tpu.concatenate %334, %335, %336, %337, %338, %339, %340, %341 in 2 : vector<1x1x8xf32>, vector<1x1x8xf32>, vector<1x1x8xf32>, vector<1x1x8xf32>, vector<1x1x8xf32>, vector<1x1x8xf32>, vector<1x1x8xf32>, vector<1x1x8xf32> -> vector<1x1x64xf32>
    %c0_100 = arith.constant 0 : index
    %c0_101 = arith.constant 0 : index
    %c0_102 = arith.constant 0 : index
    %343 = vector.load %arg6[%c0_100, %c0_101, %c0_102] : memref<1x1x64xf32, #tpu.memory_space<vmem>>, vector<1x1x64xf32>
    tpu.vector_store %arg6[%c0_100, %c0_101, %c0_102], %342 {strides = array<i32>} : memref<1x1x64xf32, #tpu.memory_space<vmem>>, vector<1x1x64xf32>,
    return
  }
  func.func @transform_0(%arg0: i32) -> (i32, i32, i32) {
    %c0_i32 = arith.constant 0 : i32
    %c0_i32_0 = arith.constant 0 : i32
    %c0_i32_1 = arith.constant 0 : i32
    return %arg0, %c0_i32, %c0_i32_0 : i32, i32, i32
  }
  func.func @transform_1(%arg0: i32) -> (i32, i32, i32, i32) {
    %c0_i32 = arith.constant 0 : i32
    %c0_i32_0 = arith.constant 0 : i32
    %c0_i32_1 = arith.constant 0 : i32
    %c0_i32_2 = arith.constant 0 : i32
    %c0_i32_3 = arith.constant 0 : i32
    return %c0_i32, %c0_i32_0, %c0_i32_1, %c0_i32_2 : i32, i32, i32, i32
  }
  func.func @transform_2(%arg0: i32) -> (i32, i32) {
    %c0_i32 = arith.constant 0 : i32
    %c0_i32_0 = arith.constant 0 : i32
    %c0_i32_1 = arith.constant 0 : i32
    return %c0_i32, %c0_i32_0 : i32, i32
  }
  func.func @transform_3(%arg0: i32) -> (i32, i32, i32, i32) {
    %c0_i32 = arith.constant 0 : i32
    %c0_i32_0 = arith.constant 0 : i32
    %c0_i32_1 = arith.constant 0 : i32
    %c0_i32_2 = arith.constant 0 : i32
    %c0_i32_3 = arith.constant 0 : i32
    return %c0_i32, %c0_i32_0, %c0_i32_1, %c0_i32_2 : i32, i32, i32, i32
  }
  func.func @transform_4(%arg0: i32) -> (i32, i32) {
    %c0_i32 = arith.constant 0 : i32
    %c0_i32_0 = arith.constant 0 : i32
    %c0_i32_1 = arith.constant 0 : i32
    return %c0_i32, %c0_i32_0 : i32, i32
  }
  func.func @transform_5(%arg0: i32) -> (i32, i32, i32) {
    %c0_i32 = arith.constant 0 : i32
    %c0_i32_0 = arith.constant 0 : i32
    %c0_i32_1 = arith.constant 0 : i32
    return %arg0, %c0_i32, %c0_i32_0 : i32, i32, i32
  }
}

module attributes {stable_mosaic.version = 11 : i64} {
  func.func @tree_kernel(%arg0: i32, %arg1: memref<1x16x4xf32, #tpu.memory_space<vmem>>, %arg2: memref<4x5x16x32xf32, #tpu.memory_space<vmem>>, %arg3: memref<4x32xf32, #tpu.memory_space<vmem>>, %arg4: memref<4x3x32x16xf32, #tpu.memory_space<vmem>>, %arg5: memref<4x16xf32, #tpu.memory_space<vmem>>, %arg6: memref<1x1x64xf32, #tpu.memory_space<vmem>>, %arg7: memref<1x8x8xf32, #tpu.memory_space<vmem>>) attributes {dimension_semantics = [#tpu.dimension_semantics<parallel>], iteration_bounds = array<i64: 2>, scalar_prefetch = 0 : i64, scratch_operands = 1 : i64, tpu.core_type = #tpu.core_type<tc>, window_params = [{transform_indices = @transform_0, window_bounds = array<i64: 1, 16, 4>}, {pipeline_mode = #tpu.pipeline_mode<synchronous>, transform_indices = @transform_1, window_bounds = array<i64: 4, 5, 16, 32>}, {pipeline_mode = #tpu.pipeline_mode<synchronous>, transform_indices = @transform_2, window_bounds = array<i64: 4, 32>}, {pipeline_mode = #tpu.pipeline_mode<synchronous>, transform_indices = @transform_3, window_bounds = array<i64: 4, 3, 32, 16>}, {pipeline_mode = #tpu.pipeline_mode<synchronous>, transform_indices = @transform_4, window_bounds = array<i64: 4, 16>}, {transform_indices = @transform_5, window_bounds = array<i64: 1, 1, 64>}]} {
    %c0 = arith.constant 0 : index
    %c0_0 = arith.constant 0 : index
    %c0_1 = arith.constant 0 : index
    %0 = vector.load %arg1[%c0, %c0_0, %c0_1] : memref<1x16x4xf32, #tpu.memory_space<vmem>>, vector<1x1x4xf32>
    %c0_2 = arith.constant 0 : index
    %c2 = arith.constant 2 : index
    %c0_3 = arith.constant 0 : index
    %1 = vector.load %arg1[%c0_2, %c2, %c0_3] : memref<1x16x4xf32, #tpu.memory_space<vmem>>, vector<1x1x4xf32>
    %c0_4 = arith.constant 0 : index
    %c4 = arith.constant 4 : index
    %c0_5 = arith.constant 0 : index
    %2 = vector.load %arg1[%c0_4, %c4, %c0_5] : memref<1x16x4xf32, #tpu.memory_space<vmem>>, vector<1x1x4xf32>
    %c0_6 = arith.constant 0 : index
    %c6 = arith.constant 6 : index
    %c0_7 = arith.constant 0 : index
    %3 = vector.load %arg1[%c0_6, %c6, %c0_7] : memref<1x16x4xf32, #tpu.memory_space<vmem>>, vector<1x1x4xf32>
    %c0_8 = arith.constant 0 : index
    %c8 = arith.constant 8 : index
    %c0_9 = arith.constant 0 : index
    %4 = vector.load %arg1[%c0_8, %c8, %c0_9] : memref<1x16x4xf32, #tpu.memory_space<vmem>>, vector<1x1x4xf32>
    %c0_10 = arith.constant 0 : index
    %c10 = arith.constant 10 : index
    %c0_11 = arith.constant 0 : index
    %5 = vector.load %arg1[%c0_10, %c10, %c0_11] : memref<1x16x4xf32, #tpu.memory_space<vmem>>, vector<1x1x4xf32>
    %c0_12 = arith.constant 0 : index
    %c12 = arith.constant 12 : index
    %c0_13 = arith.constant 0 : index
    %6 = vector.load %arg1[%c0_12, %c12, %c0_13] : memref<1x16x4xf32, #tpu.memory_space<vmem>>, vector<1x1x4xf32>
    %c0_14 = arith.constant 0 : index
    %c14 = arith.constant 14 : index
    %c0_15 = arith.constant 0 : index
    %7 = vector.load %arg1[%c0_14, %c14, %c0_15] : memref<1x16x4xf32, #tpu.memory_space<vmem>>, vector<1x1x4xf32>
    %8 = tpu.concatenate %0, %1, %2, %3, %4, %5, %6, %7 in 1 : vector<1x1x4xf32>, vector<1x1x4xf32>, vector<1x1x4xf32>, vector<1x1x4xf32>, vector<1x1x4xf32>, vector<1x1x4xf32>, vector<1x1x4xf32>, vector<1x1x4xf32> -> vector<1x8x4xf32>
    %c0_16 = arith.constant 0 : index
    %c1 = arith.constant 1 : index
    %c0_17 = arith.constant 0 : index
    %9 = vector.load %arg1[%c0_16, %c1, %c0_17] : memref<1x16x4xf32, #tpu.memory_space<vmem>>, vector<1x1x4xf32>
    %c0_18 = arith.constant 0 : index
    %c3 = arith.constant 3 : index
    %c0_19 = arith.constant 0 : index
    %10 = vector.load %arg1[%c0_18, %c3, %c0_19] : memref<1x16x4xf32, #tpu.memory_space<vmem>>, vector<1x1x4xf32>
    %c0_20 = arith.constant 0 : index
    %c5 = arith.constant 5 : index
    %c0_21 = arith.constant 0 : index
    %11 = vector.load %arg1[%c0_20, %c5, %c0_21] : memref<1x16x4xf32, #tpu.memory_space<vmem>>, vector<1x1x4xf32>
    %c0_22 = arith.constant 0 : index
    %c7 = arith.constant 7 : index
    %c0_23 = arith.constant 0 : index
    %12 = vector.load %arg1[%c0_22, %c7, %c0_23] : memref<1x16x4xf32, #tpu.memory_space<vmem>>, vector<1x1x4xf32>
    %c0_24 = arith.constant 0 : index
    %c9 = arith.constant 9 : index
    %c0_25 = arith.constant 0 : index
    %13 = vector.load %arg1[%c0_24, %c9, %c0_25] : memref<1x16x4xf32, #tpu.memory_space<vmem>>, vector<1x1x4xf32>
    %c0_26 = arith.constant 0 : index
    %c11 = arith.constant 11 : index
    %c0_27 = arith.constant 0 : index
    %14 = vector.load %arg1[%c0_26, %c11, %c0_27] : memref<1x16x4xf32, #tpu.memory_space<vmem>>, vector<1x1x4xf32>
    %c0_28 = arith.constant 0 : index
    %c13 = arith.constant 13 : index
    %c0_29 = arith.constant 0 : index
    %15 = vector.load %arg1[%c0_28, %c13, %c0_29] : memref<1x16x4xf32, #tpu.memory_space<vmem>>, vector<1x1x4xf32>
    %c0_30 = arith.constant 0 : index
    %c15 = arith.constant 15 : index
    %c0_31 = arith.constant 0 : index
    %16 = vector.load %arg1[%c0_30, %c15, %c0_31] : memref<1x16x4xf32, #tpu.memory_space<vmem>>, vector<1x1x4xf32>
    %17 = tpu.concatenate %9, %10, %11, %12, %13, %14, %15, %16 in 1 : vector<1x1x4xf32>, vector<1x1x4xf32>, vector<1x1x4xf32>, vector<1x1x4xf32>, vector<1x1x4xf32>, vector<1x1x4xf32>, vector<1x1x4xf32>, vector<1x1x4xf32> -> vector<1x8x4xf32>
    %18 = tpu.concatenate %8, %17 in 2 : vector<1x8x4xf32>, vector<1x8x4xf32> -> vector<1x8x8xf32>
    %19 = vector.extract_strided_slice %18 {offsets = [0, 0, 0], sizes = [1, 1, 8], strides = [1, 1, 1]} : vector<1x8x8xf32> to vector<1x1x8xf32>
    %20 = vector.extract_strided_slice %18 {offsets = [0, 7, 0], sizes = [1, 1, 8], strides = [1, 1, 1]} : vector<1x8x8xf32> to vector<1x1x8xf32>
    %21 = tpu.concatenate %19, %19, %19, %18, %20, %20, %20 in 1 : vector<1x1x8xf32>, vector<1x1x8xf32>, vector<1x1x8xf32>, vector<1x8x8xf32>, vector<1x1x8xf32>, vector<1x1x8xf32>, vector<1x1x8xf32> -> vector<1x14x8xf32>
    %c0_32 = arith.constant 0 : index
    %c0_33 = arith.constant 0 : index
    %c0_34 = arith.constant 0 : index
    %c0_35 = arith.constant 0 : index
    %22 = vector.load %arg2[%c0_32, %c0_33, %c0_34, %c0_35] : memref<4x5x16x32xf32, #tpu.memory_space<vmem>>, vector<1x5x16x32xf32>
    %23 = vector.shape_cast %22 : vector<1x5x16x32xf32> to vector<5x16x32xf32>
    %c0_36 = arith.constant 0 : index
    %c0_37 = arith.constant 0 : index
    %c0_38 = arith.constant 0 : index
    %c0_39 = arith.constant 0 : index
    %24 = vector.load %arg4[%c0_36, %c0_37, %c0_38, %c0_39] : memref<4x3x32x16xf32, #tpu.memory_space<vmem>>, vector<1x3x32x16xf32>
    %25 = vector.shape_cast %24 : vector<1x3x32x16xf32> to vector<3x32x16xf32>
    %26 = vector.extract_strided_slice %21 {offsets = [0, 0, 0], sizes = [1, 10, 8], strides = [1, 1, 1]} : vector<1x14x8xf32> to vector<1x10x8xf32>
    %27 = vector.extract_strided_slice %23 {offsets = [0, 0, 0], sizes = [1, 8, 16], strides = [1, 1, 1]} : vector<5x16x32xf32> to vector<1x8x16xf32>
    %28 = vector.shape_cast %27 : vector<1x8x16xf32> to vector<8x16xf32>
    %29 = vector.shape_cast %26 : vector<1x10x8xf32> to vector<10x8xf32>
    %cst = arith.constant dense<0.000000e+00> : vector<10x16xf32>
    %30 = tpu.matmul %29, %28, %cst {dimension_numbers = #tpu.dot_dimension_numbers<[1], [0], [0], [1], [0, 0, 1, 1], [], []>} : vector<10x8xf32>, vector<8x16xf32>, vector<10x16xf32> -> vector<10x16xf32>
    %31 = vector.shape_cast %30 : vector<10x16xf32> to vector<1x10x16xf32>
    %32 = vector.extract_strided_slice %21 {offsets = [0, 1, 0], sizes = [1, 10, 8], strides = [1, 1, 1]} : vector<1x14x8xf32> to vector<1x10x8xf32>
    %33 = vector.extract_strided_slice %23 {offsets = [1, 0, 0], sizes = [1, 8, 16], strides = [1, 1, 1]} : vector<5x16x32xf32> to vector<1x8x16xf32>
    %34 = vector.shape_cast %33 : vector<1x8x16xf32> to vector<8x16xf32>
    %35 = vector.shape_cast %32 : vector<1x10x8xf32> to vector<10x8xf32>
    %cst_40 = arith.constant dense<0.000000e+00> : vector<10x16xf32>
    %36 = tpu.matmul %35, %34, %cst_40 {dimension_numbers = #tpu.dot_dimension_numbers<[1], [0], [0], [1], [0, 0, 1, 1], [], []>} : vector<10x8xf32>, vector<8x16xf32>, vector<10x16xf32> -> vector<10x16xf32>
    %37 = vector.shape_cast %36 : vector<10x16xf32> to vector<1x10x16xf32>
    %38 = arith.addf %31, %37 : vector<1x10x16xf32>
    %39 = vector.extract_strided_slice %21 {offsets = [0, 2, 0], sizes = [1, 10, 8], strides = [1, 1, 1]} : vector<1x14x8xf32> to vector<1x10x8xf32>
    %40 = vector.extract_strided_slice %23 {offsets = [2, 0, 0], sizes = [1, 8, 16], strides = [1, 1, 1]} : vector<5x16x32xf32> to vector<1x8x16xf32>
    %41 = vector.shape_cast %40 : vector<1x8x16xf32> to vector<8x16xf32>
    %42 = vector.shape_cast %39 : vector<1x10x8xf32> to vector<10x8xf32>
    %cst_41 = arith.constant dense<0.000000e+00> : vector<10x16xf32>
    %43 = tpu.matmul %42, %41, %cst_41 {dimension_numbers = #tpu.dot_dimension_numbers<[1], [0], [0], [1], [0, 0, 1, 1], [], []>} : vector<10x8xf32>, vector<8x16xf32>, vector<10x16xf32> -> vector<10x16xf32>
    %44 = vector.shape_cast %43 : vector<10x16xf32> to vector<1x10x16xf32>
    %45 = arith.addf %38, %44 : vector<1x10x16xf32>
    %46 = vector.extract_strided_slice %21 {offsets = [0, 3, 0], sizes = [1, 10, 8], strides = [1, 1, 1]} : vector<1x14x8xf32> to vector<1x10x8xf32>
    %47 = vector.extract_strided_slice %23 {offsets = [3, 0, 0], sizes = [1, 8, 16], strides = [1, 1, 1]} : vector<5x16x32xf32> to vector<1x8x16xf32>
    %48 = vector.shape_cast %47 : vector<1x8x16xf32> to vector<8x16xf32>
    %49 = vector.shape_cast %46 : vector<1x10x8xf32> to vector<10x8xf32>
    %cst_42 = arith.constant dense<0.000000e+00> : vector<10x16xf32>
    %50 = tpu.matmul %49, %48, %cst_42 {dimension_numbers = #tpu.dot_dimension_numbers<[1], [0], [0], [1], [0, 0, 1, 1], [], []>} : vector<10x8xf32>, vector<8x16xf32>, vector<10x16xf32> -> vector<10x16xf32>
    %51 = vector.shape_cast %50 : vector<10x16xf32> to vector<1x10x16xf32>
    %52 = arith.addf %45, %51 : vector<1x10x16xf32>
    %53 = vector.extract_strided_slice %21 {offsets = [0, 4, 0], sizes = [1, 10, 8], strides = [1, 1, 1]} : vector<1x14x8xf32> to vector<1x10x8xf32>
    %54 = vector.extract_strided_slice %23 {offsets = [4, 0, 0], sizes = [1, 8, 16], strides = [1, 1, 1]} : vector<5x16x32xf32> to vector<1x8x16xf32>
    %55 = vector.shape_cast %54 : vector<1x8x16xf32> to vector<8x16xf32>
    %56 = vector.shape_cast %53 : vector<1x10x8xf32> to vector<10x8xf32>
    %cst_43 = arith.constant dense<0.000000e+00> : vector<10x16xf32>
    %57 = tpu.matmul %56, %55, %cst_43 {dimension_numbers = #tpu.dot_dimension_numbers<[1], [0], [0], [1], [0, 0, 1, 1], [], []>} : vector<10x8xf32>, vector<8x16xf32>, vector<10x16xf32> -> vector<10x16xf32>
    %58 = vector.shape_cast %57 : vector<10x16xf32> to vector<1x10x16xf32>
    %59 = arith.addf %52, %58 : vector<1x10x16xf32>
    %c0_44 = arith.constant 0 : index
    %c0_45 = arith.constant 0 : index
    %60 = vector.load %arg3[%c0_44, %c0_45] : memref<4x32xf32, #tpu.memory_space<vmem>>, vector<1x32xf32>
    %61 = vector.extract_strided_slice %60 {offsets = [0, 0], sizes = [1, 16], strides = [1, 1]} : vector<1x32xf32> to vector<1x16xf32>
    %62 = vector.shape_cast %61 : vector<1x16xf32> to vector<1x1x16xf32>
    %63 = vector.broadcast %62 : vector<1x1x16xf32> to vector<1x10x16xf32>
    %64 = arith.addf %59, %63 : vector<1x10x16xf32>
    %cst_46 = arith.constant 0.000000e+00 : f32
    %65 = vector.broadcast %cst_46 : f32 to vector<1x10x16xf32>
    %66 = arith.cmpf ogt, %64, %65 : vector<1x10x16xf32>
    %cst_47 = arith.constant 0.00999999977 : f32
    %67 = vector.broadcast %cst_47 : f32 to vector<1x10x16xf32>
    %68 = arith.mulf %67, %64 : vector<1x10x16xf32>
    %69 = arith.select %66, %64, %68 : vector<1x10x16xi1>, vector<1x10x16xf32>
    %70 = vector.extract_strided_slice %69 {offsets = [0, 0, 0], sizes = [1, 8, 16], strides = [1, 1, 1]} : vector<1x10x16xf32> to vector<1x8x16xf32>
    %71 = vector.extract_strided_slice %25 {offsets = [0, 0, 0], sizes = [1, 16, 8], strides = [1, 1, 1]} : vector<3x32x16xf32> to vector<1x16x8xf32>
    %72 = vector.shape_cast %71 : vector<1x16x8xf32> to vector<16x8xf32>
    %73 = vector.shape_cast %70 : vector<1x8x16xf32> to vector<8x16xf32>
    %cst_48 = arith.constant dense<0.000000e+00> : vector<8x8xf32>
    %74 = tpu.matmul %73, %72, %cst_48 {dimension_numbers = #tpu.dot_dimension_numbers<[1], [0], [0], [1], [0, 0, 1, 1], [], []>} : vector<8x16xf32>, vector<16x8xf32>, vector<8x8xf32> -> vector<8x8xf32>
    %75 = vector.shape_cast %74 : vector<8x8xf32> to vector<1x8x8xf32>
    %76 = vector.extract_strided_slice %69 {offsets = [0, 1, 0], sizes = [1, 8, 16], strides = [1, 1, 1]} : vector<1x10x16xf32> to vector<1x8x16xf32>
    %77 = vector.extract_strided_slice %25 {offsets = [1, 0, 0], sizes = [1, 16, 8], strides = [1, 1, 1]} : vector<3x32x16xf32> to vector<1x16x8xf32>
    %78 = vector.shape_cast %77 : vector<1x16x8xf32> to vector<16x8xf32>
    %79 = vector.shape_cast %76 : vector<1x8x16xf32> to vector<8x16xf32>
    %cst_49 = arith.constant dense<0.000000e+00> : vector<8x8xf32>
    %80 = tpu.matmul %79, %78, %cst_49 {dimension_numbers = #tpu.dot_dimension_numbers<[1], [0], [0], [1], [0, 0, 1, 1], [], []>} : vector<8x16xf32>, vector<16x8xf32>, vector<8x8xf32> -> vector<8x8xf32>
    %81 = vector.shape_cast %80 : vector<8x8xf32> to vector<1x8x8xf32>
    %82 = arith.addf %75, %81 : vector<1x8x8xf32>
    %83 = vector.extract_strided_slice %69 {offsets = [0, 2, 0], sizes = [1, 8, 16], strides = [1, 1, 1]} : vector<1x10x16xf32> to vector<1x8x16xf32>
    %84 = vector.extract_strided_slice %25 {offsets = [2, 0, 0], sizes = [1, 16, 8], strides = [1, 1, 1]} : vector<3x32x16xf32> to vector<1x16x8xf32>
    %85 = vector.shape_cast %84 : vector<1x16x8xf32> to vector<16x8xf32>
    %86 = vector.shape_cast %83 : vector<1x8x16xf32> to vector<8x16xf32>
    %cst_50 = arith.constant dense<0.000000e+00> : vector<8x8xf32>
    %87 = tpu.matmul %86, %85, %cst_50 {dimension_numbers = #tpu.dot_dimension_numbers<[1], [0], [0], [1], [0, 0, 1, 1], [], []>} : vector<8x16xf32>, vector<16x8xf32>, vector<8x8xf32> -> vector<8x8xf32>
    %88 = vector.shape_cast %87 : vector<8x8xf32> to vector<1x8x8xf32>
    %89 = arith.addf %82, %88 : vector<1x8x8xf32>
    %c0_51 = arith.constant 0 : index
    %c0_52 = arith.constant 0 : index
    %90 = vector.load %arg5[%c0_51, %c0_52] : memref<4x16xf32, #tpu.memory_space<vmem>>, vector<1x16xf32>
    %91 = vector.extract_strided_slice %90 {offsets = [0, 0], sizes = [1, 8], strides = [1, 1]} : vector<1x16xf32> to vector<1x8xf32>
    %92 = vector.shape_cast %91 : vector<1x8xf32> to vector<1x1x8xf32>
    %93 = vector.broadcast %92 : vector<1x1x8xf32> to vector<1x8x8xf32>
    %94 = arith.addf %89, %93 : vector<1x8x8xf32>
    %95 = math.tanh %94 : vector<1x8x8xf32>
    %96 = vector.extract_strided_slice %95 {offsets = [0, 0, 0], sizes = [1, 8, 4], strides = [1, 1, 1]} : vector<1x8x8xf32> to vector<1x8x4xf32>
    %97 = math.exp %96 : vector<1x8x4xf32>
    %98 = arith.mulf %17, %97 : vector<1x8x4xf32>
    %99 = vector.extract_strided_slice %95 {offsets = [0, 0, 4], sizes = [1, 8, 4], strides = [1, 1, 1]} : vector<1x8x8xf32> to vector<1x8x4xf32>
    %100 = math.exp %99 : vector<1x8x4xf32>
    %101 = arith.mulf %8, %100 : vector<1x8x4xf32>
    %102 = tpu.concatenate %98, %101 in 2 : vector<1x8x4xf32>, vector<1x8x4xf32> -> vector<1x8x8xf32>
    %103 = vector.extract_strided_slice %102 {offsets = [0, 0, 0], sizes = [1, 1, 8], strides = [1, 1, 1]} : vector<1x8x8xf32> to vector<1x1x8xf32>
    %104 = vector.extract_strided_slice %102 {offsets = [0, 7, 0], sizes = [1, 1, 8], strides = [1, 1, 1]} : vector<1x8x8xf32> to vector<1x1x8xf32>
    %105 = tpu.concatenate %103, %103, %103, %102, %104, %104, %104 in 1 : vector<1x1x8xf32>, vector<1x1x8xf32>, vector<1x1x8xf32>, vector<1x8x8xf32>, vector<1x1x8xf32>, vector<1x1x8xf32>, vector<1x1x8xf32> -> vector<1x14x8xf32>
    %c1_53 = arith.constant 1 : index
    %c0_54 = arith.constant 0 : index
    %c0_55 = arith.constant 0 : index
    %c0_56 = arith.constant 0 : index
    %106 = vector.load %arg2[%c1_53, %c0_54, %c0_55, %c0_56] : memref<4x5x16x32xf32, #tpu.memory_space<vmem>>, vector<1x5x16x32xf32>
    %107 = vector.shape_cast %106 : vector<1x5x16x32xf32> to vector<5x16x32xf32>
    %c1_57 = arith.constant 1 : index
    %c0_58 = arith.constant 0 : index
    %c0_59 = arith.constant 0 : index
    %c0_60 = arith.constant 0 : index
    %108 = vector.load %arg4[%c1_57, %c0_58, %c0_59, %c0_60] : memref<4x3x32x16xf32, #tpu.memory_space<vmem>>, vector<1x3x32x16xf32>
    %109 = vector.shape_cast %108 : vector<1x3x32x16xf32> to vector<3x32x16xf32>
    %110 = vector.extract_strided_slice %105 {offsets = [0, 0, 0], sizes = [1, 10, 8], strides = [1, 1, 1]} : vector<1x14x8xf32> to vector<1x10x8xf32>
    %111 = vector.extract_strided_slice %107 {offsets = [0, 0, 0], sizes = [1, 8, 16], strides = [1, 1, 1]} : vector<5x16x32xf32> to vector<1x8x16xf32>
    %112 = vector.shape_cast %111 : vector<1x8x16xf32> to vector<8x16xf32>
    %113 = vector.shape_cast %110 : vector<1x10x8xf32> to vector<10x8xf32>
    %cst_61 = arith.constant dense<0.000000e+00> : vector<10x16xf32>
    %114 = tpu.matmul %113, %112, %cst_61 {dimension_numbers = #tpu.dot_dimension_numbers<[1], [0], [0], [1], [0, 0, 1, 1], [], []>} : vector<10x8xf32>, vector<8x16xf32>, vector<10x16xf32> -> vector<10x16xf32>
    %115 = vector.shape_cast %114 : vector<10x16xf32> to vector<1x10x16xf32>
    %116 = vector.extract_strided_slice %105 {offsets = [0, 1, 0], sizes = [1, 10, 8], strides = [1, 1, 1]} : vector<1x14x8xf32> to vector<1x10x8xf32>
    %117 = vector.extract_strided_slice %107 {offsets = [1, 0, 0], sizes = [1, 8, 16], strides = [1, 1, 1]} : vector<5x16x32xf32> to vector<1x8x16xf32>
    %118 = vector.shape_cast %117 : vector<1x8x16xf32> to vector<8x16xf32>
    %119 = vector.shape_cast %116 : vector<1x10x8xf32> to vector<10x8xf32>
    %cst_62 = arith.constant dense<0.000000e+00> : vector<10x16xf32>
    %120 = tpu.matmul %119, %118, %cst_62 {dimension_numbers = #tpu.dot_dimension_numbers<[1], [0], [0], [1], [0, 0, 1, 1], [], []>} : vector<10x8xf32>, vector<8x16xf32>, vector<10x16xf32> -> vector<10x16xf32>
    %121 = vector.shape_cast %120 : vector<10x16xf32> to vector<1x10x16xf32>
    %122 = arith.addf %115, %121 : vector<1x10x16xf32>
    %123 = vector.extract_strided_slice %105 {offsets = [0, 2, 0], sizes = [1, 10, 8], strides = [1, 1, 1]} : vector<1x14x8xf32> to vector<1x10x8xf32>
    %124 = vector.extract_strided_slice %107 {offsets = [2, 0, 0], sizes = [1, 8, 16], strides = [1, 1, 1]} : vector<5x16x32xf32> to vector<1x8x16xf32>
    %125 = vector.shape_cast %124 : vector<1x8x16xf32> to vector<8x16xf32>
    %126 = vector.shape_cast %123 : vector<1x10x8xf32> to vector<10x8xf32>
    %cst_63 = arith.constant dense<0.000000e+00> : vector<10x16xf32>
    %127 = tpu.matmul %126, %125, %cst_63 {dimension_numbers = #tpu.dot_dimension_numbers<[1], [0], [0], [1], [0, 0, 1, 1], [], []>} : vector<10x8xf32>, vector<8x16xf32>, vector<10x16xf32> -> vector<10x16xf32>
    %128 = vector.shape_cast %127 : vector<10x16xf32> to vector<1x10x16xf32>
    %129 = arith.addf %122, %128 : vector<1x10x16xf32>
    %130 = vector.extract_strided_slice %105 {offsets = [0, 3, 0], sizes = [1, 10, 8], strides = [1, 1, 1]} : vector<1x14x8xf32> to vector<1x10x8xf32>
    %131 = vector.extract_strided_slice %107 {offsets = [3, 0, 0], sizes = [1, 8, 16], strides = [1, 1, 1]} : vector<5x16x32xf32> to vector<1x8x16xf32>
    %132 = vector.shape_cast %131 : vector<1x8x16xf32> to vector<8x16xf32>
    %133 = vector.shape_cast %130 : vector<1x10x8xf32> to vector<10x8xf32>
    %cst_64 = arith.constant dense<0.000000e+00> : vector<10x16xf32>
    %134 = tpu.matmul %133, %132, %cst_64 {dimension_numbers = #tpu.dot_dimension_numbers<[1], [0], [0], [1], [0, 0, 1, 1], [], []>} : vector<10x8xf32>, vector<8x16xf32>, vector<10x16xf32> -> vector<10x16xf32>
    %135 = vector.shape_cast %134 : vector<10x16xf32> to vector<1x10x16xf32>
    %136 = arith.addf %129, %135 : vector<1x10x16xf32>
    %137 = vector.extract_strided_slice %105 {offsets = [0, 4, 0], sizes = [1, 10, 8], strides = [1, 1, 1]} : vector<1x14x8xf32> to vector<1x10x8xf32>
    %138 = vector.extract_strided_slice %107 {offsets = [4, 0, 0], sizes = [1, 8, 16], strides = [1, 1, 1]} : vector<5x16x32xf32> to vector<1x8x16xf32>
    %139 = vector.shape_cast %138 : vector<1x8x16xf32> to vector<8x16xf32>
    %140 = vector.shape_cast %137 : vector<1x10x8xf32> to vector<10x8xf32>
    %cst_65 = arith.constant dense<0.000000e+00> : vector<10x16xf32>
    %141 = tpu.matmul %140, %139, %cst_65 {dimension_numbers = #tpu.dot_dimension_numbers<[1], [0], [0], [1], [0, 0, 1, 1], [], []>} : vector<10x8xf32>, vector<8x16xf32>, vector<10x16xf32> -> vector<10x16xf32>
    %142 = vector.shape_cast %141 : vector<10x16xf32> to vector<1x10x16xf32>
    %143 = arith.addf %136, %142 : vector<1x10x16xf32>
    %c1_66 = arith.constant 1 : index
    %c0_67 = arith.constant 0 : index
    %144 = vector.load %arg3[%c1_66, %c0_67] : memref<4x32xf32, #tpu.memory_space<vmem>>, vector<1x32xf32>
    %145 = vector.extract_strided_slice %144 {offsets = [0, 0], sizes = [1, 16], strides = [1, 1]} : vector<1x32xf32> to vector<1x16xf32>
    %146 = vector.shape_cast %145 : vector<1x16xf32> to vector<1x1x16xf32>
    %147 = vector.broadcast %146 : vector<1x1x16xf32> to vector<1x10x16xf32>
    %148 = arith.addf %143, %147 : vector<1x10x16xf32>
    %cst_68 = arith.constant 0.000000e+00 : f32
    %149 = vector.broadcast %cst_68 : f32 to vector<1x10x16xf32>
    %150 = arith.cmpf ogt, %148, %149 : vector<1x10x16xf32>
    %cst_69 = arith.constant 0.00999999977 : f32
    %151 = vector.broadcast %cst_69 : f32 to vector<1x10x16xf32>
    %152 = arith.mulf %151, %148 : vector<1x10x16xf32>
    %153 = arith.select %150, %148, %152 : vector<1x10x16xi1>, vector<1x10x16xf32>
    %154 = vector.extract_strided_slice %153 {offsets = [0, 0, 0], sizes = [1, 8, 16], strides = [1, 1, 1]} : vector<1x10x16xf32> to vector<1x8x16xf32>
    %155 = vector.extract_strided_slice %109 {offsets = [0, 0, 0], sizes = [1, 16, 8], strides = [1, 1, 1]} : vector<3x32x16xf32> to vector<1x16x8xf32>
    %156 = vector.shape_cast %155 : vector<1x16x8xf32> to vector<16x8xf32>
    %157 = vector.shape_cast %154 : vector<1x8x16xf32> to vector<8x16xf32>
    %cst_70 = arith.constant dense<0.000000e+00> : vector<8x8xf32>
    %158 = tpu.matmul %157, %156, %cst_70 {dimension_numbers = #tpu.dot_dimension_numbers<[1], [0], [0], [1], [0, 0, 1, 1], [], []>} : vector<8x16xf32>, vector<16x8xf32>, vector<8x8xf32> -> vector<8x8xf32>
    %159 = vector.shape_cast %158 : vector<8x8xf32> to vector<1x8x8xf32>
    %160 = vector.extract_strided_slice %153 {offsets = [0, 1, 0], sizes = [1, 8, 16], strides = [1, 1, 1]} : vector<1x10x16xf32> to vector<1x8x16xf32>
    %161 = vector.extract_strided_slice %109 {offsets = [1, 0, 0], sizes = [1, 16, 8], strides = [1, 1, 1]} : vector<3x32x16xf32> to vector<1x16x8xf32>
    %162 = vector.shape_cast %161 : vector<1x16x8xf32> to vector<16x8xf32>
    %163 = vector.shape_cast %160 : vector<1x8x16xf32> to vector<8x16xf32>
    %cst_71 = arith.constant dense<0.000000e+00> : vector<8x8xf32>
    %164 = tpu.matmul %163, %162, %cst_71 {dimension_numbers = #tpu.dot_dimension_numbers<[1], [0], [0], [1], [0, 0, 1, 1], [], []>} : vector<8x16xf32>, vector<16x8xf32>, vector<8x8xf32> -> vector<8x8xf32>
    %165 = vector.shape_cast %164 : vector<8x8xf32> to vector<1x8x8xf32>
    %166 = arith.addf %159, %165 : vector<1x8x8xf32>
    %167 = vector.extract_strided_slice %153 {offsets = [0, 2, 0], sizes = [1, 8, 16], strides = [1, 1, 1]} : vector<1x10x16xf32> to vector<1x8x16xf32>
    %168 = vector.extract_strided_slice %109 {offsets = [2, 0, 0], sizes = [1, 16, 8], strides = [1, 1, 1]} : vector<3x32x16xf32> to vector<1x16x8xf32>
    %169 = vector.shape_cast %168 : vector<1x16x8xf32> to vector<16x8xf32>
    %170 = vector.shape_cast %167 : vector<1x8x16xf32> to vector<8x16xf32>
    %cst_72 = arith.constant dense<0.000000e+00> : vector<8x8xf32>
    %171 = tpu.matmul %170, %169, %cst_72 {dimension_numbers = #tpu.dot_dimension_numbers<[1], [0], [0], [1], [0, 0, 1, 1], [], []>} : vector<8x16xf32>, vector<16x8xf32>, vector<8x8xf32> -> vector<8x8xf32>
    %172 = vector.shape_cast %171 : vector<8x8xf32> to vector<1x8x8xf32>
    %173 = arith.addf %166, %172 : vector<1x8x8xf32>
    %c1_73 = arith.constant 1 : index
    %c0_74 = arith.constant 0 : index
    %174 = vector.load %arg5[%c1_73, %c0_74] : memref<4x16xf32, #tpu.memory_space<vmem>>, vector<1x16xf32>
    %175 = vector.extract_strided_slice %174 {offsets = [0, 0], sizes = [1, 8], strides = [1, 1]} : vector<1x16xf32> to vector<1x8xf32>
    %176 = vector.shape_cast %175 : vector<1x8xf32> to vector<1x1x8xf32>
    %177 = vector.broadcast %176 : vector<1x1x8xf32> to vector<1x8x8xf32>
    %178 = arith.addf %173, %177 : vector<1x8x8xf32>
    %179 = math.tanh %178 : vector<1x8x8xf32>
    %180 = vector.extract_strided_slice %179 {offsets = [0, 0, 0], sizes = [1, 8, 4], strides = [1, 1, 1]} : vector<1x8x8xf32> to vector<1x8x4xf32>
    %181 = arith.addf %101, %180 : vector<1x8x4xf32>
    %182 = vector.extract_strided_slice %179 {offsets = [0, 0, 4], sizes = [1, 8, 4], strides = [1, 1, 1]} : vector<1x8x8xf32> to vector<1x8x4xf32>
    %183 = arith.subf %98, %182 : vector<1x8x4xf32>
    %c0_75 = arith.constant 0 : index
    %c0_76 = arith.constant 0 : index
    %c0_77 = arith.constant 0 : index
    %184 = vector.load %arg7[%c0_75, %c0_76, %c0_77] : memref<1x8x8xf32, #tpu.memory_space<vmem>>, vector<1x8x4xf32>
    tpu.vector_store %arg7[%c0_75, %c0_76, %c0_77], %181 {strides = array<i32>} : memref<1x8x8xf32, #tpu.memory_space<vmem>>, vector<1x8x4xf32>,
    %c0_78 = arith.constant 0 : index
    %c0_79 = arith.constant 0 : index
    %c4_80 = arith.constant 4 : index
    %185 = vector.load %arg7[%c0_78, %c0_79, %c4_80] : memref<1x8x8xf32, #tpu.memory_space<vmem>>, vector<1x8x4xf32>
    tpu.vector_store %arg7[%c0_78, %c0_79, %c4_80], %183 {strides = array<i32>} : memref<1x8x8xf32, #tpu.memory_space<vmem>>, vector<1x8x4xf32>,
    %c0_81 = arith.constant 0 : index
    %c0_82 = arith.constant 0 : index
    %c0_83 = arith.constant 0 : index
    %186 = vector.load %arg7[%c0_81, %c0_82, %c0_83] : memref<1x8x8xf32, #tpu.memory_space<vmem>>, vector<1x1x8xf32>
    %c0_84 = arith.constant 0 : index
    %c2_85 = arith.constant 2 : index
    %c0_86 = arith.constant 0 : index
    %187 = vector.load %arg7[%c0_84, %c2_85, %c0_86] : memref<1x8x8xf32, #tpu.memory_space<vmem>>, vector<1x1x8xf32>
    %c0_87 = arith.constant 0 : index
    %c4_88 = arith.constant 4 : index
    %c0_89 = arith.constant 0 : index
    %188 = vector.load %arg7[%c0_87, %c4_88, %c0_89] : memref<1x8x8xf32, #tpu.memory_space<vmem>>, vector<1x1x8xf32>
    %c0_90 = arith.constant 0 : index
    %c6_91 = arith.constant 6 : index
    %c0_92 = arith.constant 0 : index
    %189 = vector.load %arg7[%c0_90, %c6_91, %c0_92] : memref<1x8x8xf32, #tpu.memory_space<vmem>>, vector<1x1x8xf32>
    %190 = tpu.concatenate %186, %187, %188, %189 in 1 : vector<1x1x8xf32>, vector<1x1x8xf32>, vector<1x1x8xf32>, vector<1x1x8xf32> -> vector<1x4x8xf32>
    %c0_93 = arith.constant 0 : index
    %c1_94 = arith.constant 1 : index
    %c0_95 = arith.constant 0 : index
    %191 = vector.load %arg7[%c0_93, %c1_94, %c0_95] : memref<1x8x8xf32, #tpu.memory_space<vmem>>, vector<1x1x8xf32>
    %c0_96 = arith.constant 0 : index
    %c3_97 = arith.constant 3 : index
    %c0_98 = arith.constant 0 : index
    %192 = vector.load %arg7[%c0_96, %c3_97, %c0_98] : memref<1x8x8xf32, #tpu.memory_space<vmem>>, vector<1x1x8xf32>
    %c0_99 = arith.constant 0 : index
    %c5_100 = arith.constant 5 : index
    %c0_101 = arith.constant 0 : index
    %193 = vector.load %arg7[%c0_99, %c5_100, %c0_101] : memref<1x8x8xf32, #tpu.memory_space<vmem>>, vector<1x1x8xf32>
    %c0_102 = arith.constant 0 : index
    %c7_103 = arith.constant 7 : index
    %c0_104 = arith.constant 0 : index
    %194 = vector.load %arg7[%c0_102, %c7_103, %c0_104] : memref<1x8x8xf32, #tpu.memory_space<vmem>>, vector<1x1x8xf32>
    %195 = tpu.concatenate %191, %192, %193, %194 in 1 : vector<1x1x8xf32>, vector<1x1x8xf32>, vector<1x1x8xf32>, vector<1x1x8xf32> -> vector<1x4x8xf32>
    %196 = tpu.concatenate %190, %195 in 2 : vector<1x4x8xf32>, vector<1x4x8xf32> -> vector<1x4x16xf32>
    %197 = vector.extract_strided_slice %196 {offsets = [0, 0, 0], sizes = [1, 1, 16], strides = [1, 1, 1]} : vector<1x4x16xf32> to vector<1x1x16xf32>
    %198 = vector.extract_strided_slice %196 {offsets = [0, 3, 0], sizes = [1, 1, 16], strides = [1, 1, 1]} : vector<1x4x16xf32> to vector<1x1x16xf32>
    %199 = tpu.concatenate %197, %197, %197, %196, %198, %198, %198 in 1 : vector<1x1x16xf32>, vector<1x1x16xf32>, vector<1x1x16xf32>, vector<1x4x16xf32>, vector<1x1x16xf32>, vector<1x1x16xf32>, vector<1x1x16xf32> -> vector<1x10x16xf32>
    %c2_105 = arith.constant 2 : index
    %c0_106 = arith.constant 0 : index
    %c0_107 = arith.constant 0 : index
    %c0_108 = arith.constant 0 : index
    %200 = vector.load %arg2[%c2_105, %c0_106, %c0_107, %c0_108] : memref<4x5x16x32xf32, #tpu.memory_space<vmem>>, vector<1x5x16x32xf32>
    %201 = vector.shape_cast %200 : vector<1x5x16x32xf32> to vector<5x16x32xf32>
    %c2_109 = arith.constant 2 : index
    %c0_110 = arith.constant 0 : index
    %c0_111 = arith.constant 0 : index
    %c0_112 = arith.constant 0 : index
    %202 = vector.load %arg4[%c2_109, %c0_110, %c0_111, %c0_112] : memref<4x3x32x16xf32, #tpu.memory_space<vmem>>, vector<1x3x32x16xf32>
    %203 = vector.shape_cast %202 : vector<1x3x32x16xf32> to vector<3x32x16xf32>
    %204 = vector.extract_strided_slice %199 {offsets = [0, 0, 0], sizes = [1, 6, 16], strides = [1, 1, 1]} : vector<1x10x16xf32> to vector<1x6x16xf32>
    %205 = vector.extract_strided_slice %201 {offsets = [0, 0, 0], sizes = [1, 16, 32], strides = [1, 1, 1]} : vector<5x16x32xf32> to vector<1x16x32xf32>
    %206 = vector.shape_cast %205 : vector<1x16x32xf32> to vector<16x32xf32>
    %207 = vector.shape_cast %204 : vector<1x6x16xf32> to vector<6x16xf32>
    %cst_113 = arith.constant dense<0.000000e+00> : vector<6x32xf32>
    %208 = tpu.matmul %207, %206, %cst_113 {dimension_numbers = #tpu.dot_dimension_numbers<[1], [0], [0], [1], [0, 0, 1, 1], [], []>} : vector<6x16xf32>, vector<16x32xf32>, vector<6x32xf32> -> vector<6x32xf32>
    %209 = vector.shape_cast %208 : vector<6x32xf32> to vector<1x6x32xf32>
    %210 = vector.extract_strided_slice %199 {offsets = [0, 1, 0], sizes = [1, 6, 16], strides = [1, 1, 1]} : vector<1x10x16xf32> to vector<1x6x16xf32>
    %211 = vector.extract_strided_slice %201 {offsets = [1, 0, 0], sizes = [1, 16, 32], strides = [1, 1, 1]} : vector<5x16x32xf32> to vector<1x16x32xf32>
    %212 = vector.shape_cast %211 : vector<1x16x32xf32> to vector<16x32xf32>
    %213 = vector.shape_cast %210 : vector<1x6x16xf32> to vector<6x16xf32>
    %cst_114 = arith.constant dense<0.000000e+00> : vector<6x32xf32>
    %214 = tpu.matmul %213, %212, %cst_114 {dimension_numbers = #tpu.dot_dimension_numbers<[1], [0], [0], [1], [0, 0, 1, 1], [], []>} : vector<6x16xf32>, vector<16x32xf32>, vector<6x32xf32> -> vector<6x32xf32>
    %215 = vector.shape_cast %214 : vector<6x32xf32> to vector<1x6x32xf32>
    %216 = arith.addf %209, %215 : vector<1x6x32xf32>
    %217 = vector.extract_strided_slice %199 {offsets = [0, 2, 0], sizes = [1, 6, 16], strides = [1, 1, 1]} : vector<1x10x16xf32> to vector<1x6x16xf32>
    %218 = vector.extract_strided_slice %201 {offsets = [2, 0, 0], sizes = [1, 16, 32], strides = [1, 1, 1]} : vector<5x16x32xf32> to vector<1x16x32xf32>
    %219 = vector.shape_cast %218 : vector<1x16x32xf32> to vector<16x32xf32>
    %220 = vector.shape_cast %217 : vector<1x6x16xf32> to vector<6x16xf32>
    %cst_115 = arith.constant dense<0.000000e+00> : vector<6x32xf32>
    %221 = tpu.matmul %220, %219, %cst_115 {dimension_numbers = #tpu.dot_dimension_numbers<[1], [0], [0], [1], [0, 0, 1, 1], [], []>} : vector<6x16xf32>, vector<16x32xf32>, vector<6x32xf32> -> vector<6x32xf32>
    %222 = vector.shape_cast %221 : vector<6x32xf32> to vector<1x6x32xf32>
    %223 = arith.addf %216, %222 : vector<1x6x32xf32>
    %224 = vector.extract_strided_slice %199 {offsets = [0, 3, 0], sizes = [1, 6, 16], strides = [1, 1, 1]} : vector<1x10x16xf32> to vector<1x6x16xf32>
    %225 = vector.extract_strided_slice %201 {offsets = [3, 0, 0], sizes = [1, 16, 32], strides = [1, 1, 1]} : vector<5x16x32xf32> to vector<1x16x32xf32>
    %226 = vector.shape_cast %225 : vector<1x16x32xf32> to vector<16x32xf32>
    %227 = vector.shape_cast %224 : vector<1x6x16xf32> to vector<6x16xf32>
    %cst_116 = arith.constant dense<0.000000e+00> : vector<6x32xf32>
    %228 = tpu.matmul %227, %226, %cst_116 {dimension_numbers = #tpu.dot_dimension_numbers<[1], [0], [0], [1], [0, 0, 1, 1], [], []>} : vector<6x16xf32>, vector<16x32xf32>, vector<6x32xf32> -> vector<6x32xf32>
    %229 = vector.shape_cast %228 : vector<6x32xf32> to vector<1x6x32xf32>
    %230 = arith.addf %223, %229 : vector<1x6x32xf32>
    %231 = vector.extract_strided_slice %199 {offsets = [0, 4, 0], sizes = [1, 6, 16], strides = [1, 1, 1]} : vector<1x10x16xf32> to vector<1x6x16xf32>
    %232 = vector.extract_strided_slice %201 {offsets = [4, 0, 0], sizes = [1, 16, 32], strides = [1, 1, 1]} : vector<5x16x32xf32> to vector<1x16x32xf32>
    %233 = vector.shape_cast %232 : vector<1x16x32xf32> to vector<16x32xf32>
    %234 = vector.shape_cast %231 : vector<1x6x16xf32> to vector<6x16xf32>
    %cst_117 = arith.constant dense<0.000000e+00> : vector<6x32xf32>
    %235 = tpu.matmul %234, %233, %cst_117 {dimension_numbers = #tpu.dot_dimension_numbers<[1], [0], [0], [1], [0, 0, 1, 1], [], []>} : vector<6x16xf32>, vector<16x32xf32>, vector<6x32xf32> -> vector<6x32xf32>
    %236 = vector.shape_cast %235 : vector<6x32xf32> to vector<1x6x32xf32>
    %237 = arith.addf %230, %236 : vector<1x6x32xf32>
    %c2_118 = arith.constant 2 : index
    %c0_119 = arith.constant 0 : index
    %238 = vector.load %arg3[%c2_118, %c0_119] : memref<4x32xf32, #tpu.memory_space<vmem>>, vector<1x32xf32>
    %239 = vector.shape_cast %238 : vector<1x32xf32> to vector<1x1x32xf32>
    %240 = vector.broadcast %239 : vector<1x1x32xf32> to vector<1x6x32xf32>
    %241 = arith.addf %237, %240 : vector<1x6x32xf32>
    %cst_120 = arith.constant 0.000000e+00 : f32
    %242 = vector.broadcast %cst_120 : f32 to vector<1x6x32xf32>
    %243 = arith.cmpf ogt, %241, %242 : vector<1x6x32xf32>
    %cst_121 = arith.constant 0.00999999977 : f32
    %244 = vector.broadcast %cst_121 : f32 to vector<1x6x32xf32>
    %245 = arith.mulf %244, %241 : vector<1x6x32xf32>
    %246 = arith.select %243, %241, %245 : vector<1x6x32xi1>, vector<1x6x32xf32>
    %247 = vector.extract_strided_slice %246 {offsets = [0, 0, 0], sizes = [1, 4, 32], strides = [1, 1, 1]} : vector<1x6x32xf32> to vector<1x4x32xf32>
    %248 = vector.extract_strided_slice %203 {offsets = [0, 0, 0], sizes = [1, 32, 16], strides = [1, 1, 1]} : vector<3x32x16xf32> to vector<1x32x16xf32>
    %249 = vector.shape_cast %248 : vector<1x32x16xf32> to vector<32x16xf32>
    %250 = vector.shape_cast %247 : vector<1x4x32xf32> to vector<4x32xf32>
    %cst_122 = arith.constant dense<0.000000e+00> : vector<4x16xf32>
    %251 = tpu.matmul %250, %249, %cst_122 {dimension_numbers = #tpu.dot_dimension_numbers<[1], [0], [0], [1], [0, 0, 1, 1], [], []>} : vector<4x32xf32>, vector<32x16xf32>, vector<4x16xf32> -> vector<4x16xf32>
    %252 = vector.shape_cast %251 : vector<4x16xf32> to vector<1x4x16xf32>
    %253 = vector.extract_strided_slice %246 {offsets = [0, 1, 0], sizes = [1, 4, 32], strides = [1, 1, 1]} : vector<1x6x32xf32> to vector<1x4x32xf32>
    %254 = vector.extract_strided_slice %203 {offsets = [1, 0, 0], sizes = [1, 32, 16], strides = [1, 1, 1]} : vector<3x32x16xf32> to vector<1x32x16xf32>
    %255 = vector.shape_cast %254 : vector<1x32x16xf32> to vector<32x16xf32>
    %256 = vector.shape_cast %253 : vector<1x4x32xf32> to vector<4x32xf32>
    %cst_123 = arith.constant dense<0.000000e+00> : vector<4x16xf32>
    %257 = tpu.matmul %256, %255, %cst_123 {dimension_numbers = #tpu.dot_dimension_numbers<[1], [0], [0], [1], [0, 0, 1, 1], [], []>} : vector<4x32xf32>, vector<32x16xf32>, vector<4x16xf32> -> vector<4x16xf32>
    %258 = vector.shape_cast %257 : vector<4x16xf32> to vector<1x4x16xf32>
    %259 = arith.addf %252, %258 : vector<1x4x16xf32>
    %260 = vector.extract_strided_slice %246 {offsets = [0, 2, 0], sizes = [1, 4, 32], strides = [1, 1, 1]} : vector<1x6x32xf32> to vector<1x4x32xf32>
    %261 = vector.extract_strided_slice %203 {offsets = [2, 0, 0], sizes = [1, 32, 16], strides = [1, 1, 1]} : vector<3x32x16xf32> to vector<1x32x16xf32>
    %262 = vector.shape_cast %261 : vector<1x32x16xf32> to vector<32x16xf32>
    %263 = vector.shape_cast %260 : vector<1x4x32xf32> to vector<4x32xf32>
    %cst_124 = arith.constant dense<0.000000e+00> : vector<4x16xf32>
    %264 = tpu.matmul %263, %262, %cst_124 {dimension_numbers = #tpu.dot_dimension_numbers<[1], [0], [0], [1], [0, 0, 1, 1], [], []>} : vector<4x32xf32>, vector<32x16xf32>, vector<4x16xf32> -> vector<4x16xf32>
    %265 = vector.shape_cast %264 : vector<4x16xf32> to vector<1x4x16xf32>
    %266 = arith.addf %259, %265 : vector<1x4x16xf32>
    %c2_125 = arith.constant 2 : index
    %c0_126 = arith.constant 0 : index
    %267 = vector.load %arg5[%c2_125, %c0_126] : memref<4x16xf32, #tpu.memory_space<vmem>>, vector<1x16xf32>
    %268 = vector.shape_cast %267 : vector<1x16xf32> to vector<1x1x16xf32>
    %269 = vector.broadcast %268 : vector<1x1x16xf32> to vector<1x4x16xf32>
    %270 = arith.addf %266, %269 : vector<1x4x16xf32>
    %271 = math.tanh %270 : vector<1x4x16xf32>
    %272 = vector.extract_strided_slice %271 {offsets = [0, 0, 0], sizes = [1, 4, 8], strides = [1, 1, 1]} : vector<1x4x16xf32> to vector<1x4x8xf32>
    %273 = math.exp %272 : vector<1x4x8xf32>
    %274 = arith.mulf %195, %273 : vector<1x4x8xf32>
    %275 = vector.extract_strided_slice %271 {offsets = [0, 0, 8], sizes = [1, 4, 8], strides = [1, 1, 1]} : vector<1x4x16xf32> to vector<1x4x8xf32>
    %276 = math.exp %275 : vector<1x4x8xf32>
    %277 = arith.mulf %190, %276 : vector<1x4x8xf32>
    %278 = tpu.concatenate %274, %277 in 2 : vector<1x4x8xf32>, vector<1x4x8xf32> -> vector<1x4x16xf32>
    %279 = vector.extract_strided_slice %278 {offsets = [0, 0, 0], sizes = [1, 1, 16], strides = [1, 1, 1]} : vector<1x4x16xf32> to vector<1x1x16xf32>
    %280 = vector.extract_strided_slice %278 {offsets = [0, 3, 0], sizes = [1, 1, 16], strides = [1, 1, 1]} : vector<1x4x16xf32> to vector<1x1x16xf32>
    %281 = tpu.concatenate %279, %279, %279, %278, %280, %280, %280 in 1 : vector<1x1x16xf32>, vector<1x1x16xf32>, vector<1x1x16xf32>, vector<1x4x16xf32>, vector<1x1x16xf32>, vector<1x1x16xf32>, vector<1x1x16xf32> -> vector<1x10x16xf32>
    %c3_127 = arith.constant 3 : index
    %c0_128 = arith.constant 0 : index
    %c0_129 = arith.constant 0 : index
    %c0_130 = arith.constant 0 : index
    %282 = vector.load %arg2[%c3_127, %c0_128, %c0_129, %c0_130] : memref<4x5x16x32xf32, #tpu.memory_space<vmem>>, vector<1x5x16x32xf32>
    %283 = vector.shape_cast %282 : vector<1x5x16x32xf32> to vector<5x16x32xf32>
    %c3_131 = arith.constant 3 : index
    %c0_132 = arith.constant 0 : index
    %c0_133 = arith.constant 0 : index
    %c0_134 = arith.constant 0 : index
    %284 = vector.load %arg4[%c3_131, %c0_132, %c0_133, %c0_134] : memref<4x3x32x16xf32, #tpu.memory_space<vmem>>, vector<1x3x32x16xf32>
    %285 = vector.shape_cast %284 : vector<1x3x32x16xf32> to vector<3x32x16xf32>
    %286 = vector.extract_strided_slice %281 {offsets = [0, 0, 0], sizes = [1, 6, 16], strides = [1, 1, 1]} : vector<1x10x16xf32> to vector<1x6x16xf32>
    %287 = vector.extract_strided_slice %283 {offsets = [0, 0, 0], sizes = [1, 16, 32], strides = [1, 1, 1]} : vector<5x16x32xf32> to vector<1x16x32xf32>
    %288 = vector.shape_cast %287 : vector<1x16x32xf32> to vector<16x32xf32>
    %289 = vector.shape_cast %286 : vector<1x6x16xf32> to vector<6x16xf32>
    %cst_135 = arith.constant dense<0.000000e+00> : vector<6x32xf32>
    %290 = tpu.matmul %289, %288, %cst_135 {dimension_numbers = #tpu.dot_dimension_numbers<[1], [0], [0], [1], [0, 0, 1, 1], [], []>} : vector<6x16xf32>, vector<16x32xf32>, vector<6x32xf32> -> vector<6x32xf32>
    %291 = vector.shape_cast %290 : vector<6x32xf32> to vector<1x6x32xf32>
    %292 = vector.extract_strided_slice %281 {offsets = [0, 1, 0], sizes = [1, 6, 16], strides = [1, 1, 1]} : vector<1x10x16xf32> to vector<1x6x16xf32>
    %293 = vector.extract_strided_slice %283 {offsets = [1, 0, 0], sizes = [1, 16, 32], strides = [1, 1, 1]} : vector<5x16x32xf32> to vector<1x16x32xf32>
    %294 = vector.shape_cast %293 : vector<1x16x32xf32> to vector<16x32xf32>
    %295 = vector.shape_cast %292 : vector<1x6x16xf32> to vector<6x16xf32>
    %cst_136 = arith.constant dense<0.000000e+00> : vector<6x32xf32>
    %296 = tpu.matmul %295, %294, %cst_136 {dimension_numbers = #tpu.dot_dimension_numbers<[1], [0], [0], [1], [0, 0, 1, 1], [], []>} : vector<6x16xf32>, vector<16x32xf32>, vector<6x32xf32> -> vector<6x32xf32>
    %297 = vector.shape_cast %296 : vector<6x32xf32> to vector<1x6x32xf32>
    %298 = arith.addf %291, %297 : vector<1x6x32xf32>
    %299 = vector.extract_strided_slice %281 {offsets = [0, 2, 0], sizes = [1, 6, 16], strides = [1, 1, 1]} : vector<1x10x16xf32> to vector<1x6x16xf32>
    %300 = vector.extract_strided_slice %283 {offsets = [2, 0, 0], sizes = [1, 16, 32], strides = [1, 1, 1]} : vector<5x16x32xf32> to vector<1x16x32xf32>
    %301 = vector.shape_cast %300 : vector<1x16x32xf32> to vector<16x32xf32>
    %302 = vector.shape_cast %299 : vector<1x6x16xf32> to vector<6x16xf32>
    %cst_137 = arith.constant dense<0.000000e+00> : vector<6x32xf32>
    %303 = tpu.matmul %302, %301, %cst_137 {dimension_numbers = #tpu.dot_dimension_numbers<[1], [0], [0], [1], [0, 0, 1, 1], [], []>} : vector<6x16xf32>, vector<16x32xf32>, vector<6x32xf32> -> vector<6x32xf32>
    %304 = vector.shape_cast %303 : vector<6x32xf32> to vector<1x6x32xf32>
    %305 = arith.addf %298, %304 : vector<1x6x32xf32>
    %306 = vector.extract_strided_slice %281 {offsets = [0, 3, 0], sizes = [1, 6, 16], strides = [1, 1, 1]} : vector<1x10x16xf32> to vector<1x6x16xf32>
    %307 = vector.extract_strided_slice %283 {offsets = [3, 0, 0], sizes = [1, 16, 32], strides = [1, 1, 1]} : vector<5x16x32xf32> to vector<1x16x32xf32>
    %308 = vector.shape_cast %307 : vector<1x16x32xf32> to vector<16x32xf32>
    %309 = vector.shape_cast %306 : vector<1x6x16xf32> to vector<6x16xf32>
    %cst_138 = arith.constant dense<0.000000e+00> : vector<6x32xf32>
    %310 = tpu.matmul %309, %308, %cst_138 {dimension_numbers = #tpu.dot_dimension_numbers<[1], [0], [0], [1], [0, 0, 1, 1], [], []>} : vector<6x16xf32>, vector<16x32xf32>, vector<6x32xf32> -> vector<6x32xf32>
    %311 = vector.shape_cast %310 : vector<6x32xf32> to vector<1x6x32xf32>
    %312 = arith.addf %305, %311 : vector<1x6x32xf32>
    %313 = vector.extract_strided_slice %281 {offsets = [0, 4, 0], sizes = [1, 6, 16], strides = [1, 1, 1]} : vector<1x10x16xf32> to vector<1x6x16xf32>
    %314 = vector.extract_strided_slice %283 {offsets = [4, 0, 0], sizes = [1, 16, 32], strides = [1, 1, 1]} : vector<5x16x32xf32> to vector<1x16x32xf32>
    %315 = vector.shape_cast %314 : vector<1x16x32xf32> to vector<16x32xf32>
    %316 = vector.shape_cast %313 : vector<1x6x16xf32> to vector<6x16xf32>
    %cst_139 = arith.constant dense<0.000000e+00> : vector<6x32xf32>
    %317 = tpu.matmul %316, %315, %cst_139 {dimension_numbers = #tpu.dot_dimension_numbers<[1], [0], [0], [1], [0, 0, 1, 1], [], []>} : vector<6x16xf32>, vector<16x32xf32>, vector<6x32xf32> -> vector<6x32xf32>
    %318 = vector.shape_cast %317 : vector<6x32xf32> to vector<1x6x32xf32>
    %319 = arith.addf %312, %318 : vector<1x6x32xf32>
    %c3_140 = arith.constant 3 : index
    %c0_141 = arith.constant 0 : index
    %320 = vector.load %arg3[%c3_140, %c0_141] : memref<4x32xf32, #tpu.memory_space<vmem>>, vector<1x32xf32>
    %321 = vector.shape_cast %320 : vector<1x32xf32> to vector<1x1x32xf32>
    %322 = vector.broadcast %321 : vector<1x1x32xf32> to vector<1x6x32xf32>
    %323 = arith.addf %319, %322 : vector<1x6x32xf32>
    %cst_142 = arith.constant 0.000000e+00 : f32
    %324 = vector.broadcast %cst_142 : f32 to vector<1x6x32xf32>
    %325 = arith.cmpf ogt, %323, %324 : vector<1x6x32xf32>
    %cst_143 = arith.constant 0.00999999977 : f32
    %326 = vector.broadcast %cst_143 : f32 to vector<1x6x32xf32>
    %327 = arith.mulf %326, %323 : vector<1x6x32xf32>
    %328 = arith.select %325, %323, %327 : vector<1x6x32xi1>, vector<1x6x32xf32>
    %329 = vector.extract_strided_slice %328 {offsets = [0, 0, 0], sizes = [1, 4, 32], strides = [1, 1, 1]} : vector<1x6x32xf32> to vector<1x4x32xf32>
    %330 = vector.extract_strided_slice %285 {offsets = [0, 0, 0], sizes = [1, 32, 16], strides = [1, 1, 1]} : vector<3x32x16xf32> to vector<1x32x16xf32>
    %331 = vector.shape_cast %330 : vector<1x32x16xf32> to vector<32x16xf32>
    %332 = vector.shape_cast %329 : vector<1x4x32xf32> to vector<4x32xf32>
    %cst_144 = arith.constant dense<0.000000e+00> : vector<4x16xf32>
    %333 = tpu.matmul %332, %331, %cst_144 {dimension_numbers = #tpu.dot_dimension_numbers<[1], [0], [0], [1], [0, 0, 1, 1], [], []>} : vector<4x32xf32>, vector<32x16xf32>, vector<4x16xf32> -> vector<4x16xf32>
    %334 = vector.shape_cast %333 : vector<4x16xf32> to vector<1x4x16xf32>
    %335 = vector.extract_strided_slice %328 {offsets = [0, 1, 0], sizes = [1, 4, 32], strides = [1, 1, 1]} : vector<1x6x32xf32> to vector<1x4x32xf32>
    %336 = vector.extract_strided_slice %285 {offsets = [1, 0, 0], sizes = [1, 32, 16], strides = [1, 1, 1]} : vector<3x32x16xf32> to vector<1x32x16xf32>
    %337 = vector.shape_cast %336 : vector<1x32x16xf32> to vector<32x16xf32>
    %338 = vector.shape_cast %335 : vector<1x4x32xf32> to vector<4x32xf32>
    %cst_145 = arith.constant dense<0.000000e+00> : vector<4x16xf32>
    %339 = tpu.matmul %338, %337, %cst_145 {dimension_numbers = #tpu.dot_dimension_numbers<[1], [0], [0], [1], [0, 0, 1, 1], [], []>} : vector<4x32xf32>, vector<32x16xf32>, vector<4x16xf32> -> vector<4x16xf32>
    %340 = vector.shape_cast %339 : vector<4x16xf32> to vector<1x4x16xf32>
    %341 = arith.addf %334, %340 : vector<1x4x16xf32>
    %342 = vector.extract_strided_slice %328 {offsets = [0, 2, 0], sizes = [1, 4, 32], strides = [1, 1, 1]} : vector<1x6x32xf32> to vector<1x4x32xf32>
    %343 = vector.extract_strided_slice %285 {offsets = [2, 0, 0], sizes = [1, 32, 16], strides = [1, 1, 1]} : vector<3x32x16xf32> to vector<1x32x16xf32>
    %344 = vector.shape_cast %343 : vector<1x32x16xf32> to vector<32x16xf32>
    %345 = vector.shape_cast %342 : vector<1x4x32xf32> to vector<4x32xf32>
    %cst_146 = arith.constant dense<0.000000e+00> : vector<4x16xf32>
    %346 = tpu.matmul %345, %344, %cst_146 {dimension_numbers = #tpu.dot_dimension_numbers<[1], [0], [0], [1], [0, 0, 1, 1], [], []>} : vector<4x32xf32>, vector<32x16xf32>, vector<4x16xf32> -> vector<4x16xf32>
    %347 = vector.shape_cast %346 : vector<4x16xf32> to vector<1x4x16xf32>
    %348 = arith.addf %341, %347 : vector<1x4x16xf32>
    %c3_147 = arith.constant 3 : index
    %c0_148 = arith.constant 0 : index
    %349 = vector.load %arg5[%c3_147, %c0_148] : memref<4x16xf32, #tpu.memory_space<vmem>>, vector<1x16xf32>
    %350 = vector.shape_cast %349 : vector<1x16xf32> to vector<1x1x16xf32>
    %351 = vector.broadcast %350 : vector<1x1x16xf32> to vector<1x4x16xf32>
    %352 = arith.addf %348, %351 : vector<1x4x16xf32>
    %353 = math.tanh %352 : vector<1x4x16xf32>
    %354 = vector.extract_strided_slice %353 {offsets = [0, 0, 0], sizes = [1, 4, 8], strides = [1, 1, 1]} : vector<1x4x16xf32> to vector<1x4x8xf32>
    %355 = arith.addf %277, %354 : vector<1x4x8xf32>
    %356 = vector.extract_strided_slice %353 {offsets = [0, 0, 8], sizes = [1, 4, 8], strides = [1, 1, 1]} : vector<1x4x16xf32> to vector<1x4x8xf32>
    %357 = arith.subf %274, %356 : vector<1x4x8xf32>
    %358 = vector.extract_strided_slice %355 {offsets = [0, 0, 0], sizes = [1, 1, 8], strides = [1, 1, 1]} : vector<1x4x8xf32> to vector<1x1x8xf32>
    %359 = vector.extract_strided_slice %357 {offsets = [0, 0, 0], sizes = [1, 1, 8], strides = [1, 1, 1]} : vector<1x4x8xf32> to vector<1x1x8xf32>
    %360 = vector.extract_strided_slice %355 {offsets = [0, 1, 0], sizes = [1, 1, 8], strides = [1, 1, 1]} : vector<1x4x8xf32> to vector<1x1x8xf32>
    %361 = vector.extract_strided_slice %357 {offsets = [0, 1, 0], sizes = [1, 1, 8], strides = [1, 1, 1]} : vector<1x4x8xf32> to vector<1x1x8xf32>
    %362 = vector.extract_strided_slice %355 {offsets = [0, 2, 0], sizes = [1, 1, 8], strides = [1, 1, 1]} : vector<1x4x8xf32> to vector<1x1x8xf32>
    %363 = vector.extract_strided_slice %357 {offsets = [0, 2, 0], sizes = [1, 1, 8], strides = [1, 1, 1]} : vector<1x4x8xf32> to vector<1x1x8xf32>
    %364 = vector.extract_strided_slice %355 {offsets = [0, 3, 0], sizes = [1, 1, 8], strides = [1, 1, 1]} : vector<1x4x8xf32> to vector<1x1x8xf32>
    %365 = vector.extract_strided_slice %357 {offsets = [0, 3, 0], sizes = [1, 1, 8], strides = [1, 1, 1]} : vector<1x4x8xf32> to vector<1x1x8xf32>
    %366 = tpu.concatenate %358, %359, %360, %361, %362, %363, %364, %365 in 2 : vector<1x1x8xf32>, vector<1x1x8xf32>, vector<1x1x8xf32>, vector<1x1x8xf32>, vector<1x1x8xf32>, vector<1x1x8xf32>, vector<1x1x8xf32>, vector<1x1x8xf32> -> vector<1x1x64xf32>
    %c0_149 = arith.constant 0 : index
    %c0_150 = arith.constant 0 : index
    %c0_151 = arith.constant 0 : index
    %367 = vector.load %arg6[%c0_149, %c0_150, %c0_151] : memref<1x1x64xf32, #tpu.memory_space<vmem>>, vector<1x1x64xf32>
    tpu.vector_store %arg6[%c0_149, %c0_150, %c0_151], %366 {strides = array<i32>} : memref<1x1x64xf32, #tpu.memory_space<vmem>>, vector<1x1x64xf32>,
    return
  }
  func.func @transform_0(%arg0: i32) -> (i32, i32, i32) {
    %c0_i32 = arith.constant 0 : i32
    %c0_i32_0 = arith.constant 0 : i32
    %c0_i32_1 = arith.constant 0 : i32
    return %arg0, %c0_i32, %c0_i32_0 : i32, i32, i32
  }
  func.func @transform_1(%arg0: i32) -> (i32, i32, i32, i32) {
    %c0_i32 = arith.constant 0 : i32
    %c0_i32_0 = arith.constant 0 : i32
    %c0_i32_1 = arith.constant 0 : i32
    %c0_i32_2 = arith.constant 0 : i32
    %c0_i32_3 = arith.constant 0 : i32
    return %c0_i32, %c0_i32_0, %c0_i32_1, %c0_i32_2 : i32, i32, i32, i32
  }
  func.func @transform_2(%arg0: i32) -> (i32, i32) {
    %c0_i32 = arith.constant 0 : i32
    %c0_i32_0 = arith.constant 0 : i32
    %c0_i32_1 = arith.constant 0 : i32
    return %c0_i32, %c0_i32_0 : i32, i32
  }
  func.func @transform_3(%arg0: i32) -> (i32, i32, i32, i32) {
    %c0_i32 = arith.constant 0 : i32
    %c0_i32_0 = arith.constant 0 : i32
    %c0_i32_1 = arith.constant 0 : i32
    %c0_i32_2 = arith.constant 0 : i32
    %c0_i32_3 = arith.constant 0 : i32
    return %c0_i32, %c0_i32_0, %c0_i32_1, %c0_i32_2 : i32, i32, i32, i32
  }
  func.func @transform_4(%arg0: i32) -> (i32, i32) {
    %c0_i32 = arith.constant 0 : i32
    %c0_i32_0 = arith.constant 0 : i32
    %c0_i32_1 = arith.constant 0 : i32
    return %c0_i32, %c0_i32_0 : i32, i32
  }
  func.func @transform_5(%arg0: i32) -> (i32, i32, i32) {
    %c0_i32 = arith.constant 0 : i32
    %c0_i32_0 = arith.constant 0 : i32
    %c0_i32_1 = arith.constant 0 : i32
    return %arg0, %c0_i32, %c0_i32_0 : i32, i32, i32
  }
}

</mosaic_0001>

<bundles_post_ra>
// kernel: tpu_custom_call.1
= control target key start
LH: loop header
LB: loop body
LE: loop exit
PB: predicated region body
PF: predicated region fallthrough
CT: control target
= control target key end

     0   :  { %10 = vsyncpa [#allocation4], 0  ;;  %s4346_s0 = inlined_call_operand.vmem [shape: f32[2,16,4], index: 0, kind: input, shape index: {}]   ;;  %s4347_s1 = inlined_call_operand.vmem [shape: f32[4,5,16,32], index: 1, kind: input, shape index: {}]   ;;  %s4348_s2 = inlined_call_operand.vmem [shape: f32[4,32], index: 2, kind: input, shape index: {}]   ;;  %s4349_s3 = inlined_call_operand.vmem [shape: f32[4,3,32,16], index: 3, kind: input, shape index: {}]   ;;  %s4350_s4 = inlined_call_operand.vmem [shape: f32[4,16], index: 4, kind: input, shape index: {}]   ;;  %s4351_s5 = inlined_call_operand.hbm [shape: f32[2,1,64], index: 5, kind: output, shape index: {}]  }
   0x1   :  { %12 = vsyncpa [#allocation4 + $0x1], 0  ;;  %s3822_s18 = smov 0   ;;  %s3824_s19 = smov 0  }
   0x2   :  { %s3826_s20 = smov 0   ;;  %s3828_s21 = smov 0  }
   0x3 LB: > { %s3843_s22 = sadd.s32 4294967295, %s3776_s21   ;;  %s3098_s23 = sadd.s32 4294967294, %s3776_s21   ;;  %s3776_s21 = sphi %s3828_s21, %s4357_s21   ;;  %s3772_s20 = sphi %s3826_s20, %s4356_s20   ;;  %s3768_s19 = sphi %s3824_s19, %s4355_s19   ;;  %s3764_s18 = sphi %s3822_s18, %s4354_s18  }
   0x4   : > { %s3847_s24 = sadd.s32 1, %s3776_s21   ;;  %s135_s25 = sadd.s32 1, %s3772_s20 }
   0x5   : > { %s132_s26 = ssub.s32 %s3776_s21, %s3847_s24  ;;  %p145_p0 = scmp.ne.s32.totalorder %s3772_s20, %s3768_s19 }
   0x6   : > { %p133_p1 = scmp.eq.s32.totalorder %s132_s26, 0  ;;  %p146_p2 = scmp.eq.s32.totalorder %s3843_s22, 1 }
   0x7   : > { %p151_p3 = scmp.ne.s32.totalorder %s3768_s19, %s3764_s18  ;;  %p152_p4 = scmp.eq.s32.totalorder %s3098_s23, 1 }
   0x8   : > { %s3858_s27 = scalar_select %p133_p1, %s3772_s20, %s135_s25  }
   0x9   : > { %p3860_p5 = por %p146_p2, %p145_p0  ;;  %p3864_p6 = por %p152_p4, %p151_p3 }
   0xa   : > { %p3101_p7 = scmp.ge.s32.totalorder %s3776_s21, 1  ;;  %p190_p8 = scmp.lt.s32.totalorder %s3776_s21, 3 }
   0xc   : > { %p191_p9 = pnand %p3101_p7, %p190_p8 }
   0xd   : > { %p217_p10 = scmp.lt.s32.totalorder (!%p191_p9), %s3843_s22, 1  ;;  %v255_v0 = vld [vmem:[%s4347_s1] sm:$0xff] (!%p191_p9)  ;;  %v256_v1 = vld [vmem:[%s4347_s1 + $0x10] sm:$0xff] (!%p191_p9)  ;;  %s3778_s16 = smov (!%p191_p9), 4   ;;  %vm229_vm0 = vcmask (!%p191_p9), 31744   ;;  %vm244_vm1 = vcmask (!%p191_p9), 1040384  }
   0xe   : > { %194 = sbr.rel (%p191_p9) target bundleno = 3166 (0xc5e), region = 40  ;;  %3322 = vmatprep.subr.mxu1 (!%p191_p9), %v255_v0  ;;  %3327 = vmatprep.subr.mxu0 (!%p191_p9), %v256_v1  ;;  %v257_v2 = vld [vmem:[%s4347_s1 + $0x20] sm:$0xff] (!%p191_p9)  ;;  %vm246_vm2 = vcmask (!%p191_p9), 1041408   ;;  %vm248_vm3 = vcmask (!%p191_p9), 1042432   ;;  %vm251_vm4 = vcmask (!%p191_p9), 1043456   ;;  %vm253_vm5 = vcmask (!%p191_p9), 1044480  }
   0xf   : > { %3323 = vmatpush3.msra.mxu1 (!%p191_p9), %v255_v0  ;;  %3328 = vmatpush3.msra.mxu0 (!%p191_p9), %v256_v1  ;;  %vm266_vm6 = vcmask (!%p191_p9), 64512   ;;  %vm348_vm7 = vcmask (!%p191_p9), 1046528   ;;  %vm433_vm8 = vcmask (!%p191_p9), 1045504   ;;  %v258_v24 = vld [vmem:[%s4347_s1 + $0x30] sm:$0xff] (!%p191_p9)  ;;  %v259_v28 = vld [vmem:[%s4347_s1 + $0x40] sm:$0xff] (!%p191_p9)  ;;  %v261_v34 = vld [vmem:[%s4349_s3 + $0x8] sm:$0xff] (!%p191_p9) }
  0x10   : > { %3332 = vmatprep.subr.mxu0 (!%p191_p9), %v257_v2  ;;  %v260_v33 = vld [vmem:[%s4349_s3] sm:$0xff] (!%p191_p9)  ;;  %v3779_v36 = vmov (!%p191_p9), 0.0|0.0   ;;  %vm3780_vm9 = vmmov (!%p191_p9), 0   ;;  %v3781_v37 = vmov (!%p191_p9), 0.0   ;;  %v263_v47 = vld [vmem:[%s4349_s3 + $0x28] sm:$0xff] (!%p191_p9)  ;;  %vm699_vm12 = vcmask (!%p191_p9), 130048  }
  0x11   : > { %v3551_v35 = vpack.c.bf16 (!%p191_p9), %v261_v34, %v260_v33  ;;  %3550 = vmatprep.subr.bf16.mxu1 (!%p191_p9), %v3779_v36  ;;  %v3115_v41 = vld [vmem:[%s4348_s2] ss:$0 sm:$0xff] (!%p191_p9)  ;;  %v265_v54 = vld [vmem:[%s4349_s3 + $0x48] sm:$0xff] (!%p191_p9)  ;;  %s3782_s6 = smov (!%p191_p9), 124   ;;  %v3122_v33 = vld [vmem:[%s4347_s1 + $0x70] sm:$0xff] (!%p191_p9)  ;;  %vm1652_vm15 = vcmask (!%p191_p9), 64544  }
  0x12   : > { %v262_v46 = vld [vmem:[%s4349_s3 + $0x20] sm:$0xff] (!%p191_p9)  ;;  %s3784_s8 = smov (!%p191_p9), 120   ;;  %s3785_s14 = smov (!%p191_p9), 16  }
  0x13   : > { %v3554_v51 = vpack.c.bf16 (!%p191_p9), %v263_v47, %v262_v46  ;;  %v264_v53 = vld [vmem:[%s4349_s3 + $0x40] sm:$0xff] (!%p191_p9)  ;;  %s3787_s17 = smov (!%p191_p9), 48   ;;  %s3788_s23 = smov (!%p191_p9), 24  }
  0x14   : > { %v3557_v60 = vpack.c.bf16 (!%p191_p9), %v265_v54, %v264_v53  ;;  %s3790_s25 = smov (!%p191_p9), 56   ;;  %s215_s26 = sand.u32 (!%p191_p9), 1, %s3768_s19  }
  0x15   : > { %s218_s9 = scalar_select %p217_p10, %s3843_s22, 1 }
  0x16   : > { %s216_s30 = scalar_lea.vmem [#allocation3], %s215_s26 }
  0x17   : > { %s3213_s12 = sshll.u32 %s218_s9, 4  ;;  %s3043_s7 = sshll.u32 %s216_s30, 4  ;;  %s4306_s7 = int_to_ptr.vmem [resolvable:$true] %s3043_s7 }
  0x18   : > { %s221_s15 = scalar_lea.vmem %s4346_s0, %s3213_s12  ;;  %s3714_s11 = scalar_lea.vmem %s4306_s7, 16 }
  0x19   : > { %v3884_v3 = vld [vmem:[%s221_s15 + $0x1] ss:$2 sm:$0xff]  ;;  %v3888_v4 = vld [vmem:[%s221_s15] ss:$2 sm:$0xff]  ;;  %s3786_s15 = smov 32   ;;  %p3715_p11 = scmp.ne.s32.totalorder %s4306_s7, %s3714_s11 }
  0x1a   : > { %226 = vrot.lane.b32.xlu0 %v3884_v3, %s3778_s16  ;;  %s3791_s12 = smov [#allocation3]  }
  0x1b   : > { %p3716_p12 = pnand %p3715_p11, %p3860_p5  ;;  %s3718_s13 = sshll.u32 %s3791_s12, 4  ;;  %s3719_s13 = int_to_ptr.vmem [resolvable:$false] %s3718_s13 }
  0x1c   : > { %p3721_p0 = scmp.lt.s32.totalorder %s4306_s7, %s3719_s13 }
  0x1d   : > { %p3717_p13 = pneg %p3716_p12 }
  0x8c   : > { %v227_v5 = vpop.permute.xlu0 %226 }
  0x8d   : > { %v230_v6 = vsel %vm229_vm0, %v3888_v4, %v227_v5 }
  0x8e   : > { %v232_v7 = vrot.slane %v230_v6, 7  ;;  %v238_v8 = vrot.slane %v230_v6, 4  ;;  %v234_v9 = vrot.slane %v230_v6, 6  ;;  %v236_v10 = vrot.slane %v230_v6, 5 }
  0x8f   : > { %v240_v11 = vrot.slane %v230_v6, 3  ;;  %v242_v13 = vrot.slane %v230_v6, 2 }
  0x90   : > { %v245_v12 = vsel %vm244_vm1, %v230_v6, %v232_v7  ;;  %v250_v14 = vsel %vm248_vm3, %v236_v10, %v238_v8  ;;  %v3119_v7 = vld [vmem:[%s4350_s4] ss:$0 sm:$0xff] }
  0x91   : > { %v247_v15 = vsel %vm246_vm2, %v245_v12, %v234_v9  ;;  %v252_v16 = vsel %vm251_vm4, %v250_v14, %v240_v11  ;;  %v3120_v14 = vld [vmem:[%s4347_s1 + $0x50] sm:$0xff] }
  0x92   : > { %v249_v17 = vsel %vm248_vm3, %v247_v15, %v236_v10  ;;  %v254_v18 = vsel %vm253_vm5, %v252_v16, %v242_v13  ;;  %v3121_v15 = vld [vmem:[%s4347_s1 + $0x60] sm:$0xff] }
  0x93   : > { %3324 = vmatprep.mubr.msk.f32.mxu1 %vm266_vm6, %v249_v17  ;;  %v349_v19 = vrot.slane %v249_v17, 1  ;;  %v350_v20 = vrot.slane %v254_v18, 1  ;;  %v434_v21 = vrot.slane %v249_v17, 2  ;;  %v435_v22 = vrot.slane %v254_v18, 2 }
  0x94   : > { %3325 = vmatmul.mubr.msk.f32.vlgmr.msra.gmra.mrb[0].mxu1 %vm266_vm6, %v254_v18  ;;  %v518_v26 = vrot.slane %v249_v17, 3  ;;  %v519_v27 = vrot.slane %v254_v18, 3  ;;  %v602_v30 = vrot.slane %v249_v17, 4  ;;  %v603_v31 = vrot.slane %v254_v18, 4 }
  0x95   : > { %v351_v23 = vsel %vm348_vm7, %v349_v19, %v350_v20  ;;  %v436_v25 = vsel %vm433_vm8, %v434_v21, %v435_v22  ;;  %3552 = vmatpush3.bf16.msra.mxu1 %v3551_v35  ;;  %3351 = vmatprep.mubr.msk.f32.mxu1 %vm3780_vm9, %v3781_v37 }
  0x96   : > { %3329 = vmatprep.mubr.msk.f32.mxu0 %vm266_vm6, %v351_v23  ;;  %v520_v29 = vsel %vm253_vm5, %v518_v26, %v519_v27  ;;  %v604_v32 = vsel %vm251_vm4, %v602_v30, %v603_v31  ;;  %3553 = vmatprep.subr.bf16.mxu1 %v3779_v36 }
  0x97   : > { %3330 = vmatmul.mubr.msk.f32.vlgmr.msra.gmra.mrb[0].mxu0 %vm266_vm6, %v350_v20 }
  0x98   : > { %3333 = vmatpush3.msra.mxu0 %v257_v2  ;;  %3334 = vmatprep.mubr.msk.f32.mxu0 %vm266_vm6, %v436_v25 }
  0x99   : > { %3337 = vmatprep.subr.mxu0 %v258_v24 }
  0x9f   : > { %3335 = vmatmul.mubr.msk.f32.vlgmr.msra.gmra.mrb[0].mxu0 %vm266_vm6, %v435_v22 }
  0xa0   : > { %3338 = vmatpush3.msra.mxu0 %v258_v24  ;;  %3339 = vmatprep.mubr.msk.f32.mxu0 %vm266_vm6, %v520_v29 }
  0xa1   : > { %3342 = vmatprep.subr.mxu0 %v259_v28 }
  0xa7   : > { %3340 = vmatmul.mubr.msk.f32.vlgmr.msra.gmra.mrb[0].mxu0 %vm266_vm6, %v519_v27 }
  0xa8   : > { %3343 = vmatpush3.msra.mxu0 %v259_v28  ;;  %3344 = vmatprep.mubr.msk.f32.mxu0 %vm266_vm6, %v604_v32 }
  0xa9   : > { %3559 = vmatprep.subr.bf16.mxu0 %v3779_v36 }
  0xaf   : > { %3345 = vmatmul.mubr.msk.f32.vlgmr.msra.gmra.mrb[0].mxu0 %vm266_vm6, %v603_v31 }
  0xb0   : > { %3397 = vmatprep.mubr.msk.f32.mxu0 %vm3780_vm9, %v3781_v37 }
 0x167   : > { %v3326_v38 = vpop.f32.mrb[0].mxu1 }
 0x168   : > { %v339_v39 = vpop.f32.mrb[1].mxu1 }
 0x182   : > { %v3346_v40 = vpop.f32.mrb[0].mxu0 }
 0x183   : > { %v3634_v42 = vadd.f32 %v3346_v40, %v3326_v38  ;;  %v675_v43 = vpop.f32.mrb[1].mxu0 }
 0x184   : > { %v3635_v44 = vadd.f32 %v675_v43, %v339_v39  ;;  %v3123_v39 = vld [vmem:[%s4347_s1 + $0x80] sm:$0xff]  ;;  %v3124_v43 = vld [vmem:[%s4347_s1 + $0x90] sm:$0xff] }
 0x185   : > { %v692_v45 = vadd.f32 %v3634_v42, %v3115_v41 }
 0x186   : > { %v691_v48 = vadd.f32 %v3635_v44, %v3115_v41 }
 0x187   : > { %vm694_vm10 = vcmp.gt.f32.partialorder %v692_v45, 0.0  ;;  %v696_v49 = vmul.f32 0.01, %v692_v45 }
 0x188   : > { %vm693_vm11 = vcmp.gt.f32.partialorder %v691_v48, 0.0  ;;  %v695_v50 = vmul.f32 0.01, %v691_v48 }
 0x189   : > { %v698_v52 = vsel %vm694_vm10, %v692_v45, %v696_v49  ;;  %v3126_v49 = vld [vmem:[%s4349_s3 + $0x68] sm:$0xff] }
 0x18a   : > { %v775_v55 = vrot.slane %v698_v52, 1  ;;  %v851_v56 = vrot.slane %v698_v52, 2  ;;  %v697_v57 = vsel %vm693_vm11, %v691_v48, %v695_v50  ;;  %v3125_v48 = vld [vmem:[%s4349_s3 + $0x60] sm:$0xff] }
 0x18b   : > { %3352 = vmatmul.mubr.msk.f32.vlgmr.msra.gmra.mrb[2].mxu1 %vm699_vm12, %v697_v57  ;;  %v774_v58 = vrot.slane %v697_v57, 1  ;;  %v850_v59 = vrot.slane %v697_v57, 2  ;;  %v3560_v50 = vpack.c.bf16 %v3126_v49, %v3125_v48  ;;  %v3154_v49 = vld [vmem:[%s4347_s1 + $0xe0] sm:$0xff] }
 0x18c   : > { %3555 = vmatpush3.bf16.msra.mxu1 %v3554_v51  ;;  %3358 = vmatprep.mubr.msk.f32.mxu1 %vm3780_vm9, %v3781_v37  ;;  %v3141_v51 = vld [vmem:[%s4348_s2 + $0x1] ss:$0 sm:$0xff] }
 0x18d   : > { %3556 = vmatprep.subr.bf16.mxu1 %v3779_v36  ;;  %v776_v61 = vsel %vm348_vm7, %v774_v58, %v775_v55  ;;  %v852_v62 = vsel %vm433_vm8, %v850_v59, %v851_v56  ;;  %3561 = vmatpush3.bf16.msra.mxu0 %v3560_v50  ;;  %v3127_v55 = vld [vmem:[%s4349_s3 + $0x80] sm:$0xff]  ;;  %v3128_v56 = vld [vmem:[%s4349_s3 + $0x88] sm:$0xff] }
 0x18e   : > { %3562 = vmatprep.subr.bf16.mxu0 %v3779_v36  ;;  %v3155_v50 = vld [vmem:[%s4347_s1 + $0xe8] sm:$0xff] }
 0x18f   : > { %3359 = vmatmul.mubr.msk.f32.vlgmr.msra.gmra.mrb[4].mxu1 %vm699_vm12, %v776_v61 }
 0x190   : > { %3558 = vmatpush3.bf16.msra.mxu1 %v3557_v60  ;;  %3365 = vmatprep.mubr.msk.f32.mxu1 %vm3780_vm9, %v3781_v37  ;;  %v3563_v60 = vpack.c.bf16 %v3128_v56, %v3127_v55  ;;  %v3581_v55 = vpack.c.bf16 %v3155_v50, %v3154_v49 }
 0x191   : > { %3368 = vmatprep.subr.mxu1 %v3120_v14 }
 0x193   : > { %3366 = vmatmul.mubr.msk.f32.vlgmr.msra.gmra.mrb[6].mxu1 %vm699_vm12, %v852_v62  ;;  %v3129_v62 = vld [vmem:[%s4349_s3 + $0xa0] sm:$0xff] }
 0x194   : > { %3369 = vmatpush3.msra.mxu1 %v3120_v14 }
 0x195   : > { %3373 = vmatprep.subr.mxu1 %v3121_v15 }
 0x25e   : > { %v769_v63 = vpop.f32.mrb[2].mxu1 }
 0x25f   : > { %v3353_v0 = vpop.f32.mrb[3].mxu1 }
 0x262   : > { %v845_v1 = vpop.f32.mrb[4].mxu1 }
 0x263   : > { %v849_v2 = vadd.f32 %v845_v1, %v769_v63  ;;  %v3360_v5 = vpop.f32.mrb[5].mxu1  ;;  %v3130_v63 = vld [vmem:[%s4349_s3 + $0xa8] sm:$0xff] }
 0x266   : > { %v921_v6 = vpop.f32.mrb[6].mxu1 }
 0x267   : > { %v925_v8 = vadd.f32 %v921_v6, %v849_v2  ;;  %v3367_v9 = vpop.f32.mrb[7].mxu1 }
 0x269   : > { %v931_v10 = vadd.f32 %v3119_v7, %v925_v8  ;;  %v3566_v7 = vpack.c.bf16 %v3130_v63, %v3129_v62  ;;  %v3156_v63 = vld [vmem:[%s4349_s3 + $0xc0] sm:$0xff] }
 0x26b   : > { %3702 = vtanh.f32 %v931_v10 }
 0x275   : > { %v3703_v11 = vpop.eup %3702 }
 0x276   : > { %v933_v12 = vmul.f32 1.442695, %v3703_v11 }
 0x278   : > { %3704 = vpow2.f32 %v933_v12 }
 0x282   : > { %v3705_v13 = vpop.eup %3704 }
 0x283   : > { %937 = vrot.lane.b32.xlu0 %v3705_v13, %s3782_s6  ;;  %v3972_v18 = vmul.f32 %v3705_v13, %v3884_v3 }
 0x2f5   : > { %v938_v16 = vpop.permute.xlu0 %937 }
 0x2f6   : > { %v3967_v17 = vmul.f32 %v938_v16, %v3888_v4  ;;  %v3145_v16 = vld [vmem:[%s4350_s4 + $0x1] ss:$0 sm:$0xff] }
 0x2f8   : > { %942 = vrot.lane.b32.xlu1 %v3967_v17, %s3778_s16 }
 0x36a   : > { %v943_v19 = vpop.permute.xlu1 %942 }
 0x36b   : > { %v945_v20 = vsel %vm229_vm0, %v3972_v18, %v943_v19 }
 0x36c   : > { %v947_v21 = vrot.slane %v945_v20, 7  ;;  %v953_v22 = vrot.slane %v945_v20, 4  ;;  %v949_v23 = vrot.slane %v945_v20, 6  ;;  %v951_v24 = vrot.slane %v945_v20, 5 }
 0x36d   : > { %v955_v25 = vrot.slane %v945_v20, 3  ;;  %v957_v27 = vrot.slane %v945_v20, 2 }
 0x36e   : > { %v959_v26 = vsel %vm244_vm1, %v945_v20, %v947_v21  ;;  %v962_v4 = vsel %vm248_vm3, %v951_v24, %v953_v22 }
 0x36f   : > { %v960_v28 = vsel %vm246_vm2, %v959_v26, %v949_v23  ;;  %v963_v29 = vsel %vm251_vm4, %v962_v4, %v955_v25  ;;  %v3146_v26 = vld [vmem:[%s4347_s1 + $0xa0] sm:$0xff]  ;;  %v3148_v4 = vld [vmem:[%s4347_s1 + $0xb0] sm:$0xff] }
 0x370   : > { %v961_v3 = vsel %vm248_vm3, %v960_v28, %v951_v24  ;;  %v964_v30 = vsel %vm253_vm5, %v963_v29, %v957_v27  ;;  %v3147_v27 = vld [vmem:[%s4347_s1 + $0xa8] sm:$0xff] }
 0x371   : > { %3370 = vmatprep.mubr.msk.f32.mxu1 %vm266_vm6, %v961_v3  ;;  %v1059_v31 = vrot.slane %v961_v3, 1  ;;  %v1060_v32 = vrot.slane %v964_v30, 1  ;;  %v1143_v35 = vrot.slane %v961_v3, 2  ;;  %v1144_v38 = vrot.slane %v964_v30, 2 }
 0x372   : > { %3371 = vmatmul.mubr.msk.f32.vlgmr.msra.gmra.mrb[8].mxu1 %vm266_vm6, %v964_v30  ;;  %v1227_v41 = vrot.slane %v961_v3, 3  ;;  %v1228_v42 = vrot.slane %v964_v30, 3  ;;  %v1311_v45 = vrot.slane %v961_v3, 4  ;;  %v1312_v46 = vrot.slane %v964_v30, 4 }
 0x373   : > { %3374 = vmatpush3.msra.mxu1 %v3121_v15  ;;  %v1061_v34 = vsel %vm348_vm7, %v1059_v31, %v1060_v32  ;;  %v1145_v40 = vsel %vm433_vm8, %v1143_v35, %v1144_v38  ;;  %v3150_v35 = vld [vmem:[%s4347_s1 + $0xc0] sm:$0xff] }
 0x374   : > { %3375 = vmatprep.mubr.msk.f32.mxu1 %vm266_vm6, %v1061_v34  ;;  %3378 = vmatprep.subr.mxu1 %v3122_v33  ;;  %v1229_v44 = vsel %vm253_vm5, %v1227_v41, %v1228_v42  ;;  %v1313_v47 = vsel %vm251_vm4, %v1311_v45, %v1312_v46 }
 0x37a   : > { %3376 = vmatmul.mubr.msk.f32.vlgmr.msra.gmra.mrb[8].mxu1 %vm266_vm6, %v1060_v32 }
 0x37b   : > { %3379 = vmatpush3.msra.mxu1 %v3122_v33  ;;  %3380 = vmatprep.mubr.msk.f32.mxu1 %vm266_vm6, %v1145_v40 }
 0x37c   : > { %3383 = vmatprep.subr.mxu1 %v3123_v39 }
 0x382   : > { %3381 = vmatmul.mubr.msk.f32.vlgmr.msra.gmra.mrb[8].mxu1 %vm266_vm6, %v1144_v38  ;;  %v3151_v38 = vld [vmem:[%s4347_s1 + $0xc8] sm:$0xff] }
 0x383   : > { %3384 = vmatpush3.msra.mxu1 %v3123_v39  ;;  %3385 = vmatprep.mubr.msk.f32.mxu1 %vm266_vm6, %v1229_v44  ;;  %v3153_v44 = vld [vmem:[%s4347_s1 + $0xd8] sm:$0xff] }
 0x384   : > { %3388 = vmatprep.subr.mxu1 %v3124_v43 }
 0x38a   : > { %3386 = vmatmul.mubr.msk.f32.vlgmr.msra.gmra.mrb[8].mxu1 %vm266_vm6, %v1228_v42 }
 0x38b   : > { %3389 = vmatpush3.msra.mxu1 %v3124_v43  ;;  %3390 = vmatprep.mubr.msk.f32.mxu1 %vm266_vm6, %v1313_v47  ;;  %v3152_v43 = vld [vmem:[%s4347_s1 + $0xd0] sm:$0xff]  ;;  %v3575_v47 = vpack.c.bf16 %v3151_v38, %v3150_v35 }
 0x38c   : > { %3571 = vmatprep.subr.bf16.mxu1 %v3779_v36 }
 0x392   : > { %3391 = vmatmul.mubr.msk.f32.vlgmr.msra.gmra.mrb[8].mxu1 %vm266_vm6, %v1312_v46 }
 0x393   : > { %3425 = vmatprep.mubr.msk.f32.mxu1 %vm3780_vm9, %v3781_v37 }
 0x465   : > { %v3392_v52 = vpop.f32.mrb[8].mxu1 }
 0x466   : > { %v1401_v53 = vadd.f32 %v3392_v52, %v3141_v51  ;;  %v1384_v54 = vpop.f32.mrb[9].mxu1  ;;  %v3578_v52 = vpack.c.bf16 %v3153_v44, %v3152_v43 }
 0x467   : > { %v1400_v57 = vadd.f32 %v3141_v51, %v1384_v54 }
 0x468   : > { %vm1403_vm13 = vcmp.gt.f32.partialorder %v1401_v53, 0.0  ;;  %v1405_v58 = vmul.f32 0.01, %v1401_v53 }
 0x469   : > { %vm1402_vm14 = vcmp.gt.f32.partialorder %v1400_v57, 0.0  ;;  %v1404_v59 = vmul.f32 0.01, %v1400_v57 }
 0x46a   : > { %v1407_v61 = vsel %vm1403_vm13, %v1401_v53, %v1405_v58 }
 0x46b   : > { %v1483_v0 = vrot.slane %v1407_v61, 1  ;;  %v1559_v1 = vrot.slane %v1407_v61, 2  ;;  %v1406_v2 = vsel %vm1402_vm14, %v1400_v57, %v1404_v59 }
 0x46c   : > { %v1482_v5 = vrot.slane %v1406_v2, 1  ;;  %v1558_v6 = vrot.slane %v1406_v2, 2  ;;  %3398 = vmatmul.mubr.msk.f32.vlgmr.msra.gmra.mrb[2].mxu0 %vm699_vm12, %v1406_v2  ;;  %v3160_v2 = vld [vmem:[%s4349_s3 + $0xe0] sm:$0xff] }
 0x46d   : > { %3564 = vmatpush3.bf16.msra.mxu0 %v3563_v60  ;;  %3404 = vmatprep.mubr.msk.f32.mxu0 %vm3780_vm9, %v3781_v37 }
 0x46e   : > { %3565 = vmatprep.subr.bf16.mxu0 %v3779_v36  ;;  %v1484_v8 = vsel %vm348_vm7, %v1482_v5, %v1483_v0  ;;  %v1560_v9 = vsel %vm433_vm8, %v1558_v6, %v1559_v1  ;;  %v3157_v0 = vld [vmem:[%s4349_s3 + $0xc8] sm:$0xff]  ;;  %vm2087_vm8 = vcmask 261120  }
 0x46f   : > { %v3584_v1 = vpack.c.bf16 %v3157_v0, %v3156_v63  ;;  %v3161_v5 = vld [vmem:[%s4349_s3 + $0xe8] sm:$0xff] }
 0x470   : > { %3405 = vmatmul.mubr.msk.f32.vlgmr.msra.gmra.mrb[4].mxu0 %vm699_vm12, %v1484_v8  ;;  %v3590_v6 = vpack.c.bf16 %v3161_v5, %v3160_v2  ;;  %v3159_v8 = vld [vmem:[%s4349_s3 + $0xd8] sm:$0xff]  ;;  %v3180_v5 = vld [vmem:[%s4347_s1 + $0x100] sm:$0xff] }
 0x471   : > { %3567 = vmatpush3.bf16.msra.mxu0 %v3566_v7  ;;  %3411 = vmatprep.mubr.msk.f32.mxu0 %vm3780_vm9, %v3781_v37  ;;  %v3158_v7 = vld [vmem:[%s4349_s3 + $0xd0] sm:$0xff] }
 0x472   : > { %3568 = vmatprep.subr.bf16.mxu0 %v3779_v36 }
 0x474   : > { %3412 = vmatmul.mubr.msk.f32.vlgmr.msra.gmra.mrb[6].mxu0 %vm699_vm12, %v1560_v9  ;;  %v3587_v9 = vpack.c.bf16 %v3159_v8, %v3158_v7 }
 0x475   : > { %3418 = vmatprep.mubr.msk.f32.mxu0 %vm3780_vm9, %v3781_v37 }
 0x53f   : > { %v1477_v10 = vpop.f32.mrb[2].mxu0 }
 0x540   : > { %v3399_v11 = vpop.f32.mrb[3].mxu0 }
 0x541   : > { %v3163_v11 = vld [vmem:[%s4349_s3 + $0xf8] sm:$0xff] }
 0x543   : > { %v1553_v12 = vpop.f32.mrb[4].mxu0 }
 0x544   : > { %v1557_v13 = vadd.f32 %v1553_v12, %v1477_v10  ;;  %v3406_v14 = vpop.f32.mrb[5].mxu0  ;;  %v3162_v10 = vld [vmem:[%s4349_s3 + $0xf0] sm:$0xff] }
 0x545   : > { %v3593_v12 = vpack.c.bf16 %v3163_v11, %v3162_v10  ;;  %v3187_v10 = vld [vmem:[%s4347_s1 + $0x138] sm:$0xff] }
 0x547   : > { %v1629_v15 = vpop.f32.mrb[6].mxu0 }
 0x548   : > { %v1633_v19 = vadd.f32 %v1629_v15, %v1557_v13  ;;  %v3413_v20 = vpop.f32.mrb[7].mxu0 }
 0x54a   : > { %v1639_v21 = vadd.f32 %v3145_v16, %v1633_v19 }
 0x54c   : > { %3706 = vtanh.f32 %v1639_v21 }
 0x556   : > { %v3707_v22 = vpop.eup %3706 }
 0x557   : > { %1643 = vrot.lane.b32.xlu1 %v3707_v22, %s3782_s6  ;;  %v1641_v23 = vadd.f32 %v3707_v22, %v3967_v17  ;;  %v3569_v17 = vpack.c.bf16 %v3147_v27, %v3146_v26  ;;  %v3173_v27 = vld [vmem:[%s4348_s2 + $0x2] ss:$0 sm:$0xff] }
 0x559   : > { %1647 = vst.msk [vmem:[#allocation2] sm:$0xff] %vm229_vm0, %v1641_v23  ;;  %3570 = vmatpush3.bf16.msra.mxu0 %v3569_v17 }
 0x55a   : > { %3574 = vmatprep.subr.bf16.mxu0 %v3779_v36 }
 0x5c9   : > { %v1644_v24 = vpop.permute.xlu1 %1643 }
 0x5ca   : > { %v1646_v25 = vsub.f32 %v3972_v18, %v1644_v24  ;;  %v3149_v18 = vld [vmem:[%s4347_s1 + $0xb8] sm:$0xff] }
 0x5cb   : > { %v3572_v28 = vpack.c.bf16 %v3149_v18, %v3148_v4  ;;  %v3164_v18 = vld [vmem:[%s4349_s3 + $0x100] sm:$0xff] }
 0x5cc   : > { %1649 = vrot.lane.b32.xlu0 %v1646_v25, %s3778_s16  ;;  %s3783_s16 = smov 8  }
 0x5cd   : > { %3573 = vmatpush3.bf16.msra.mxu1 %v3572_v28  ;;  %v3165_v28 = vld [vmem:[%s4349_s3 + $0x108] sm:$0xff] }
 0x5ce   : > { %3577 = vmatprep.subr.bf16.mxu1 %v3779_v36 }
 0x63e   : > { %v1650_v29 = vpop.permute.xlu0 %1649 }
 0x63f   : > { %1653 = vst.msk [vmem:[#allocation2] sm:$0xff] %vm1652_vm15, %v1650_v29 }
 0x646   : > { %v4065_v3 = vld [vmem:[#allocation2 + $0x1] ss:$2 sm:$0xf]  ;;  %v4069_v31 = vld [vmem:[#allocation2] ss:$2 sm:$0xf] }
 0x647   : > { %1658 = vrot.lane.b32.xlu1 %v4065_v3, %s3783_s16 }
 0x6b9   : > { %v1659_v30 = vpop.permute.xlu1 %1658 }
 0x6ba   : > { %v1661_v32 = vsel %vm266_vm6, %v4069_v31, %v1659_v30 }
 0x6bb   : > { %v1663_v33 = vrot.slane %v1661_v32, 7  ;;  %v1665_v34 = vrot.slane %v1661_v32, 6  ;;  %v1671_v39 = vrot.slane %v1661_v32, 3  ;;  %v1673_v40 = vrot.slane %v1661_v32, 2 }
 0x6bc   : > { %v1667_v41 = vrot.slane %v1661_v32, 5  ;;  %v1669_v45 = vrot.slane %v1661_v32, 4 }
 0x6bd   : > { %v1675_v42 = vsel %vm244_vm1, %v1661_v32, %v1663_v33  ;;  %v1679_v54 = vsel %vm244_vm1, %v1671_v39, %v1673_v40  ;;  %v3596_v32 = vpack.c.bf16 %v3165_v28, %v3164_v18  ;;  %v3166_v33 = vld [vmem:[%s4349_s3 + $0x110] sm:$0xff]  ;;  %v3188_v28 = vld [vmem:[%s4349_s3 + $0x120] sm:$0xff] }
 0x6be   : > { %v1676_v46 = vsel %vm246_vm2, %v1675_v42, %v1665_v34  ;;  %v1927_v58 = vrot.slane %v1679_v54, 3  ;;  %v2003_v61 = vrot.slane %v1679_v54, 4  ;;  %v3167_v34 = vld [vmem:[%s4349_s3 + $0x118] sm:$0xff]  ;;  %v3178_v54 = vld [vmem:[%s4347_s1 + $0xf0] sm:$0xff] }
 0x6bf   : > { %v1677_v48 = vsel %vm248_vm3, %v1676_v46, %v1667_v41  ;;  %v3599_v39 = vpack.c.bf16 %v3167_v34, %v3166_v33  ;;  %v3193_v33 = vld [vmem:[%s4349_s3 + $0x148] sm:$0xff] }
 0x6c0   : > { %v1678_v51 = vsel %vm348_vm7, %v1677_v48, %v1669_v45 }
 0x6c1   : > { %3419 = vmatmul.mubr.msk.f32.vlgmr.msra.gmra.mrb[8].mxu0 %vm699_vm12, %v1678_v51  ;;  %v1777_v53 = vrot.slane %v1678_v51, 1  ;;  %v1926_v56 = vrot.slane %v1678_v51, 3  ;;  %v1851_v57 = vrot.slane %v1678_v51, 2  ;;  %v2002_v59 = vrot.slane %v1678_v51, 4 }
 0x6c2   : > { %3576 = vmatpush3.bf16.msra.mxu0 %v3575_v47  ;;  %3432 = vmatprep.mubr.msk.f32.mxu0 %vm3780_vm9, %v3781_v37  ;;  %v3177_v47 = vld [vmem:[%s4350_s4 + $0x2] ss:$0 sm:$0xff] }
 0x6c3   : > { %3426 = vmatmul.mubr.msk.f32.vlgmr.msra.gmra.mrb[10].mxu1 %vm699_vm12, %v1777_v53  ;;  %3580 = vmatprep.subr.bf16.mxu0 %v3779_v36  ;;  %v1928_v60 = vsel %vm253_vm5, %v1926_v56, %v1927_v58  ;;  %v2004_v62 = vsel %vm251_vm4, %v2002_v59, %v2003_v61  ;;  %v3182_v56 = vld [vmem:[%s4347_s1 + $0x110] sm:$0xff]  ;;  %v3183_v58 = vld [vmem:[%s4347_s1 + $0x118] sm:$0xff] }
 0x6c4   : > { %3579 = vmatpush3.bf16.msra.mxu1 %v3578_v52  ;;  %3439 = vmatprep.mubr.msk.f32.mxu1 %vm3780_vm9, %v3781_v37  ;;  %v3608_v59 = vpack.c.bf16 %v3183_v58, %v3182_v56  ;;  %v3205_v56 = vld [vmem:[%s4348_s2 + $0x3] ss:$0 sm:$0xff] }
 0x6c5   : > { %3433 = vmatmul.mubr.msk.f32.vlgmr.msra.gmra.mrb[10].mxu0 %vm699_vm12, %v1851_v57  ;;  %3583 = vmatprep.subr.bf16.mxu1 %v3779_v36  ;;  %v3196_v58 = vld [vmem:[%s4349_s3 + $0x160] sm:$0xff] }
 0x6c6   : > { %3582 = vmatpush3.bf16.msra.mxu0 %v3581_v55  ;;  %3446 = vmatprep.mubr.msk.f32.mxu0 %vm3780_vm9, %v3781_v37  ;;  %v3179_v55 = vld [vmem:[%s4347_s1 + $0xf8] sm:$0xff] }
 0x6c7   : > { %3440 = vmatmul.mubr.msk.f32.vlgmr.msra.gmra.mrb[12].mxu1 %vm699_vm12, %v1928_v60  ;;  %3589 = vmatprep.subr.bf16.mxu0 %v3779_v36  ;;  %v3602_v57 = vpack.c.bf16 %v3179_v55, %v3178_v54 }
 0x6c8   : > { %3457 = vmatprep.mubr.msk.f32.mxu1 %vm3780_vm9, %v3781_v37  ;;  %3585 = vmatpush3.bf16.msra.mxu1 %v3584_v1 }
 0x6c9   : > { %3447 = vmatmul.mubr.msk.f32.vlgmr.msra.gmra.mrb[12].mxu0 %vm699_vm12, %v2004_v62  ;;  %3586 = vmatprep.subr.bf16.mxu1 %v3779_v36 }
 0x6ca   : > { %3468 = vmatprep.mubr.msk.f32.mxu0 %vm3780_vm9, %v3781_v37  ;;  %3591 = vmatpush3.bf16.msra.mxu0 %v3590_v6 }
 0x6cb   : > { %3592 = vmatprep.subr.bf16.mxu0 %v3779_v36 }
 0x6cc   : > { %3588 = vmatpush3.bf16.msra.mxu1 %v3587_v9  ;;  %v3186_v9 = vld [vmem:[%s4347_s1 + $0x130] sm:$0xff] }
 0x6cd   : > { %3595 = vmatprep.subr.bf16.mxu1 %v3779_v36 }
 0x6ce   : > { %3594 = vmatpush3.bf16.msra.mxu0 %v3593_v12 }
 0x6cf   : > { %3601 = vmatprep.subr.bf16.mxu0 %v3779_v36 }
 0x794   : > { %v1773_v13 = vpop.f32.mrb[8].mxu0 }
 0x795   : > { %v3420_v14 = vpop.f32.mrb[9].mxu0 }
 0x796   : > { %v1846_v15 = vpop.f32.mrb[10].mxu1 }
 0x797   : > { %v1850_v16 = vadd.f32 %v1846_v15, %v1773_v13  ;;  %v3427_v19 = vpop.f32.mrb[11].mxu1  ;;  %v3184_v15 = vld [vmem:[%s4347_s1 + $0x120] sm:$0xff] }
 0x798   : > { %v1920_v20 = vpop.f32.mrb[10].mxu0 }
 0x799   : > { %v1924_v21 = vadd.f32 %v1920_v20, %v1850_v16  ;;  %v3434_v22 = vpop.f32.mrb[11].mxu0  ;;  %v3185_v16 = vld [vmem:[%s4347_s1 + $0x128] sm:$0xff]  ;;  %v3614_v20 = vpack.c.bf16 %v3187_v10, %v3186_v9 }
 0x79a   : > { %v1997_v23 = vpop.f32.mrb[12].mxu1 }
 0x79b   : > { %v2001_v24 = vadd.f32 %v1997_v23, %v1924_v21  ;;  %v3441_v25 = vpop.f32.mrb[13].mxu1  ;;  %v3611_v23 = vpack.c.bf16 %v3185_v16, %v3184_v15 }
 0x79c   : > { %v2073_v26 = vpop.f32.mrb[12].mxu0 }
 0x79d   : > { %v2077_v4 = vadd.f32 %v2073_v26, %v2001_v24  ;;  %v3448_v17 = vpop.f32.mrb[13].mxu0 }
 0x79f   : > { %v2083_v29 = vadd.f32 %v3173_v27, %v2077_v4 }
 0x7a1   : > { %vm2084_vm0 = vcmp.gt.f32.partialorder %v2083_v29, 0.0  ;;  %v2085_v30 = vmul.f32 0.01, %v2083_v29 }
 0x7a3   : > { %v2086_v35 = vsel %vm2084_vm0, %v2083_v29, %v2085_v30  ;;  %v3189_v29 = vld [vmem:[%s4349_s3 + $0x128] sm:$0xff] }
 0x7a4   : > { %3458 = vmatmul.mubr.msk.f32.vlgmr.msra.gmra.mrb[14].mxu1 %vm2087_vm8, %v2086_v35  ;;  %v2161_v38 = vrot.slane %v2086_v35, 1  ;;  %v2235_v40 = vrot.slane %v2086_v35, 2  ;;  %v3617_v30 = vpack.c.bf16 %v3189_v29, %v3188_v28  ;;  %v3190_v35 = vld [vmem:[%s4349_s3 + $0x130] sm:$0xff] }
 0x7a5   : > { %3597 = vmatpush3.bf16.msra.mxu1 %v3596_v32  ;;  %3479 = vmatprep.mubr.msk.f32.mxu1 %vm3780_vm9, %v3781_v37  ;;  %v3192_v32 = vld [vmem:[%s4349_s3 + $0x140] sm:$0xff] }
 0x7a6   : > { %3469 = vmatmul.mubr.msk.f32.vlgmr.msra.gmra.mrb[14].mxu0 %vm2087_vm8, %v2161_v38  ;;  %3598 = vmatprep.subr.bf16.mxu1 %v3779_v36  ;;  %v3623_v34 = vpack.c.bf16 %v3193_v33, %v3192_v32  ;;  %v3191_v38 = vld [vmem:[%s4349_s3 + $0x138] sm:$0xff] }
 0x7a7   : > { %3486 = vmatprep.mubr.msk.f32.mxu0 %vm3780_vm9, %v3781_v37  ;;  %3603 = vmatpush3.bf16.msra.mxu0 %v3602_v57 }
 0x7a8   : > { %3604 = vmatprep.subr.bf16.mxu0 %v3779_v36 }
 0x7a9   : > { %3600 = vmatpush3.bf16.msra.mxu1 %v3599_v39  ;;  %v3620_v39 = vpack.c.bf16 %v3191_v38, %v3190_v35 }
 0x7aa   : > { %3607 = vmatprep.subr.bf16.mxu1 %v3779_v36 }
 0x7ac   : > { %3480 = vmatmul.mubr.msk.f32.vlgmr.msra.gmra.mrb[16].mxu1 %vm2087_vm8, %v2235_v40  ;;  %v3194_v40 = vld [vmem:[%s4349_s3 + $0x150] sm:$0xff] }
 0x7ad   : > { %3500 = vmatprep.mubr.msk.f32.mxu1 %vm3780_vm9, %v3781_v37  ;;  %3609 = vmatpush3.bf16.msra.mxu1 %v3608_v59  ;;  %v3197_v59 = vld [vmem:[%s4349_s3 + $0x168] sm:$0xff] }
 0x7ae   : > { %3613 = vmatprep.subr.bf16.mxu1 %v3779_v36 }
 0x877   : > { %v2157_v41 = vpop.f32.mrb[14].mxu1 }
 0x878   : > { %v3459_v42 = vpop.f32.mrb[15].mxu1 }
 0x879   : > { %v2230_v43 = vpop.f32.mrb[14].mxu0 }
 0x87a   : > { %v2234_v44 = vadd.f32 %v2230_v43, %v2157_v41  ;;  %v3470_v45 = vpop.f32.mrb[15].mxu0  ;;  %v3195_v41 = vld [vmem:[%s4349_s3 + $0x158] sm:$0xff] }
 0x87b   : > { %v3626_v42 = vpack.c.bf16 %v3195_v41, %v3194_v40 }
 0x87f   : > { %v2304_v46 = vpop.f32.mrb[16].mxu1 }
 0x880   : > { %v2308_v48 = vadd.f32 %v2304_v46, %v2234_v44  ;;  %v3481_v49 = vpop.f32.mrb[17].mxu1 }
 0x882   : > { %v2314_v50 = vadd.f32 %v3177_v47, %v2308_v48 }
 0x884   : > { %3708 = vtanh.f32 %v2314_v50 }
 0x88e   : > { %v3709_v51 = vpop.eup %3708 }
 0x88f   : > { %v2316_v52 = vmul.f32 1.442695, %v3709_v51 }
 0x891   : > { %3710 = vpow2.f32 %v2316_v52 }
 0x89b   : > { %v3711_v53 = vpop.eup %3710 }
 0x89c   : > { %2320 = vrot.lane.b32.xlu0 %v3711_v53, %s3784_s8  ;;  %v4194_v62 = vmul.f32 %v3711_v53, %v4065_v3 }
 0x90e   : > { %v2321_v60 = vpop.permute.xlu0 %2320 }
 0x90f   : > { %v4189_v61 = vmul.f32 %v2321_v60, %v4069_v31  ;;  %v3181_v31 = vld [vmem:[%s4347_s1 + $0x108] sm:$0xff] }
 0x910   : > { %v3605_v13 = vpack.c.bf16 %v3181_v31, %v3180_v5 }
 0x911   : > { %2325 = vrot.lane.b32.xlu1 %v4189_v61, %s3783_s16 }
 0x983   : > { %v2326_v63 = vpop.permute.xlu1 %2325 }
 0x984   : > { %v2328_v0 = vsel %vm266_vm6, %v4194_v62, %v2326_v63 }
 0x985   : > { %v2330_v1 = vrot.slane %v2328_v0, 7  ;;  %v2332_v2 = vrot.slane %v2328_v0, 6  ;;  %v2338_v6 = vrot.slane %v2328_v0, 3  ;;  %v2340_v7 = vrot.slane %v2328_v0, 2 }
 0x986   : > { %v2334_v8 = vrot.slane %v2328_v0, 5  ;;  %v2336_v11 = vrot.slane %v2328_v0, 4 }
 0x987   : > { %v2342_v3 = vsel %vm244_vm1, %v2328_v0, %v2330_v1  ;;  %v2346_v22 = vsel %vm244_vm1, %v2338_v6, %v2340_v7  ;;  %v3629_v0 = vpack.c.bf16 %v3197_v59, %v3196_v58  ;;  %v3198_v1 = vld [vmem:[%s4349_s3 + $0x170] sm:$0xff] }
 0x988   : > { %v2343_v12 = vsel %vm246_vm2, %v2342_v3, %v2332_v2  ;;  %v2670_v26 = vrot.slane %v2346_v22, 4  ;;  %v2594_v17 = vrot.slane %v2346_v22, 3  ;;  %v3199_v2 = vld [vmem:[%s4349_s3 + $0x178] sm:$0xff]  ;;  %vm3019_vm2 = vcmask 195584  }
 0x989   : > { %v2344_v14 = vsel %vm248_vm3, %v2343_v12, %v2334_v8  ;;  %v3632_v6 = vpack.c.bf16 %v3199_v2, %v3198_v1  ;;  %vm3022_vm3 = vcmask 326656  }
 0x98a   : > { %v2345_v19 = vsel %vm348_vm7, %v2344_v14, %v2336_v11 }
 0x98b   : > { %3487 = vmatmul.mubr.msk.f32.vlgmr.msra.gmra.mrb[16].mxu0 %vm699_vm12, %v2345_v19  ;;  %v2518_v21 = vrot.slane %v2345_v19, 2  ;;  %v2669_v24 = vrot.slane %v2345_v19, 4  ;;  %v2444_v25 = vrot.slane %v2345_v19, 1  ;;  %v2593_v27 = vrot.slane %v2345_v19, 3 }
 0x98c   : > { %3606 = vmatpush3.bf16.msra.mxu0 %v3605_v13  ;;  %3493 = vmatprep.mubr.msk.f32.mxu0 %vm3780_vm9, %v3781_v37  ;;  %v3209_v13 = vld [vmem:[%s4350_s4 + $0x3] ss:$0 sm:$0xff] }
 0x98d   : > { %3501 = vmatmul.mubr.msk.f32.vlgmr.msra.gmra.mrb[18].mxu1 %vm699_vm12, %v2518_v21  ;;  %3610 = vmatprep.subr.bf16.mxu0 %v3779_v36  ;;  %v2671_v4 = vsel %vm251_vm4, %v2669_v24, %v2670_v26  ;;  %v2595_v18 = vsel %vm253_vm5, %v2593_v27, %v2594_v17  ;;  %vm3024_vm4 = vcmask 392192   ;;  %vm3026_vm5 = vcmask 457728  }
 0x98e   : > { %3615 = vmatpush3.bf16.msra.mxu1 %v3614_v20  ;;  %3514 = vmatprep.mubr.msk.f32.mxu1 %vm3780_vm9, %v3781_v37 }
 0x98f   : > { %3494 = vmatmul.mubr.msk.f32.vlgmr.msra.gmra.mrb[18].mxu0 %vm699_vm12, %v2444_v25  ;;  %3622 = vmatprep.subr.bf16.mxu1 %v3779_v36 }
 0x990   : > { %3612 = vmatpush3.bf16.msra.mxu0 %v3611_v23  ;;  %3507 = vmatprep.mubr.msk.f32.mxu0 %vm3780_vm9, %v3781_v37 }
 0x991   : > { %3515 = vmatmul.mubr.msk.f32.vlgmr.msra.gmra.mrb[20].mxu1 %vm699_vm12, %v2671_v4  ;;  %3616 = vmatprep.subr.bf16.mxu0 %v3779_v36 }
 0x992   : > { %3536 = vmatprep.mubr.msk.f32.mxu1 %vm3780_vm9, %v3781_v37  ;;  %3624 = vmatpush3.bf16.msra.mxu1 %v3623_v34 }
 0x993   : > { %3508 = vmatmul.mubr.msk.f32.vlgmr.msra.gmra.mrb[20].mxu0 %vm699_vm12, %v2595_v18  ;;  %3625 = vmatprep.subr.bf16.mxu1 %v3779_v36 }
 0x994   : > { %3525 = vmatprep.mubr.msk.f32.mxu0 %vm3780_vm9, %v3781_v37  ;;  %3618 = vmatpush3.bf16.msra.mxu0 %v3617_v30 }
 0x995   : > { %3619 = vmatprep.subr.bf16.mxu0 %v3779_v36 }
 0x996   : > { %3627 = vmatpush3.bf16.msra.mxu1 %v3626_v42 }
 0x998   : > { %3621 = vmatpush3.bf16.msra.mxu0 %v3620_v39 }
 0x999   : > { %3628 = vmatprep.subr.bf16.mxu0 %v3779_v36 }
 0xa5e   : > { %v2440_v43 = vpop.f32.mrb[16].mxu0 }
 0xa5f   : > { %v3488_v44 = vpop.f32.mrb[17].mxu0 }
 0xa60   : > { %v2587_v45 = vpop.f32.mrb[18].mxu1 }
 0xa61   : > { %v3502_v46 = vpop.f32.mrb[19].mxu1 }
 0xa62   : > { %v2513_v47 = vpop.f32.mrb[18].mxu0 }
 0xa63   : > { %v2517_v48 = vadd.f32 %v2513_v47, %v2440_v43  ;;  %v3495_v49 = vpop.f32.mrb[19].mxu0 }
 0xa64   : > { %v2740_v50 = vpop.f32.mrb[20].mxu1 }
 0xa65   : > { %v3516_v51 = vpop.f32.mrb[21].mxu1  ;;  %v2591_v52 = vadd.f32 %v2587_v45, %v2517_v48 }
 0xa66   : > { %v2664_v53 = vpop.f32.mrb[20].mxu0 }
 0xa67   : > { %v2668_v54 = vadd.f32 %v2664_v53, %v2591_v52  ;;  %v3509_v55 = vpop.f32.mrb[21].mxu0 }
 0xa69   : > { %v2744_v57 = vadd.f32 %v2740_v50, %v2668_v54 }
 0xa6b   : > { %v2750_v60 = vadd.f32 %v3205_v56, %v2744_v57 }
 0xa6d   : > { %v2752_v63 = vmul.f32 0.01, %v2750_v60  ;;  %vm2751_vm1 = vcmp.gt.f32.partialorder %v2750_v60, 0.0 }
 0xa6f   : > { %v2753_v5 = vsel %vm2751_vm1, %v2750_v60, %v2752_v63 }
 0xa70   : > { %3526 = vmatmul.mubr.msk.f32.vlgmr.msra.gmra.mrb[22].mxu0 %vm2087_vm8, %v2753_v5  ;;  %v2827_v31 = vrot.slane %v2753_v5, 1  ;;  %v2901_v7 = vrot.slane %v2753_v5, 2 }
 0xa71   : > { %3630 = vmatpush3.bf16.msra.mxu0 %v3629_v0  ;;  %3547 = vmatprep.mubr.msk.f32.mxu0 %vm3780_vm9, %v3781_v37 }
 0xa72   : > { %3537 = vmatmul.mubr.msk.f32.vlgmr.msra.gmra.mrb[22].mxu1 %vm2087_vm8, %v2827_v31  ;;  %3631 = vmatprep.subr.bf16.mxu0 %v3779_v36 }
 0xa75   : > { %3633 = vmatpush3.bf16.msra.mxu0 %v3632_v6 }
 0xa78   : > { %3548 = vmatmul.mubr.msk.f32.vlgmr.msra.gmra.mrb[24].mxu0 %vm2087_vm8, %v2901_v7 }
 0xb43   : > { %v2823_v8 = vpop.f32.mrb[22].mxu0 }
 0xb44   : > { %v3527_v3 = vpop.f32.mrb[23].mxu0 }
 0xb45   : > { %v2896_v9 = vpop.f32.mrb[22].mxu1 }
 0xb46   : > { %v2900_v10 = vadd.f32 %v2896_v9, %v2823_v8  ;;  %v3538_v11 = vpop.f32.mrb[23].mxu1 }
 0xb4b   : > { %v2970_v12 = vpop.f32.mrb[24].mxu0 }
 0xb4c   : > { %v2974_v14 = vadd.f32 %v2970_v12, %v2900_v10  ;;  %v3549_v37 = vpop.f32.mrb[25].mxu0 }
 0xb4e   : > { %v2980_v15 = vadd.f32 %v3209_v13, %v2974_v14 }
 0xb50   : > { %3712 = vtanh.f32 %v2980_v15 }
 0xb5a   : > { %v3713_v16 = vpop.eup %3712 }
 0xb5b   : > { %2984 = vrot.lane.b32.xlu0 %v3713_v16, %s3784_s8  ;;  %v2982_v36 = vadd.f32 %v3713_v16, %v4189_v61  ;;  %s3789_s8 = smov 40  }
 0xb5d   : > { %v2993_v19 = vrot.slane %v2982_v36, 1  ;;  %v3001_v20 = vrot.slane %v2982_v36, 2  ;;  %v3009_v21 = vrot.slane %v2982_v36, 3 }
 0xb5f   : > { %2994 = vrot.lane.b32.xlu0 %v2993_v19, %s3785_s14  ;;  %s3720_s14 = scalar_lea.vmem %s3719_s13, 32 }
 0xb60   : > { %p3722_p1 = scmp.lt.s32.totalorder %s3720_s14, %s3714_s11 }
 0xb62   : > { %p3723_p2 = por %p3722_p1, %p3721_p0 }
 0xb63   : > { %3002 = vrot.lane.b32.xlu0 %v3001_v20, %s3786_s15 }
 0xb64   : > { %p3724_p3 = pnand %p3723_p2, %p3717_p13 }
 0xb67   : > { %3010 = vrot.lane.b32.xlu0 %v3009_v21, %s3787_s17 }
 0xbcd   : > { %v2985_v22 = vpop.permute.xlu0 %2984 }
 0xbce   : > { %v2987_v23 = vsub.f32 %v4194_v62, %v2985_v22 }
 0xbd0   : > { %2989 = vrot.lane.b32.xlu1 %v2987_v23, %s3783_s16  ;;  %v2997_v24 = vrot.slane %v2987_v23, 1  ;;  %v3005_v25 = vrot.slane %v2987_v23, 2  ;;  %v3013_v61 = vrot.slane %v2987_v23, 3  ;;  %s3210_s16 = sshll.u32 %s3843_s22, 4  ;;  %s3031_s22 = scalar_lea.sflag [#allocation4], %s215_s26 }
 0xbd1   : > { %v2995_v26 = vpop.permute.xlu0 %2994  ;;  %s4304_s6 = scalar_lea.hbm %s4351_s5, %s3210_s16 }
 0xbd4   : > { %2998 = vrot.lane.b32.xlu1 %v2997_v24, %s3788_s23 }
 0xbd5   : > { %v3003_v18 = vpop.permute.xlu0 %3002 }
 0xbd8   : > { %3006 = vrot.lane.b32.xlu1 %v3005_v25, %s3789_s8 }
 0xbd9   : > { %v3011_v33 = vpop.permute.xlu0 %3010 }
 0xbdc   : > { %3014 = vrot.lane.b32.xlu1 %v3013_v61, %s3790_s25 }
 0xc42   : > { %v2990_v27 = vpop.permute.xlu1 %2989 }
 0xc43   : > { %v3017_v4 = vsel %vm266_vm6, %v2982_v36, %v2990_v27  ;;  %vm3028_vm6 = vcmask 516096  }
 0xc44   : > { %v3018_v62 = vsel %vm699_vm12, %v3017_v4, %v2995_v26 }
 0xc46   : > { %v2999_v17 = vpop.permute.xlu1 %2998 }
 0xc47   : > { %v3020_v28 = vsel %vm3019_vm2, %v3018_v62, %v2999_v17 }
 0xc48   : > { %v3021_v30 = vsel %vm2087_vm8, %v3020_v28, %v3003_v18 }
 0xc4a   : > { %v3007_v29 = vpop.permute.xlu1 %3006 }
 0xc4b   : > { %v3023_v32 = vsel %vm3022_vm3, %v3021_v30, %v3007_v29 }
 0xc4c   : > { %v3025_v35 = vsel %vm3024_vm4, %v3023_v32, %v3011_v33 }
 0xc4e   : > { %v3015_v34 = vpop.permute.xlu1 %3014 }
 0xc4f   : > { %v3027_v38 = vsel %vm3026_vm5, %v3025_v35, %v3015_v34 }
 0xc50   : > { %3029 = vst.msk [vmem:[%s216_s30] sm:$0x1] %vm3028_vm6, %v3027_v38 }
 0xc51   : > { %3727 = shalt.err (!%p3724_p3)
}
 0xc52   : > { %s3728_s15 = scalar_lea.hbm %s4304_s6, 16  ;;  %s3732_s8 = scalar_lea.hbm %s4351_s5, 32 }
 0xc53   : > { %p3729_p4 = scmp.ne.s32.totalorder %s4304_s6, %s3728_s15  ;;  %p3733_p9 = scmp.lt.u32.totalorder %s4304_s6, %s4351_s5 }
 0xc54   : > { %p3734_p10 = scmp.lt.u32.totalorder %s3732_s8, %s3728_s15  ;;  %p3736_p12 = scmp.lt.u32.totalorder %s3728_s15, %s4304_s6 }
 0xc55   : > { %p3730_p7 = pnand %p3729_p4, %p3860_p5 }
 0xc56   : > { %p3735_p11 = por %p3734_p10, %p3733_p9 }
 0xc57   : > { %p3731_p8 = pneg %p3730_p7 }
 0xc58   : > { %p3737_p13 = por %p3736_p12, %p3735_p11 }
 0xc5a   : > { %p3738_p0 = pnand %p3737_p13, %p3731_p8 }
 0xc5c   : > { %3741 = shalt.err (!%p3738_p0)
}
 0xc5d   : > { %3650 = dma.vmem_to_hbm [thread:$0]  (%p3860_p5), %s4306_s7, 16, %s4304_s6, %s3031_s22  }
 0xc5e PF: > { %p3656_p1 = scmp.ge.s32.totalorder %s3776_s21, 2  ;;  %s3055_s16 = sand.u32 1, %s3764_s18  }
 0xc5f   : > { %s3056_s30 = scalar_lea.sflag [#allocation4], %s3055_s16 }
 0xc60   : > { %p3653_p2 = pnand %p3656_p1, %p3864_p6 }
 0xc62   : > { %3759 = dma.done.wait (!%p3653_p2), %s3056_s30, 16  }
 0xc63   : > { %3761 = vsyncadd (!%p3653_p2), %s3056_s30, 4294967280  ;;  %p15_p3 = scmp.ge.s32.totalorder %s3847_s24, 4   ;;  %s4354_s18 = smov %s3768_s19 }
 0xc64   : > { %s4355_s19 = smov %s3772_s20  ;;  %s4356_s20 = smov %s3858_s27 }
 0xc65   : > { %s4357_s21 = smov %s3847_s24  ;;  %17 = sbr.rel (!%p15_p3) target bundleno = 3 (0x3), region = 83 }
 0xc6c   :  { %3060 = vsyncpa [#allocation4], 1 }
 0xc6d   :  { %3062 = vsyncpa [#allocation4 + $0x1], 1 }

// kernel: tpu_custom_call.1
= control target key start
LH: loop header
LB: loop body
LE: loop exit
PB: predicated region body
PF: predicated region fallthrough
CT: control target
= control target key end

     0   :  { %10 = vsyncpa [#allocation4], 0  ;;  %s4346_s0 = inlined_call_operand.vmem [shape: f32[2,16,4], index: 0, kind: input, shape index: {}]   ;;  %s4347_s1 = inlined_call_operand.vmem [shape: f32[4,5,16,32], index: 1, kind: input, shape index: {}]   ;;  %s4348_s2 = inlined_call_operand.vmem [shape: f32[4,32], index: 2, kind: input, shape index: {}]   ;;  %s4349_s3 = inlined_call_operand.vmem [shape: f32[4,3,32,16], index: 3, kind: input, shape index: {}]   ;;  %s4350_s4 = inlined_call_operand.vmem [shape: f32[4,16], index: 4, kind: input, shape index: {}]   ;;  %s4351_s5 = inlined_call_operand.hbm [shape: f32[2,1,64], index: 5, kind: output, shape index: {}]  }
   0x1   :  { %12 = vsyncpa [#allocation4 + $0x1], 0  ;;  %s3822_s18 = smov 0   ;;  %s3824_s19 = smov 0  }
   0x2   :  { %s3826_s20 = smov 0   ;;  %s3828_s21 = smov 0  }
   0x3 LB: > { %s3843_s22 = sadd.s32 4294967295, %s3776_s21   ;;  %s3098_s23 = sadd.s32 4294967294, %s3776_s21   ;;  %s3776_s21 = sphi %s3828_s21, %s4357_s21   ;;  %s3772_s20 = sphi %s3826_s20, %s4356_s20   ;;  %s3768_s19 = sphi %s3824_s19, %s4355_s19   ;;  %s3764_s18 = sphi %s3822_s18, %s4354_s18  }
   0x4   : > { %s3847_s24 = sadd.s32 1, %s3776_s21   ;;  %s135_s25 = sadd.s32 1, %s3772_s20 }
   0x5   : > { %s132_s26 = ssub.s32 %s3776_s21, %s3847_s24  ;;  %p145_p0 = scmp.ne.s32.totalorder %s3772_s20, %s3768_s19 }
   0x6   : > { %p133_p1 = scmp.eq.s32.totalorder %s132_s26, 0  ;;  %p146_p2 = scmp.eq.s32.totalorder %s3843_s22, 1 }
   0x7   : > { %p151_p3 = scmp.ne.s32.totalorder %s3768_s19, %s3764_s18  ;;  %p152_p4 = scmp.eq.s32.totalorder %s3098_s23, 1 }
   0x8   : > { %s3858_s27 = scalar_select %p133_p1, %s3772_s20, %s135_s25  }
   0x9   : > { %p3860_p5 = por %p146_p2, %p145_p0  ;;  %p3864_p6 = por %p152_p4, %p151_p3 }
   0xa   : > { %p3101_p7 = scmp.ge.s32.totalorder %s3776_s21, 1  ;;  %p190_p8 = scmp.lt.s32.totalorder %s3776_s21, 3 }
   0xc   : > { %p191_p9 = pnand %p3101_p7, %p190_p8 }
   0xd   : > { %p217_p10 = scmp.lt.s32.totalorder (!%p191_p9), %s3843_s22, 1  ;;  %v255_v0 = vld [vmem:[%s4347_s1] sm:$0xff] (!%p191_p9)  ;;  %v256_v1 = vld [vmem:[%s4347_s1 + $0x10] sm:$0xff] (!%p191_p9)  ;;  %s3778_s16 = smov (!%p191_p9), 4   ;;  %vm229_vm0 = vcmask (!%p191_p9), 31744   ;;  %vm244_vm1 = vcmask (!%p191_p9), 1040384  }
   0xe   : > { %194 = sbr.rel (%p191_p9) target bundleno = 3166 (0xc5e), region = 40  ;;  %3322 = vmatprep.subr.mxu1 (!%p191_p9), %v255_v0  ;;  %3327 = vmatprep.subr.mxu0 (!%p191_p9), %v256_v1  ;;  %v257_v2 = vld [vmem:[%s4347_s1 + $0x20] sm:$0xff] (!%p191_p9)  ;;  %vm246_vm2 = vcmask (!%p191_p9), 1041408   ;;  %vm248_vm3 = vcmask (!%p191_p9), 1042432   ;;  %vm251_vm4 = vcmask (!%p191_p9), 1043456   ;;  %vm253_vm5 = vcmask (!%p191_p9), 1044480  }
   0xf   : > { %3323 = vmatpush3.msra.mxu1 (!%p191_p9), %v255_v0  ;;  %3328 = vmatpush3.msra.mxu0 (!%p191_p9), %v256_v1  ;;  %vm266_vm6 = vcmask (!%p191_p9), 64512   ;;  %vm348_vm7 = vcmask (!%p191_p9), 1046528   ;;  %vm433_vm8 = vcmask (!%p191_p9), 1045504   ;;  %v258_v24 = vld [vmem:[%s4347_s1 + $0x30] sm:$0xff] (!%p191_p9)  ;;  %v259_v28 = vld [vmem:[%s4347_s1 + $0x40] sm:$0xff] (!%p191_p9)  ;;  %v261_v34 = vld [vmem:[%s4349_s3 + $0x8] sm:$0xff] (!%p191_p9) }
  0x10   : > { %3332 = vmatprep.subr.mxu0 (!%p191_p9), %v257_v2  ;;  %v260_v33 = vld [vmem:[%s4349_s3] sm:$0xff] (!%p191_p9)  ;;  %v3779_v36 = vmov (!%p191_p9), 0.0|0.0   ;;  %vm3780_vm9 = vmmov (!%p191_p9), 0   ;;  %v3781_v37 = vmov (!%p191_p9), 0.0   ;;  %v263_v47 = vld [vmem:[%s4349_s3 + $0x28] sm:$0xff] (!%p191_p9)  ;;  %vm699_vm12 = vcmask (!%p191_p9), 130048  }
  0x11   : > { %v3551_v35 = vpack.c.bf16 (!%p191_p9), %v261_v34, %v260_v33  ;;  %3550 = vmatprep.subr.bf16.mxu1 (!%p191_p9), %v3779_v36  ;;  %v3115_v41 = vld [vmem:[%s4348_s2] ss:$0 sm:$0xff] (!%p191_p9)  ;;  %v265_v54 = vld [vmem:[%s4349_s3 + $0x48] sm:$0xff] (!%p191_p9)  ;;  %s3782_s6 = smov (!%p191_p9), 124   ;;  %v3122_v33 = vld [vmem:[%s4347_s1 + $0x70] sm:$0xff] (!%p191_p9)  ;;  %vm1652_vm15 = vcmask (!%p191_p9), 64544  }
  0x12   : > { %v262_v46 = vld [vmem:[%s4349_s3 + $0x20] sm:$0xff] (!%p191_p9)  ;;  %s3784_s8 = smov (!%p191_p9), 120   ;;  %s3785_s14 = smov (!%p191_p9), 16  }
  0x13   : > { %v3554_v51 = vpack.c.bf16 (!%p191_p9), %v263_v47, %v262_v46  ;;  %v264_v53 = vld [vmem:[%s4349_s3 + $0x40] sm:$0xff] (!%p191_p9)  ;;  %s3787_s17 = smov (!%p191_p9), 48   ;;  %s3788_s23 = smov (!%p191_p9), 24  }
  0x14   : > { %v3557_v60 = vpack.c.bf16 (!%p191_p9), %v265_v54, %v264_v53  ;;  %s3790_s25 = smov (!%p191_p9), 56   ;;  %s215_s26 = sand.u32 (!%p191_p9), 1, %s3768_s19  }
  0x15   : > { %s218_s9 = scalar_select %p217_p10, %s3843_s22, 1 }
  0x16   : > { %s216_s30 = scalar_lea.vmem [#allocation3], %s215_s26 }
  0x17   : > { %s3213_s12 = sshll.u32 %s218_s9, 4  ;;  %s3043_s7 = sshll.u32 %s216_s30, 4  ;;  %s4306_s7 = int_to_ptr.vmem [resolvable:$true] %s3043_s7 }
  0x18   : > { %s221_s15 = scalar_lea.vmem %s4346_s0, %s3213_s12  ;;  %s3714_s11 = scalar_lea.vmem %s4306_s7, 16 }
  0x19   : > { %v3884_v3 = vld [vmem:[%s221_s15 + $0x1] ss:$2 sm:$0xff]  ;;  %v3888_v4 = vld [vmem:[%s221_s15] ss:$2 sm:$0xff]  ;;  %s3786_s15 = smov 32   ;;  %p3715_p11 = scmp.ne.s32.totalorder %s4306_s7, %s3714_s11 }
  0x1a   : > { %226 = vrot.lane.b32.xlu0 %v3884_v3, %s3778_s16  ;;  %s3791_s12 = smov [#allocation3]  }
  0x1b   : > { %p3716_p12 = pnand %p3715_p11, %p3860_p5  ;;  %s3718_s13 = sshll.u32 %s3791_s12, 4  ;;  %s3719_s13 = int_to_ptr.vmem [resolvable:$false] %s3718_s13 }
  0x1c   : > { %p3721_p0 = scmp.lt.s32.totalorder %s4306_s7, %s3719_s13 }
  0x1d   : > { %p3717_p13 = pneg %p3716_p12 }
  0x8c   : > { %v227_v5 = vpop.permute.xlu0 %226 }
  0x8d   : > { %v230_v6 = vsel %vm229_vm0, %v3888_v4, %v227_v5 }
  0x8e   : > { %v232_v7 = vrot.slane %v230_v6, 7  ;;  %v238_v8 = vrot.slane %v230_v6, 4  ;;  %v234_v9 = vrot.slane %v230_v6, 6  ;;  %v236_v10 = vrot.slane %v230_v6, 5 }
  0x8f   : > { %v240_v11 = vrot.slane %v230_v6, 3  ;;  %v242_v13 = vrot.slane %v230_v6, 2 }
  0x90   : > { %v245_v12 = vsel %vm244_vm1, %v230_v6, %v232_v7  ;;  %v250_v14 = vsel %vm248_vm3, %v236_v10, %v238_v8  ;;  %v3119_v7 = vld [vmem:[%s4350_s4] ss:$0 sm:$0xff] }
  0x91   : > { %v247_v15 = vsel %vm246_vm2, %v245_v12, %v234_v9  ;;  %v252_v16 = vsel %vm251_vm4, %v250_v14, %v240_v11  ;;  %v3120_v14 = vld [vmem:[%s4347_s1 + $0x50] sm:$0xff] }
  0x92   : > { %v249_v17 = vsel %vm248_vm3, %v247_v15, %v236_v10  ;;  %v254_v18 = vsel %vm253_vm5, %v252_v16, %v242_v13  ;;  %v3121_v15 = vld [vmem:[%s4347_s1 + $0x60] sm:$0xff] }
  0x93   : > { %3324 = vmatprep.mubr.msk.f32.mxu1 %vm266_vm6, %v249_v17  ;;  %v349_v19 = vrot.slane %v249_v17, 1  ;;  %v350_v20 = vrot.slane %v254_v18, 1  ;;  %v434_v21 = vrot.slane %v249_v17, 2  ;;  %v435_v22 = vrot.slane %v254_v18, 2 }
  0x94   : > { %3325 = vmatmul.mubr.msk.f32.vlgmr.msra.gmra.mrb[0].mxu1 %vm266_vm6, %v254_v18  ;;  %v518_v26 = vrot.slane %v249_v17, 3  ;;  %v519_v27 = vrot.slane %v254_v18, 3  ;;  %v602_v30 = vrot.slane %v249_v17, 4  ;;  %v603_v31 = vrot.slane %v254_v18, 4 }
  0x95   : > { %v351_v23 = vsel %vm348_vm7, %v349_v19, %v350_v20  ;;  %v436_v25 = vsel %vm433_vm8, %v434_v21, %v435_v22  ;;  %3552 = vmatpush3.bf16.msra.mxu1 %v3551_v35  ;;  %3351 = vmatprep.mubr.msk.f32.mxu1 %vm3780_vm9, %v3781_v37 }
  0x96   : > { %3329 = vmatprep.mubr.msk.f32.mxu0 %vm266_vm6, %v351_v23  ;;  %v520_v29 = vsel %vm253_vm5, %v518_v26, %v519_v27  ;;  %v604_v32 = vsel %vm251_vm4, %v602_v30, %v603_v31  ;;  %3553 = vmatprep.subr.bf16.mxu1 %v3779_v36 }
  0x97   : > { %3330 = vmatmul.mubr.msk.f32.vlgmr.msra.gmra.mrb[0].mxu0 %vm266_vm6, %v350_v20 }
  0x98   : > { %3333 = vmatpush3.msra.mxu0 %v257_v2  ;;  %3334 = vmatprep.mubr.msk.f32.mxu0 %vm266_vm6, %v436_v25 }
  0x99   : > { %3337 = vmatprep.subr.mxu0 %v258_v24 }
  0x9f   : > { %3335 = vmatmul.mubr.msk.f32.vlgmr.msra.gmra.mrb[0].mxu0 %vm266_vm6, %v435_v22 }
  0xa0   : > { %3338 = vmatpush3.msra.mxu0 %v258_v24  ;;  %3339 = vmatprep.mubr.msk.f32.mxu0 %vm266_vm6, %v520_v29 }
  0xa1   : > { %3342 = vmatprep.subr.mxu0 %v259_v28 }
  0xa7   : > { %3340 = vmatmul.mubr.msk.f32.vlgmr.msra.gmra.mrb[0].mxu0 %vm266_vm6, %v519_v27 }
  0xa8   : > { %3343 = vmatpush3.msra.mxu0 %v259_v28  ;;  %3344 = vmatprep.mubr.msk.f32.mxu0 %vm266_vm6, %v604_v32 }
  0xa9   : > { %3559 = vmatprep.subr.bf16.mxu0 %v3779_v36 }
  0xaf   : > { %3345 = vmatmul.mubr.msk.f32.vlgmr.msra.gmra.mrb[0].mxu0 %vm266_vm6, %v603_v31 }
  0xb0   : > { %3397 = vmatprep.mubr.msk.f32.mxu0 %vm3780_vm9, %v3781_v37 }
 0x167   : > { %v3326_v38 = vpop.f32.mrb[0].mxu1 }
 0x168   : > { %v339_v39 = vpop.f32.mrb[1].mxu1 }
 0x182   : > { %v3346_v40 = vpop.f32.mrb[0].mxu0 }
 0x183   : > { %v3634_v42 = vadd.f32 %v3346_v40, %v3326_v38  ;;  %v675_v43 = vpop.f32.mrb[1].mxu0 }
 0x184   : > { %v3635_v44 = vadd.f32 %v675_v43, %v339_v39  ;;  %v3123_v39 = vld [vmem:[%s4347_s1 + $0x80] sm:$0xff]  ;;  %v3124_v43 = vld [vmem:[%s4347_s1 + $0x90] sm:$0xff] }
 0x185   : > { %v692_v45 = vadd.f32 %v3634_v42, %v3115_v41 }
 0x186   : > { %v691_v48 = vadd.f32 %v3635_v44, %v3115_v41 }
 0x187   : > { %vm694_vm10 = vcmp.gt.f32.partialorder %v692_v45, 0.0  ;;  %v696_v49 = vmul.f32 0.01, %v692_v45 }
 0x188   : > { %vm693_vm11 = vcmp.gt.f32.partialorder %v691_v48, 0.0  ;;  %v695_v50 = vmul.f32 0.01, %v691_v48 }
 0x189   : > { %v698_v52 = vsel %vm694_vm10, %v692_v45, %v696_v49  ;;  %v3126_v49 = vld [vmem:[%s4349_s3 + $0x68] sm:$0xff] }
 0x18a   : > { %v775_v55 = vrot.slane %v698_v52, 1  ;;  %v851_v56 = vrot.slane %v698_v52, 2  ;;  %v697_v57 = vsel %vm693_vm11, %v691_v48, %v695_v50  ;;  %v3125_v48 = vld [vmem:[%s4349_s3 + $0x60] sm:$0xff] }
 0x18b   : > { %3352 = vmatmul.mubr.msk.f32.vlgmr.msra.gmra.mrb[2].mxu1 %vm699_vm12, %v697_v57  ;;  %v774_v58 = vrot.slane %v697_v57, 1  ;;  %v850_v59 = vrot.slane %v697_v57, 2  ;;  %v3560_v50 = vpack.c.bf16 %v3126_v49, %v3125_v48  ;;  %v3154_v49 = vld [vmem:[%s4347_s1 + $0xe0] sm:$0xff] }
 0x18c   : > { %3555 = vmatpush3.bf16.msra.mxu1 %v3554_v51  ;;  %3358 = vmatprep.mubr.msk.f32.mxu1 %vm3780_vm9, %v3781_v37  ;;  %v3141_v51 = vld [vmem:[%s4348_s2 + $0x1] ss:$0 sm:$0xff] }
 0x18d   : > { %3556 = vmatprep.subr.bf16.mxu1 %v3779_v36  ;;  %v776_v61 = vsel %vm348_vm7, %v774_v58, %v775_v55  ;;  %v852_v62 = vsel %vm433_vm8, %v850_v59, %v851_v56  ;;  %3561 = vmatpush3.bf16.msra.mxu0 %v3560_v50  ;;  %v3127_v55 = vld [vmem:[%s4349_s3 + $0x80] sm:$0xff]  ;;  %v3128_v56 = vld [vmem:[%s4349_s3 + $0x88] sm:$0xff] }
 0x18e   : > { %3562 = vmatprep.subr.bf16.mxu0 %v3779_v36  ;;  %v3155_v50 = vld [vmem:[%s4347_s1 + $0xe8] sm:$0xff] }
 0x18f   : > { %3359 = vmatmul.mubr.msk.f32.vlgmr.msra.gmra.mrb[4].mxu1 %vm699_vm12, %v776_v61 }
 0x190   : > { %3558 = vmatpush3.bf16.msra.mxu1 %v3557_v60  ;;  %3365 = vmatprep.mubr.msk.f32.mxu1 %vm3780_vm9, %v3781_v37  ;;  %v3563_v60 = vpack.c.bf16 %v3128_v56, %v3127_v55  ;;  %v3581_v55 = vpack.c.bf16 %v3155_v50, %v3154_v49 }
 0x191   : > { %3368 = vmatprep.subr.mxu1 %v3120_v14 }
 0x193   : > { %3366 = vmatmul.mubr.msk.f32.vlgmr.msra.gmra.mrb[6].mxu1 %vm699_vm12, %v852_v62  ;;  %v3129_v62 = vld [vmem:[%s4349_s3 + $0xa0] sm:$0xff] }
 0x194   : > { %3369 = vmatpush3.msra.mxu1 %v3120_v14 }
 0x195   : > { %3373 = vmatprep.subr.mxu1 %v3121_v15 }
 0x25e   : > { %v769_v63 = vpop.f32.mrb[2].mxu1 }
 0x25f   : > { %v3353_v0 = vpop.f32.mrb[3].mxu1 }
 0x262   : > { %v845_v1 = vpop.f32.mrb[4].mxu1 }
 0x263   : > { %v849_v2 = vadd.f32 %v845_v1, %v769_v63  ;;  %v3360_v5 = vpop.f32.mrb[5].mxu1  ;;  %v3130_v63 = vld [vmem:[%s4349_s3 + $0xa8] sm:$0xff] }
 0x266   : > { %v921_v6 = vpop.f32.mrb[6].mxu1 }
 0x267   : > { %v925_v8 = vadd.f32 %v921_v6, %v849_v2  ;;  %v3367_v9 = vpop.f32.mrb[7].mxu1 }
 0x269   : > { %v931_v10 = vadd.f32 %v3119_v7, %v925_v8  ;;  %v3566_v7 = vpack.c.bf16 %v3130_v63, %v3129_v62  ;;  %v3156_v63 = vld [vmem:[%s4349_s3 + $0xc0] sm:$0xff] }
 0x26b   : > { %3702 = vtanh.f32 %v931_v10 }
 0x275   : > { %v3703_v11 = vpop.eup %3702 }
 0x276   : > { %v933_v12 = vmul.f32 1.442695, %v3703_v11 }
 0x278   : > { %3704 = vpow2.f32 %v933_v12 }
 0x282   : > { %v3705_v13 = vpop.eup %3704 }
 0x283   : > { %937 = vrot.lane.b32.xlu0 %v3705_v13, %s3782_s6  ;;  %v3972_v18 = vmul.f32 %v3705_v13, %v3884_v3 }
 0x2f5   : > { %v938_v16 = vpop.permute.xlu0 %937 }
 0x2f6   : > { %v3967_v17 = vmul.f32 %v938_v16, %v3888_v4  ;;  %v3145_v16 = vld [vmem:[%s4350_s4 + $0x1] ss:$0 sm:$0xff] }
 0x2f8   : > { %942 = vrot.lane.b32.xlu1 %v3967_v17, %s3778_s16 }
 0x36a   : > { %v943_v19 = vpop.permute.xlu1 %942 }
 0x36b   : > { %v945_v20 = vsel %vm229_vm0, %v3972_v18, %v943_v19 }
 0x36c   : > { %v947_v21 = vrot.slane %v945_v20, 7  ;;  %v953_v22 = vrot.slane %v945_v20, 4  ;;  %v949_v23 = vrot.slane %v945_v20, 6  ;;  %v951_v24 = vrot.slane %v945_v20, 5 }
 0x36d   : > { %v955_v25 = vrot.slane %v945_v20, 3  ;;  %v957_v27 = vrot.slane %v945_v20, 2 }
 0x36e   : > { %v959_v26 = vsel %vm244_vm1, %v945_v20, %v947_v21  ;;  %v962_v4 = vsel %vm248_vm3, %v951_v24, %v953_v22 }
 0x36f   : > { %v960_v28 = vsel %vm246_vm2, %v959_v26, %v949_v23  ;;  %v963_v29 = vsel %vm251_vm4, %v962_v4, %v955_v25  ;;  %v3146_v26 = vld [vmem:[%s4347_s1 + $0xa0] sm:$0xff]  ;;  %v3148_v4 = vld [vmem:[%s4347_s1 + $0xb0] sm:$0xff] }
 0x370   : > { %v961_v3 = vsel %vm248_vm3, %v960_v28, %v951_v24  ;;  %v964_v30 = vsel %vm253_vm5, %v963_v29, %v957_v27  ;;  %v3147_v27 = vld [vmem:[%s4347_s1 + $0xa8] sm:$0xff] }
 0x371   : > { %3370 = vmatprep.mubr.msk.f32.mxu1 %vm266_vm6, %v961_v3  ;;  %v1059_v31 = vrot.slane %v961_v3, 1  ;;  %v1060_v32 = vrot.slane %v964_v30, 1  ;;  %v1143_v35 = vrot.slane %v961_v3, 2  ;;  %v1144_v38 = vrot.slane %v964_v30, 2 }
 0x372   : > { %3371 = vmatmul.mubr.msk.f32.vlgmr.msra.gmra.mrb[8].mxu1 %vm266_vm6, %v964_v30  ;;  %v1227_v41 = vrot.slane %v961_v3, 3  ;;  %v1228_v42 = vrot.slane %v964_v30, 3  ;;  %v1311_v45 = vrot.slane %v961_v3, 4  ;;  %v1312_v46 = vrot.slane %v964_v30, 4 }
 0x373   : > { %3374 = vmatpush3.msra.mxu1 %v3121_v15  ;;  %v1061_v34 = vsel %vm348_vm7, %v1059_v31, %v1060_v32  ;;  %v1145_v40 = vsel %vm433_vm8, %v1143_v35, %v1144_v38  ;;  %v3150_v35 = vld [vmem:[%s4347_s1 + $0xc0] sm:$0xff] }
 0x374   : > { %3375 = vmatprep.mubr.msk.f32.mxu1 %vm266_vm6, %v1061_v34  ;;  %3378 = vmatprep.subr.mxu1 %v3122_v33  ;;  %v1229_v44 = vsel %vm253_vm5, %v1227_v41, %v1228_v42  ;;  %v1313_v47 = vsel %vm251_vm4, %v1311_v45, %v1312_v46 }
 0x37a   : > { %3376 = vmatmul.mubr.msk.f32.vlgmr.msra.gmra.mrb[8].mxu1 %vm266_vm6, %v1060_v32 }
 0x37b   : > { %3379 = vmatpush3.msra.mxu1 %v3122_v33  ;;  %3380 = vmatprep.mubr.msk.f32.mxu1 %vm266_vm6, %v1145_v40 }
 0x37c   : > { %3383 = vmatprep.subr.mxu1 %v3123_v39 }
 0x382   : > { %3381 = vmatmul.mubr.msk.f32.vlgmr.msra.gmra.mrb[8].mxu1 %vm266_vm6, %v1144_v38  ;;  %v3151_v38 = vld [vmem:[%s4347_s1 + $0xc8] sm:$0xff] }
 0x383   : > { %3384 = vmatpush3.msra.mxu1 %v3123_v39  ;;  %3385 = vmatprep.mubr.msk.f32.mxu1 %vm266_vm6, %v1229_v44  ;;  %v3153_v44 = vld [vmem:[%s4347_s1 + $0xd8] sm:$0xff] }
 0x384   : > { %3388 = vmatprep.subr.mxu1 %v3124_v43 }
 0x38a   : > { %3386 = vmatmul.mubr.msk.f32.vlgmr.msra.gmra.mrb[8].mxu1 %vm266_vm6, %v1228_v42 }
 0x38b   : > { %3389 = vmatpush3.msra.mxu1 %v3124_v43  ;;  %3390 = vmatprep.mubr.msk.f32.mxu1 %vm266_vm6, %v1313_v47  ;;  %v3152_v43 = vld [vmem:[%s4347_s1 + $0xd0] sm:$0xff]  ;;  %v3575_v47 = vpack.c.bf16 %v3151_v38, %v3150_v35 }
 0x38c   : > { %3571 = vmatprep.subr.bf16.mxu1 %v3779_v36 }
 0x392   : > { %3391 = vmatmul.mubr.msk.f32.vlgmr.msra.gmra.mrb[8].mxu1 %vm266_vm6, %v1312_v46 }
 0x393   : > { %3425 = vmatprep.mubr.msk.f32.mxu1 %vm3780_vm9, %v3781_v37 }
 0x465   : > { %v3392_v52 = vpop.f32.mrb[8].mxu1 }
 0x466   : > { %v1401_v53 = vadd.f32 %v3392_v52, %v3141_v51  ;;  %v1384_v54 = vpop.f32.mrb[9].mxu1  ;;  %v3578_v52 = vpack.c.bf16 %v3153_v44, %v3152_v43 }
 0x467   : > { %v1400_v57 = vadd.f32 %v3141_v51, %v1384_v54 }
 0x468   : > { %vm1403_vm13 = vcmp.gt.f32.partialorder %v1401_v53, 0.0  ;;  %v1405_v58 = vmul.f32 0.01, %v1401_v53 }
 0x469   : > { %vm1402_vm14 = vcmp.gt.f32.partialorder %v1400_v57, 0.0  ;;  %v1404_v59 = vmul.f32 0.01, %v1400_v57 }
 0x46a   : > { %v1407_v61 = vsel %vm1403_vm13, %v1401_v53, %v1405_v58 }
 0x46b   : > { %v1483_v0 = vrot.slane %v1407_v61, 1  ;;  %v1559_v1 = vrot.slane %v1407_v61, 2  ;;  %v1406_v2 = vsel %vm1402_vm14, %v1400_v57, %v1404_v59 }
 0x46c   : > { %v1482_v5 = vrot.slane %v1406_v2, 1  ;;  %v1558_v6 = vrot.slane %v1406_v2, 2  ;;  %3398 = vmatmul.mubr.msk.f32.vlgmr.msra.gmra.mrb[2].mxu0 %vm699_vm12, %v1406_v2  ;;  %v3160_v2 = vld [vmem:[%s4349_s3 + $0xe0] sm:$0xff] }
 0x46d   : > { %3564 = vmatpush3.bf16.msra.mxu0 %v3563_v60  ;;  %3404 = vmatprep.mubr.msk.f32.mxu0 %vm3780_vm9, %v3781_v37 }
 0x46e   : > { %3565 = vmatprep.subr.bf16.mxu0 %v3779_v36  ;;  %v1484_v8 = vsel %vm348_vm7, %v1482_v5, %v1483_v0  ;;  %v1560_v9 = vsel %vm433_vm8, %v1558_v6, %v1559_v1  ;;  %v3157_v0 = vld [vmem:[%s4349_s3 + $0xc8] sm:$0xff]  ;;  %vm2087_vm8 = vcmask 261120  }
 0x46f   : > { %v3584_v1 = vpack.c.bf16 %v3157_v0, %v3156_v63  ;;  %v3161_v5 = vld [vmem:[%s4349_s3 + $0xe8] sm:$0xff] }
 0x470   : > { %3405 = vmatmul.mubr.msk.f32.vlgmr.msra.gmra.mrb[4].mxu0 %vm699_vm12, %v1484_v8  ;;  %v3590_v6 = vpack.c.bf16 %v3161_v5, %v3160_v2  ;;  %v3159_v8 = vld [vmem:[%s4349_s3 + $0xd8] sm:$0xff]  ;;  %v3180_v5 = vld [vmem:[%s4347_s1 + $0x100] sm:$0xff] }
 0x471   : > { %3567 = vmatpush3.bf16.msra.mxu0 %v3566_v7  ;;  %3411 = vmatprep.mubr.msk.f32.mxu0 %vm3780_vm9, %v3781_v37  ;;  %v3158_v7 = vld [vmem:[%s4349_s3 + $0xd0] sm:$0xff] }
 0x472   : > { %3568 = vmatprep.subr.bf16.mxu0 %v3779_v36 }
 0x474   : > { %3412 = vmatmul.mubr.msk.f32.vlgmr.msra.gmra.mrb[6].mxu0 %vm699_vm12, %v1560_v9  ;;  %v3587_v9 = vpack.c.bf16 %v3159_v8, %v3158_v7 }
 0x475   : > { %3418 = vmatprep.mubr.msk.f32.mxu0 %vm3780_vm9, %v3781_v37 }
 0x53f   : > { %v1477_v10 = vpop.f32.mrb[2].mxu0 }
 0x540   : > { %v3399_v11 = vpop.f32.mrb[3].mxu0 }
 0x541   : > { %v3163_v11 = vld [vmem:[%s4349_s3 + $0xf8] sm:$0xff] }
 0x543   : > { %v1553_v12 = vpop.f32.mrb[4].mxu0 }
 0x544   : > { %v1557_v13 = vadd.f32 %v1553_v12, %v1477_v10  ;;  %v3406_v14 = vpop.f32.mrb[5].mxu0  ;;  %v3162_v10 = vld [vmem:[%s4349_s3 + $0xf0] sm:$0xff] }
 0x545   : > { %v3593_v12 = vpack.c.bf16 %v3163_v11, %v3162_v10  ;;  %v3187_v10 = vld [vmem:[%s4347_s1 + $0x138] sm:$0xff] }
 0x547   : > { %v1629_v15 = vpop.f32.mrb[6].mxu0 }
 0x548   : > { %v1633_v19 = vadd.f32 %v1629_v15, %v1557_v13  ;;  %v3413_v20 = vpop.f32.mrb[7].mxu0 }
 0x54a   : > { %v1639_v21 = vadd.f32 %v3145_v16, %v1633_v19 }
 0x54c   : > { %3706 = vtanh.f32 %v1639_v21 }
 0x556   : > { %v3707_v22 = vpop.eup %3706 }
 0x557   : > { %1643 = vrot.lane.b32.xlu1 %v3707_v22, %s3782_s6  ;;  %v1641_v23 = vadd.f32 %v3707_v22, %v3967_v17  ;;  %v3569_v17 = vpack.c.bf16 %v3147_v27, %v3146_v26  ;;  %v3173_v27 = vld [vmem:[%s4348_s2 + $0x2] ss:$0 sm:$0xff] }
 0x559   : > { %1647 = vst.msk [vmem:[#allocation2] sm:$0xff] %vm229_vm0, %v1641_v23  ;;  %3570 = vmatpush3.bf16.msra.mxu0 %v3569_v17 }
 0x55a   : > { %3574 = vmatprep.subr.bf16.mxu0 %v3779_v36 }
 0x5c9   : > { %v1644_v24 = vpop.permute.xlu1 %1643 }
 0x5ca   : > { %v1646_v25 = vsub.f32 %v3972_v18, %v1644_v24  ;;  %v3149_v18 = vld [vmem:[%s4347_s1 + $0xb8] sm:$0xff] }
 0x5cb   : > { %v3572_v28 = vpack.c.bf16 %v3149_v18, %v3148_v4  ;;  %v3164_v18 = vld [vmem:[%s4349_s3 + $0x100] sm:$0xff] }
 0x5cc   : > { %1649 = vrot.lane.b32.xlu0 %v1646_v25, %s3778_s16  ;;  %s3783_s16 = smov 8  }
 0x5cd   : > { %3573 = vmatpush3.bf16.msra.mxu1 %v3572_v28  ;;  %v3165_v28 = vld [vmem:[%s4349_s3 + $0x108] sm:$0xff] }
 0x5ce   : > { %3577 = vmatprep.subr.bf16.mxu1 %v3779_v36 }
 0x63e   : > { %v1650_v29 = vpop.permute.xlu0 %1649 }
 0x63f   : > { %1653 = vst.msk [vmem:[#allocation2] sm:$0xff] %vm1652_vm15, %v1650_v29 }
 0x646   : > { %v4065_v3 = vld [vmem:[#allocation2 + $0x1] ss:$2 sm:$0xf]  ;;  %v4069_v31 = vld [vmem:[#allocation2] ss:$2 sm:$0xf] }
 0x647   : > { %1658 = vrot.lane.b32.xlu1 %v4065_v3, %s3783_s16 }
 0x6b9   : > { %v1659_v30 = vpop.permute.xlu1 %1658 }
 0x6ba   : > { %v1661_v32 = vsel %vm266_vm6, %v4069_v31, %v1659_v30 }
 0x6bb   : > { %v1663_v33 = vrot.slane %v1661_v32, 7  ;;  %v1665_v34 = vrot.slane %v1661_v32, 6  ;;  %v1671_v39 = vrot.slane %v1661_v32, 3  ;;  %v1673_v40 = vrot.slane %v1661_v32, 2 }
 0x6bc   : > { %v1667_v41 = vrot.slane %v1661_v32, 5  ;;  %v1669_v45 = vrot.slane %v1661_v32, 4 }
 0x6bd   : > { %v1675_v42 = vsel %vm244_vm1, %v1661_v32, %v1663_v33  ;;  %v1679_v54 = vsel %vm244_vm1, %v1671_v39, %v1673_v40  ;;  %v3596_v32 = vpack.c.bf16 %v3165_v28, %v3164_v18  ;;  %v3166_v33 = vld [vmem:[%s4349_s3 + $0x110] sm:$0xff]  ;;  %v3188_v28 = vld [vmem:[%s4349_s3 + $0x120] sm:$0xff] }
 0x6be   : > { %v1676_v46 = vsel %vm246_vm2, %v1675_v42, %v1665_v34  ;;  %v1927_v58 = vrot.slane %v1679_v54, 3  ;;  %v2003_v61 = vrot.slane %v1679_v54, 4  ;;  %v3167_v34 = vld [vmem:[%s4349_s3 + $0x118] sm:$0xff]  ;;  %v3178_v54 = vld [vmem:[%s4347_s1 + $0xf0] sm:$0xff] }
 0x6bf   : > { %v1677_v48 = vsel %vm248_vm3, %v1676_v46, %v1667_v41  ;;  %v3599_v39 = vpack.c.bf16 %v3167_v34, %v3166_v33  ;;  %v3193_v33 = vld [vmem:[%s4349_s3 + $0x148] sm:$0xff] }
 0x6c0   : > { %v1678_v51 = vsel %vm348_vm7, %v1677_v48, %v1669_v45 }
 0x6c1   : > { %3419 = vmatmul.mubr.msk.f32.vlgmr.msra.gmra.mrb[8].mxu0 %vm699_vm12, %v1678_v51  ;;  %v1777_v53 = vrot.slane %v1678_v51, 1  ;;  %v1926_v56 = vrot.slane %v1678_v51, 3  ;;  %v1851_v57 = vrot.slane %v1678_v51, 2  ;;  %v2002_v59 = vrot.slane %v1678_v51, 4 }
 0x6c2   : > { %3576 = vmatpush3.bf16.msra.mxu0 %v3575_v47  ;;  %3432 = vmatprep.mubr.msk.f32.mxu0 %vm3780_vm9, %v3781_v37  ;;  %v3177_v47 = vld [vmem:[%s4350_s4 + $0x2] ss:$0 sm:$0xff] }
 0x6c3   : > { %3426 = vmatmul.mubr.msk.f32.vlgmr.msra.gmra.mrb[10].mxu1 %vm699_vm12, %v1777_v53  ;;  %3580 = vmatprep.subr.bf16.mxu0 %v3779_v36  ;;  %v1928_v60 = vsel %vm253_vm5, %v1926_v56, %v1927_v58  ;;  %v2004_v62 = vsel %vm251_vm4, %v2002_v59, %v2003_v61  ;;  %v3182_v56 = vld [vmem:[%s4347_s1 + $0x110] sm:$0xff]  ;;  %v3183_v58 = vld [vmem:[%s4347_s1 + $0x118] sm:$0xff] }
 0x6c4   : > { %3579 = vmatpush3.bf16.msra.mxu1 %v3578_v52  ;;  %3439 = vmatprep.mubr.msk.f32.mxu1 %vm3780_vm9, %v3781_v37  ;;  %v3608_v59 = vpack.c.bf16 %v3183_v58, %v3182_v56  ;;  %v3205_v56 = vld [vmem:[%s4348_s2 + $0x3] ss:$0 sm:$0xff] }
 0x6c5   : > { %3433 = vmatmul.mubr.msk.f32.vlgmr.msra.gmra.mrb[10].mxu0 %vm699_vm12, %v1851_v57  ;;  %3583 = vmatprep.subr.bf16.mxu1 %v3779_v36  ;;  %v3196_v58 = vld [vmem:[%s4349_s3 + $0x160] sm:$0xff] }
 0x6c6   : > { %3582 = vmatpush3.bf16.msra.mxu0 %v3581_v55  ;;  %3446 = vmatprep.mubr.msk.f32.mxu0 %vm3780_vm9, %v3781_v37  ;;  %v3179_v55 = vld [vmem:[%s4347_s1 + $0xf8] sm:$0xff] }
 0x6c7   : > { %3440 = vmatmul.mubr.msk.f32.vlgmr.msra.gmra.mrb[12].mxu1 %vm699_vm12, %v1928_v60  ;;  %3589 = vmatprep.subr.bf16.mxu0 %v3779_v36  ;;  %v3602_v57 = vpack.c.bf16 %v3179_v55, %v3178_v54 }
 0x6c8   : > { %3457 = vmatprep.mubr.msk.f32.mxu1 %vm3780_vm9, %v3781_v37  ;;  %3585 = vmatpush3.bf16.msra.mxu1 %v3584_v1 }
 0x6c9   : > { %3447 = vmatmul.mubr.msk.f32.vlgmr.msra.gmra.mrb[12].mxu0 %vm699_vm12, %v2004_v62  ;;  %3586 = vmatprep.subr.bf16.mxu1 %v3779_v36 }
 0x6ca   : > { %3468 = vmatprep.mubr.msk.f32.mxu0 %vm3780_vm9, %v3781_v37  ;;  %3591 = vmatpush3.bf16.msra.mxu0 %v3590_v6 }
 0x6cb   : > { %3592 = vmatprep.subr.bf16.mxu0 %v3779_v36 }
 0x6cc   : > { %3588 = vmatpush3.bf16.msra.mxu1 %v3587_v9  ;;  %v3186_v9 = vld [vmem:[%s4347_s1 + $0x130] sm:$0xff] }
 0x6cd   : > { %3595 = vmatprep.subr.bf16.mxu1 %v3779_v36 }
 0x6ce   : > { %3594 = vmatpush3.bf16.msra.mxu0 %v3593_v12 }
 0x6cf   : > { %3601 = vmatprep.subr.bf16.mxu0 %v3779_v36 }
 0x794   : > { %v1773_v13 = vpop.f32.mrb[8].mxu0 }
 0x795   : > { %v3420_v14 = vpop.f32.mrb[9].mxu0 }
 0x796   : > { %v1846_v15 = vpop.f32.mrb[10].mxu1 }
 0x797   : > { %v1850_v16 = vadd.f32 %v1846_v15, %v1773_v13  ;;  %v3427_v19 = vpop.f32.mrb[11].mxu1  ;;  %v3184_v15 = vld [vmem:[%s4347_s1 + $0x120] sm:$0xff] }
 0x798   : > { %v1920_v20 = vpop.f32.mrb[10].mxu0 }
 0x799   : > { %v1924_v21 = vadd.f32 %v1920_v20, %v1850_v16  ;;  %v3434_v22 = vpop.f32.mrb[11].mxu0  ;;  %v3185_v16 = vld [vmem:[%s4347_s1 + $0x128] sm:$0xff]  ;;  %v3614_v20 = vpack.c.bf16 %v3187_v10, %v3186_v9 }
 0x79a   : > { %v1997_v23 = vpop.f32.mrb[12].mxu1 }
 0x79b   : > { %v2001_v24 = vadd.f32 %v1997_v23, %v1924_v21  ;;  %v3441_v25 = vpop.f32.mrb[13].mxu1  ;;  %v3611_v23 = vpack.c.bf16 %v3185_v16, %v3184_v15 }
 0x79c   : > { %v2073_v26 = vpop.f32.mrb[12].mxu0 }
 0x79d   : > { %v2077_v4 = vadd.f32 %v2073_v26, %v2001_v24  ;;  %v3448_v17 = vpop.f32.mrb[13].mxu0 }
 0x79f   : > { %v2083_v29 = vadd.f32 %v3173_v27, %v2077_v4 }
 0x7a1   : > { %vm2084_vm0 = vcmp.gt.f32.partialorder %v2083_v29, 0.0  ;;  %v2085_v30 = vmul.f32 0.01, %v2083_v29 }
 0x7a3   : > { %v2086_v35 = vsel %vm2084_vm0, %v2083_v29, %v2085_v30  ;;  %v3189_v29 = vld [vmem:[%s4349_s3 + $0x128] sm:$0xff] }
 0x7a4   : > { %3458 = vmatmul.mubr.msk.f32.vlgmr.msra.gmra.mrb[14].mxu1 %vm2087_vm8, %v2086_v35  ;;  %v2161_v38 = vrot.slane %v2086_v35, 1  ;;  %v2235_v40 = vrot.slane %v2086_v35, 2  ;;  %v3617_v30 = vpack.c.bf16 %v3189_v29, %v3188_v28  ;;  %v3190_v35 = vld [vmem:[%s4349_s3 + $0x130] sm:$0xff] }
 0x7a5   : > { %3597 = vmatpush3.bf16.msra.mxu1 %v3596_v32  ;;  %3479 = vmatprep.mubr.msk.f32.mxu1 %vm3780_vm9, %v3781_v37  ;;  %v3192_v32 = vld [vmem:[%s4349_s3 + $0x140] sm:$0xff] }
 0x7a6   : > { %3469 = vmatmul.mubr.msk.f32.vlgmr.msra.gmra.mrb[14].mxu0 %vm2087_vm8, %v2161_v38  ;;  %3598 = vmatprep.subr.bf16.mxu1 %v3779_v36  ;;  %v3623_v34 = vpack.c.bf16 %v3193_v33, %v3192_v32  ;;  %v3191_v38 = vld [vmem:[%s4349_s3 + $0x138] sm:$0xff] }
 0x7a7   : > { %3486 = vmatprep.mubr.msk.f32.mxu0 %vm3780_vm9, %v3781_v37  ;;  %3603 = vmatpush3.bf16.msra.mxu0 %v3602_v57 }
 0x7a8   : > { %3604 = vmatprep.subr.bf16.mxu0 %v3779_v36 }
 0x7a9   : > { %3600 = vmatpush3.bf16.msra.mxu1 %v3599_v39  ;;  %v3620_v39 = vpack.c.bf16 %v3191_v38, %v3190_v35 }
 0x7aa   : > { %3607 = vmatprep.subr.bf16.mxu1 %v3779_v36 }
 0x7ac   : > { %3480 = vmatmul.mubr.msk.f32.vlgmr.msra.gmra.mrb[16].mxu1 %vm2087_vm8, %v2235_v40  ;;  %v3194_v40 = vld [vmem:[%s4349_s3 + $0x150] sm:$0xff] }
 0x7ad   : > { %3500 = vmatprep.mubr.msk.f32.mxu1 %vm3780_vm9, %v3781_v37  ;;  %3609 = vmatpush3.bf16.msra.mxu1 %v3608_v59  ;;  %v3197_v59 = vld [vmem:[%s4349_s3 + $0x168] sm:$0xff] }
 0x7ae   : > { %3613 = vmatprep.subr.bf16.mxu1 %v3779_v36 }
 0x877   : > { %v2157_v41 = vpop.f32.mrb[14].mxu1 }
 0x878   : > { %v3459_v42 = vpop.f32.mrb[15].mxu1 }
 0x879   : > { %v2230_v43 = vpop.f32.mrb[14].mxu0 }
 0x87a   : > { %v2234_v44 = vadd.f32 %v2230_v43, %v2157_v41  ;;  %v3470_v45 = vpop.f32.mrb[15].mxu0  ;;  %v3195_v41 = vld [vmem:[%s4349_s3 + $0x158] sm:$0xff] }
 0x87b   : > { %v3626_v42 = vpack.c.bf16 %v3195_v41, %v3194_v40 }
 0x87f   : > { %v2304_v46 = vpop.f32.mrb[16].mxu1 }
 0x880   : > { %v2308_v48 = vadd.f32 %v2304_v46, %v2234_v44  ;;  %v3481_v49 = vpop.f32.mrb[17].mxu1 }
 0x882   : > { %v2314_v50 = vadd.f32 %v3177_v47, %v2308_v48 }
 0x884   : > { %3708 = vtanh.f32 %v2314_v50 }
 0x88e   : > { %v3709_v51 = vpop.eup %3708 }
 0x88f   : > { %v2316_v52 = vmul.f32 1.442695, %v3709_v51 }
 0x891   : > { %3710 = vpow2.f32 %v2316_v52 }
 0x89b   : > { %v3711_v53 = vpop.eup %3710 }
 0x89c   : > { %2320 = vrot.lane.b32.xlu0 %v3711_v53, %s3784_s8  ;;  %v4194_v62 = vmul.f32 %v3711_v53, %v4065_v3 }
 0x90e   : > { %v2321_v60 = vpop.permute.xlu0 %2320 }
 0x90f   : > { %v4189_v61 = vmul.f32 %v2321_v60, %v4069_v31  ;;  %v3181_v31 = vld [vmem:[%s4347_s1 + $0x108] sm:$0xff] }
 0x910   : > { %v3605_v13 = vpack.c.bf16 %v3181_v31, %v3180_v5 }
 0x911   : > { %2325 = vrot.lane.b32.xlu1 %v4189_v61, %s3783_s16 }
 0x983   : > { %v2326_v63 = vpop.permute.xlu1 %2325 }
 0x984   : > { %v2328_v0 = vsel %vm266_vm6, %v4194_v62, %v2326_v63 }
 0x985   : > { %v2330_v1 = vrot.slane %v2328_v0, 7  ;;  %v2332_v2 = vrot.slane %v2328_v0, 6  ;;  %v2338_v6 = vrot.slane %v2328_v0, 3  ;;  %v2340_v7 = vrot.slane %v2328_v0, 2 }
 0x986   : > { %v2334_v8 = vrot.slane %v2328_v0, 5  ;;  %v2336_v11 = vrot.slane %v2328_v0, 4 }
 0x987   : > { %v2342_v3 = vsel %vm244_vm1, %v2328_v0, %v2330_v1  ;;  %v2346_v22 = vsel %vm244_vm1, %v2338_v6, %v2340_v7  ;;  %v3629_v0 = vpack.c.bf16 %v3197_v59, %v3196_v58  ;;  %v3198_v1 = vld [vmem:[%s4349_s3 + $0x170] sm:$0xff] }
 0x988   : > { %v2343_v12 = vsel %vm246_vm2, %v2342_v3, %v2332_v2  ;;  %v2670_v26 = vrot.slane %v2346_v22, 4  ;;  %v2594_v17 = vrot.slane %v2346_v22, 3  ;;  %v3199_v2 = vld [vmem:[%s4349_s3 + $0x178] sm:$0xff]  ;;  %vm3019_vm2 = vcmask 195584  }
 0x989   : > { %v2344_v14 = vsel %vm248_vm3, %v2343_v12, %v2334_v8  ;;  %v3632_v6 = vpack.c.bf16 %v3199_v2, %v3198_v1  ;;  %vm3022_vm3 = vcmask 326656  }
 0x98a   : > { %v2345_v19 = vsel %vm348_vm7, %v2344_v14, %v2336_v11 }
 0x98b   : > { %3487 = vmatmul.mubr.msk.f32.vlgmr.msra.gmra.mrb[16].mxu0 %vm699_vm12, %v2345_v19  ;;  %v2518_v21 = vrot.slane %v2345_v19, 2  ;;  %v2669_v24 = vrot.slane %v2345_v19, 4  ;;  %v2444_v25 = vrot.slane %v2345_v19, 1  ;;  %v2593_v27 = vrot.slane %v2345_v19, 3 }
 0x98c   : > { %3606 = vmatpush3.bf16.msra.mxu0 %v3605_v13  ;;  %3493 = vmatprep.mubr.msk.f32.mxu0 %vm3780_vm9, %v3781_v37  ;;  %v3209_v13 = vld [vmem:[%s4350_s4 + $0x3] ss:$0 sm:$0xff] }
 0x98d   : > { %3501 = vmatmul.mubr.msk.f32.vlgmr.msra.gmra.mrb[18].mxu1 %vm699_vm12, %v2518_v21  ;;  %3610 = vmatprep.subr.bf16.mxu0 %v3779_v36  ;;  %v2671_v4 = vsel %vm251_vm4, %v2669_v24, %v2670_v26  ;;  %v2595_v18 = vsel %vm253_vm5, %v2593_v27, %v2594_v17  ;;  %vm3024_vm4 = vcmask 392192   ;;  %vm3026_vm5 = vcmask 457728  }
 0x98e   : > { %3615 = vmatpush3.bf16.msra.mxu1 %v3614_v20  ;;  %3514 = vmatprep.mubr.msk.f32.mxu1 %vm3780_vm9, %v3781_v37 }
 0x98f   : > { %3494 = vmatmul.mubr.msk.f32.vlgmr.msra.gmra.mrb[18].mxu0 %vm699_vm12, %v2444_v25  ;;  %3622 = vmatprep.subr.bf16.mxu1 %v3779_v36 }
 0x990   : > { %3612 = vmatpush3.bf16.msra.mxu0 %v3611_v23  ;;  %3507 = vmatprep.mubr.msk.f32.mxu0 %vm3780_vm9, %v3781_v37 }
 0x991   : > { %3515 = vmatmul.mubr.msk.f32.vlgmr.msra.gmra.mrb[20].mxu1 %vm699_vm12, %v2671_v4  ;;  %3616 = vmatprep.subr.bf16.mxu0 %v3779_v36 }
 0x992   : > { %3536 = vmatprep.mubr.msk.f32.mxu1 %vm3780_vm9, %v3781_v37  ;;  %3624 = vmatpush3.bf16.msra.mxu1 %v3623_v34 }
 0x993   : > { %3508 = vmatmul.mubr.msk.f32.vlgmr.msra.gmra.mrb[20].mxu0 %vm699_vm12, %v2595_v18  ;;  %3625 = vmatprep.subr.bf16.mxu1 %v3779_v36 }
 0x994   : > { %3525 = vmatprep.mubr.msk.f32.mxu0 %vm3780_vm9, %v3781_v37  ;;  %3618 = vmatpush3.bf16.msra.mxu0 %v3617_v30 }
 0x995   : > { %3619 = vmatprep.subr.bf16.mxu0 %v3779_v36 }
 0x996   : > { %3627 = vmatpush3.bf16.msra.mxu1 %v3626_v42 }
 0x998   : > { %3621 = vmatpush3.bf16.msra.mxu0 %v3620_v39 }
 0x999   : > { %3628 = vmatprep.subr.bf16.mxu0 %v3779_v36 }
 0xa5e   : > { %v2440_v43 = vpop.f32.mrb[16].mxu0 }
 0xa5f   : > { %v3488_v44 = vpop.f32.mrb[17].mxu0 }
 0xa60   : > { %v2587_v45 = vpop.f32.mrb[18].mxu1 }
 0xa61   : > { %v3502_v46 = vpop.f32.mrb[19].mxu1 }
 0xa62   : > { %v2513_v47 = vpop.f32.mrb[18].mxu0 }
 0xa63   : > { %v2517_v48 = vadd.f32 %v2513_v47, %v2440_v43  ;;  %v3495_v49 = vpop.f32.mrb[19].mxu0 }
 0xa64   : > { %v2740_v50 = vpop.f32.mrb[20].mxu1 }
 0xa65   : > { %v3516_v51 = vpop.f32.mrb[21].mxu1  ;;  %v2591_v52 = vadd.f32 %v2587_v45, %v2517_v48 }
 0xa66   : > { %v2664_v53 = vpop.f32.mrb[20].mxu0 }
 0xa67   : > { %v2668_v54 = vadd.f32 %v2664_v53, %v2591_v52  ;;  %v3509_v55 = vpop.f32.mrb[21].mxu0 }
 0xa69   : > { %v2744_v57 = vadd.f32 %v2740_v50, %v2668_v54 }
 0xa6b   : > { %v2750_v60 = vadd.f32 %v3205_v56, %v2744_v57 }
 0xa6d   : > { %v2752_v63 = vmul.f32 0.01, %v2750_v60  ;;  %vm2751_vm1 = vcmp.gt.f32.partialorder %v2750_v60, 0.0 }
 0xa6f   : > { %v2753_v5 = vsel %vm2751_vm1, %v2750_v60, %v2752_v63 }
 0xa70   : > { %3526 = vmatmul.mubr.msk.f32.vlgmr.msra.gmra.mrb[22].mxu0 %vm2087_vm8, %v2753_v5  ;;  %v2827_v31 = vrot.slane %v2753_v5, 1  ;;  %v2901_v7 = vrot.slane %v2753_v5, 2 }
 0xa71   : > { %3630 = vmatpush3.bf16.msra.mxu0 %v3629_v0  ;;  %3547 = vmatprep.mubr.msk.f32.mxu0 %vm3780_vm9, %v3781_v37 }
 0xa72   : > { %3537 = vmatmul.mubr.msk.f32.vlgmr.msra.gmra.mrb[22].mxu1 %vm2087_vm8, %v2827_v31  ;;  %3631 = vmatprep.subr.bf16.mxu0 %v3779_v36 }
 0xa75   : > { %3633 = vmatpush3.bf16.msra.mxu0 %v3632_v6 }
 0xa78   : > { %3548 = vmatmul.mubr.msk.f32.vlgmr.msra.gmra.mrb[24].mxu0 %vm2087_vm8, %v2901_v7 }
 0xb43   : > { %v2823_v8 = vpop.f32.mrb[22].mxu0 }
 0xb44   : > { %v3527_v3 = vpop.f32.mrb[23].mxu0 }
 0xb45   : > { %v2896_v9 = vpop.f32.mrb[22].mxu1 }
 0xb46   : > { %v2900_v10 = vadd.f32 %v2896_v9, %v2823_v8  ;;  %v3538_v11 = vpop.f32.mrb[23].mxu1 }
 0xb4b   : > { %v2970_v12 = vpop.f32.mrb[24].mxu0 }
 0xb4c   : > { %v2974_v14 = vadd.f32 %v2970_v12, %v2900_v10  ;;  %v3549_v37 = vpop.f32.mrb[25].mxu0 }
 0xb4e   : > { %v2980_v15 = vadd.f32 %v3209_v13, %v2974_v14 }
 0xb50   : > { %3712 = vtanh.f32 %v2980_v15 }
 0xb5a   : > { %v3713_v16 = vpop.eup %3712 }
 0xb5b   : > { %2984 = vrot.lane.b32.xlu0 %v3713_v16, %s3784_s8  ;;  %v2982_v36 = vadd.f32 %v3713_v16, %v4189_v61  ;;  %s3789_s8 = smov 40  }
 0xb5d   : > { %v2993_v19 = vrot.slane %v2982_v36, 1  ;;  %v3001_v20 = vrot.slane %v2982_v36, 2  ;;  %v3009_v21 = vrot.slane %v2982_v36, 3 }
 0xb5f   : > { %2994 = vrot.lane.b32.xlu0 %v2993_v19, %s3785_s14  ;;  %s3720_s14 = scalar_lea.vmem %s3719_s13, 32 }
 0xb60   : > { %p3722_p1 = scmp.lt.s32.totalorder %s3720_s14, %s3714_s11 }
 0xb62   : > { %p3723_p2 = por %p3722_p1, %p3721_p0 }
 0xb63   : > { %3002 = vrot.lane.b32.xlu0 %v3001_v20, %s3786_s15 }
 0xb64   : > { %p3724_p3 = pnand %p3723_p2, %p3717_p13 }
 0xb67   : > { %3010 = vrot.lane.b32.xlu0 %v3009_v21, %s3787_s17 }
 0xbcd   : > { %v2985_v22 = vpop.permute.xlu0 %2984 }
 0xbce   : > { %v2987_v23 = vsub.f32 %v4194_v62, %v2985_v22 }
 0xbd0   : > { %2989 = vrot.lane.b32.xlu1 %v2987_v23, %s3783_s16  ;;  %v2997_v24 = vrot.slane %v2987_v23, 1  ;;  %v3005_v25 = vrot.slane %v2987_v23, 2  ;;  %v3013_v61 = vrot.slane %v2987_v23, 3  ;;  %s3210_s16 = sshll.u32 %s3843_s22, 4  ;;  %s3031_s22 = scalar_lea.sflag [#allocation4], %s215_s26 }
 0xbd1   : > { %v2995_v26 = vpop.permute.xlu0 %2994  ;;  %s4304_s6 = scalar_lea.hbm %s4351_s5, %s3210_s16 }
 0xbd4   : > { %2998 = vrot.lane.b32.xlu1 %v2997_v24, %s3788_s23 }
 0xbd5   : > { %v3003_v18 = vpop.permute.xlu0 %3002 }
 0xbd8   : > { %3006 = vrot.lane.b32.xlu1 %v3005_v25, %s3789_s8 }
 0xbd9   : > { %v3011_v33 = vpop.permute.xlu0 %3010 }
 0xbdc   : > { %3014 = vrot.lane.b32.xlu1 %v3013_v61, %s3790_s25 }
 0xc42   : > { %v2990_v27 = vpop.permute.xlu1 %2989 }
 0xc43   : > { %v3017_v4 = vsel %vm266_vm6, %v2982_v36, %v2990_v27  ;;  %vm3028_vm6 = vcmask 516096  }
 0xc44   : > { %v3018_v62 = vsel %vm699_vm12, %v3017_v4, %v2995_v26 }
 0xc46   : > { %v2999_v17 = vpop.permute.xlu1 %2998 }
 0xc47   : > { %v3020_v28 = vsel %vm3019_vm2, %v3018_v62, %v2999_v17 }
 0xc48   : > { %v3021_v30 = vsel %vm2087_vm8, %v3020_v28, %v3003_v18 }
 0xc4a   : > { %v3007_v29 = vpop.permute.xlu1 %3006 }
 0xc4b   : > { %v3023_v32 = vsel %vm3022_vm3, %v3021_v30, %v3007_v29 }
 0xc4c   : > { %v3025_v35 = vsel %vm3024_vm4, %v3023_v32, %v3011_v33 }
 0xc4e   : > { %v3015_v34 = vpop.permute.xlu1 %3014 }
 0xc4f   : > { %v3027_v38 = vsel %vm3026_vm5, %v3025_v35, %v3015_v34 }
 0xc50   : > { %3029 = vst.msk [vmem:[%s216_s30] sm:$0x1] %vm3028_vm6, %v3027_v38 }
 0xc51   : > { %3727 = shalt.err (!%p3724_p3)
}
 0xc52   : > { %s3728_s15 = scalar_lea.hbm %s4304_s6, 16  ;;  %s3732_s8 = scalar_lea.hbm %s4351_s5, 32 }
 0xc53   : > { %p3729_p4 = scmp.ne.s32.totalorder %s4304_s6, %s3728_s15  ;;  %p3733_p9 = scmp.lt.u32.totalorder %s4304_s6, %s4351_s5 }
 0xc54   : > { %p3734_p10 = scmp.lt.u32.totalorder %s3732_s8, %s3728_s15  ;;  %p3736_p12 = scmp.lt.u32.totalorder %s3728_s15, %s4304_s6 }
 0xc55   : > { %p3730_p7 = pnand %p3729_p4, %p3860_p5 }
 0xc56   : > { %p3735_p11 = por %p3734_p10, %p3733_p9 }
 0xc57   : > { %p3731_p8 = pneg %p3730_p7 }
 0xc58   : > { %p3737_p13 = por %p3736_p12, %p3735_p11 }
 0xc5a   : > { %p3738_p0 = pnand %p3737_p13, %p3731_p8 }
 0xc5c   : > { %3741 = shalt.err (!%p3738_p0)
}
 0xc5d   : > { %3650 = dma.vmem_to_hbm [thread:$0]  (%p3860_p5), %s4306_s7, 16, %s4304_s6, %s3031_s22  }
 0xc5e PF: > { %p3656_p1 = scmp.ge.s32.totalorder %s3776_s21, 2  ;;  %s3055_s16 = sand.u32 1, %s3764_s18  }
 0xc5f   : > { %s3056_s30 = scalar_lea.sflag [#allocation4], %s3055_s16 }
 0xc60   : > { %p3653_p2 = pnand %p3656_p1, %p3864_p6 }
 0xc62   : > { %3759 = dma.done.wait (!%p3653_p2), %s3056_s30, 16  }
 0xc63   : > { %3761 = vsyncadd (!%p3653_p2), %s3056_s30, 4294967280  ;;  %p15_p3 = scmp.ge.s32.totalorder %s3847_s24, 4   ;;  %s4354_s18 = smov %s3768_s19 }
 0xc64   : > { %s4355_s19 = smov %s3772_s20  ;;  %s4356_s20 = smov %s3858_s27 }
 0xc65   : > { %s4357_s21 = smov %s3847_s24  ;;  %17 = sbr.rel (!%p15_p3) target bundleno = 3 (0x3), region = 83 }
 0xc6c   :  { %3060 = vsyncpa [#allocation4], 1 }
 0xc6d   :  { %3062 = vsyncpa [#allocation4 + $0x1], 1 }

// kernel: tpu_custom_call.1
= control target key start
LH: loop header
LB: loop body
LE: loop exit
PB: predicated region body
PF: predicated region fallthrough
CT: control target
= control target key end

     0   :  { %10 = vsyncpa [#allocation4], 0  ;;  %s4481_s0 = inlined_call_operand.vmem [shape: f32[2,16,4], index: 0, kind: input, shape index: {}]   ;;  %s4482_s1 = inlined_call_operand.vmem [shape: f32[4,5,16,32], index: 1, kind: input, shape index: {}]   ;;  %s4483_s2 = inlined_call_operand.vmem [shape: f32[4,32], index: 2, kind: input, shape index: {}]   ;;  %s4484_s3 = inlined_call_operand.vmem [shape: f32[4,3,32,16], index: 3, kind: input, shape index: {}]   ;;  %s4485_s4 = inlined_call_operand.vmem [shape: f32[4,16], index: 4, kind: input, shape index: {}]   ;;  %s4486_s5 = inlined_call_operand.hbm [shape: f32[2,1,64], index: 5, kind: output, shape index: {}]  }
   0x1   :  { %12 = vsyncpa [#allocation4 + $0x1], 0  ;;  %s3919_s18 = smov 0   ;;  %s3921_s19 = smov 0  }
   0x2   :  { %s3923_s20 = smov 0   ;;  %s3925_s21 = smov 0  }
   0x3 LB: > { %s3940_s22 = sadd.s32 4294967295, %s3873_s21   ;;  %s3196_s23 = sadd.s32 4294967294, %s3873_s21   ;;  %s3873_s21 = sphi %s3925_s21, %s4492_s21   ;;  %s3869_s20 = sphi %s3923_s20, %s4491_s20   ;;  %s3865_s19 = sphi %s3921_s19, %s4490_s19   ;;  %s3861_s18 = sphi %s3919_s18, %s4489_s18  }
   0x4   : > { %s3944_s24 = sadd.s32 1, %s3873_s21   ;;  %s135_s25 = sadd.s32 1, %s3869_s20 }
   0x5   : > { %s132_s26 = ssub.s32 %s3873_s21, %s3944_s24  ;;  %p145_p0 = scmp.ne.s32.totalorder %s3869_s20, %s3865_s19 }
   0x6   : > { %p133_p1 = scmp.eq.s32.totalorder %s132_s26, 0  ;;  %p146_p2 = scmp.eq.s32.totalorder %s3940_s22, 1 }
   0x7   : > { %p151_p3 = scmp.ne.s32.totalorder %s3865_s19, %s3861_s18  ;;  %p152_p4 = scmp.eq.s32.totalorder %s3196_s23, 1 }
   0x8   : > { %s3955_s27 = scalar_select %p133_p1, %s3869_s20, %s135_s25  }
   0x9   : > { %p3957_p5 = por %p146_p2, %p145_p0  ;;  %p3961_p6 = por %p152_p4, %p151_p3 }
   0xa   : > { %p3199_p7 = scmp.ge.s32.totalorder %s3873_s21, 1  ;;  %p190_p8 = scmp.lt.s32.totalorder %s3873_s21, 3 }
   0xc   : > { %p191_p9 = pnand %p3199_p7, %p190_p8 }
   0xd   : > { %p217_p10 = scmp.lt.s32.totalorder (!%p191_p9), %s3940_s22, 1  ;;  %vm251_vm0 = vcmask (!%p191_p9), 1040384   ;;  %v326_v0 = vld [vmem:[%s4482_s1] sm:$0xff] (!%p191_p9)  ;;  %vm253_vm1 = vcmask (!%p191_p9), 1041408   ;;  %vm255_vm2 = vcmask (!%p191_p9), 1042432   ;;  %vm257_vm3 = vcmask (!%p191_p9), 1043456  }
   0xe   : > { %194 = sbr.rel (%p191_p9) target bundleno = 3181 (0xc6d), region = 40  ;;  %3419 = vmatprep.subr.mxu1 (!%p191_p9), %v326_v0  ;;  %vm259_vm4 = vcmask (!%p191_p9), 1044480   ;;  %vm261_vm5 = vcmask (!%p191_p9), 1045504   ;;  %vm263_vm6 = vcmask (!%p191_p9), 1046528   ;;  %v327_v20 = vld [vmem:[%s4482_s1 + $0x10] sm:$0xff] (!%p191_p9)  ;;  %v328_v21 = vld [vmem:[%s4482_s1 + $0x20] sm:$0xff] (!%p191_p9) }
   0xf   : > { %3420 = vmatpush3.msra.mxu1 (!%p191_p9), %v326_v0  ;;  %3424 = vmatprep.subr.mxu0 (!%p191_p9), %v327_v20  ;;  %s3875_s16 = smov (!%p191_p9), 4   ;;  %vm305_vm7 = vcmask (!%p191_p9), 31744   ;;  %vm337_vm8 = vcmask (!%p191_p9), 64512   ;;  %vm3877_vm9 = vmmov (!%p191_p9), 0   ;;  %vm768_vm12 = vcmask (!%p191_p9), 130048   ;;  %s3881_s8 = smov (!%p191_p9), 120  }
  0x10   : > { %3425 = vmatpush3.msra.mxu0 (!%p191_p9), %v327_v20  ;;  %vm1721_vm15 = vcmask (!%p191_p9), 64544   ;;  %s3882_s14 = smov (!%p191_p9), 16   ;;  %s3883_s15 = smov (!%p191_p9), 32  }
  0x11   : > { %3429 = vmatprep.subr.mxu0 (!%p191_p9), %v328_v21  ;;  %s3884_s17 = smov (!%p191_p9), 48   ;;  %s3885_s23 = smov (!%p191_p9), 24  }
  0x12   : > { %s3887_s25 = smov (!%p191_p9), 56   ;;  %s215_s26 = sand.u32 (!%p191_p9), 1, %s3865_s19  }
  0x13   : > { %s3888_s12 = smov (!%p191_p9), [#allocation3]  }
  0x14   : > { %s3815_s13 = sshll.u32 (!%p191_p9), %s3888_s12, 4  ;;  %s3816_s13 = int_to_ptr.vmem [resolvable:$false] %s3815_s13 }
  0x15   : > { %s218_s30 = scalar_select %p217_p10, %s3940_s22, 1 }
  0x17   : > { %s3310_s6 = sshll.u32 %s218_s30, 4  ;;  %s216_s30 = scalar_lea.vmem [#allocation3], %s215_s26 }
  0x18   : > { %s3972_s9 = scalar_lea.vmem %s4481_s0, %s3310_s6  ;;  %s3879_s6 = smov 124  }
  0x19   : > { %v265_v1 = vld [vmem:[%s3972_s9 + $0x1] sm:$0x1]  ;;  %v266_v2 = vld [vmem:[%s3972_s9 + $0x3] sm:$0x1]  ;;  %v267_v3 = vld [vmem:[%s3972_s9 + $0x5] sm:$0x1] }
  0x1a   : > { %v268_v4 = vld [vmem:[%s3972_s9 + $0x7] sm:$0x1]  ;;  %v269_v5 = vld [vmem:[%s3972_s9 + $0x9] sm:$0x1]  ;;  %v270_v6 = vld [vmem:[%s3972_s9 + $0xb] sm:$0x1] }
  0x1b   : > { %v271_v7 = vld [vmem:[%s3972_s9 + $0xd] sm:$0x1]  ;;  %v274_v8 = vrot.slane %v266_v2, 7  ;;  %v277_v9 = vrot.slane %v267_v3, 6  ;;  %v272_v10 = vld [vmem:[%s3972_s9 + $0xf] sm:$0x1] }
  0x1c   : > { %v280_v11 = vrot.slane %v268_v4, 5  ;;  %v283_v12 = vrot.slane %v269_v5, 4  ;;  %v286_v13 = vrot.slane %v270_v6, 3  ;;  %v289_v15 = vrot.slane %v271_v7, 2  ;;  %v223_v25 = vld [vmem:[%s3972_s9 + $0x2] sm:$0x1] }
  0x1d   : > { %v294_v14 = vsel %vm251_vm0, %v265_v1, %v274_v8  ;;  %v292_v17 = vrot.slane %v272_v10, 1  ;;  %v224_v26 = vld [vmem:[%s3972_s9 + $0x4] sm:$0x1]  ;;  %v231_v27 = vrot.slane %v223_v25, 7  ;;  %v222_v28 = vld [vmem:[%s3972_s9] sm:$0x1] }
  0x1e   : > { %v295_v16 = vsel %vm253_vm1, %v294_v14, %v277_v9  ;;  %v225_v29 = vld [vmem:[%s3972_s9 + $0x6] sm:$0x1]  ;;  %v234_v30 = vrot.slane %v224_v26, 6  ;;  %v226_v32 = vld [vmem:[%s3972_s9 + $0x8] sm:$0x1]  ;;  %v329_v2 = vld [vmem:[%s4482_s1 + $0x30] sm:$0xff] }
  0x1f   : > { %v296_v18 = vsel %vm255_vm2, %v295_v16, %v280_v11  ;;  %v252_v31 = vsel %vm251_vm0, %v222_v28, %v231_v27  ;;  %v237_v33 = vrot.slane %v225_v29, 5  ;;  %v227_v35 = vld [vmem:[%s3972_s9 + $0xa] sm:$0x1]  ;;  %v240_v36 = vrot.slane %v226_v32, 4  ;;  %v228_v38 = vld [vmem:[%s3972_s9 + $0xc] sm:$0x1] }
  0x20   : > { %v297_v19 = vsel %vm257_vm3, %v296_v18, %v283_v12  ;;  %v254_v34 = vsel %vm253_vm1, %v252_v31, %v234_v30  ;;  %v243_v39 = vrot.slane %v227_v35, 3  ;;  %v229_v41 = vld [vmem:[%s3972_s9 + $0xe] sm:$0x1]  ;;  %v246_v42 = vrot.slane %v228_v38, 2  ;;  %v330_v6 = vld [vmem:[%s4482_s1 + $0x40] sm:$0xff]  ;;  %s3141_s7 = sshll.u32 %s216_s30, 4  ;;  %s4441_s7 = int_to_ptr.vmem [resolvable:$true] %s3141_s7 }
  0x21   : > { %v298_v22 = vsel %vm259_vm4, %v297_v19, %v286_v13  ;;  %v256_v37 = vsel %vm255_vm2, %v254_v34, %v237_v33  ;;  %v249_v44 = vrot.slane %v229_v41, 1  ;;  %v331_v11 = vld [vmem:[%s4484_s3] sm:$0xff]  ;;  %v332_v12 = vld [vmem:[%s4484_s3 + $0x8] sm:$0xff]  ;;  %v3876_v14 = vmov 0.0|0.0   ;;  %s3811_s11 = scalar_lea.vmem %s4441_s7, 16  ;;  %p3818_p0 = scmp.lt.s32.totalorder %s4441_s7, %s3816_s13 }
  0x22   : > { %v299_v23 = vsel %vm261_vm5, %v298_v22, %v289_v15  ;;  %v258_v40 = vsel %vm257_vm3, %v256_v37, %v240_v36  ;;  %v3648_v13 = vpack.c.bf16 %v332_v12, %v331_v11  ;;  %3647 = vmatprep.subr.bf16.mxu1 %v3876_v14  ;;  %v3878_v15 = vmov 0.0   ;;  %v3212_v19 = vld [vmem:[%s4483_s2] ss:$0 sm:$0xff]  ;;  %v334_v26 = vld [vmem:[%s4484_s3 + $0x28] sm:$0xff]  ;;  %v3219_v11 = vld [vmem:[%s4482_s1 + $0x70] sm:$0xff]  ;;  %p3812_p11 = scmp.ne.s32.totalorder %s4441_s7, %s3811_s11 }
  0x23   : > { %v3998_v24 = vsel %vm263_vm6, %v299_v23, %v292_v17  ;;  %v260_v43 = vsel %vm259_vm4, %v258_v40, %v243_v39  ;;  %v333_v25 = vld [vmem:[%s4484_s3 + $0x20] sm:$0xff]  ;;  %v336_v33 = vld [vmem:[%s4484_s3 + $0x48] sm:$0xff] }
  0x24   : > { %302 = vrot.lane.b32.xlu0 %v3998_v24, %s3875_s16  ;;  %v262_v45 = vsel %vm261_vm5, %v260_v43, %v246_v42  ;;  %v3651_v30 = vpack.c.bf16 %v334_v26, %v333_v25  ;;  %v335_v32 = vld [vmem:[%s4484_s3 + $0x40] sm:$0xff]  ;;  %p3813_p12 = pnand %p3812_p11, %p3957_p5 }
  0x25   : > { %v4017_v46 = vsel %vm263_vm6, %v262_v45, %v249_v44  ;;  %v3654_v39 = vpack.c.bf16 %v336_v33, %v335_v32 }
  0x26   : > { %p3814_p13 = pneg %p3813_p12 }
  0x96   : > { %v303_v47 = vpop.permute.xlu0 %302 }
  0x97   : > { %v306_v48 = vsel %vm305_vm7, %v4017_v46, %v303_v47 }
  0x98   : > { %v308_v49 = vrot.slane %v306_v48, 7  ;;  %v314_v50 = vrot.slane %v306_v48, 4  ;;  %v310_v51 = vrot.slane %v306_v48, 6  ;;  %v312_v52 = vrot.slane %v306_v48, 5 }
  0x99   : > { %v316_v53 = vrot.slane %v306_v48, 3  ;;  %v318_v55 = vrot.slane %v306_v48, 2 }
  0x9a   : > { %v320_v54 = vsel %vm251_vm0, %v306_v48, %v308_v49  ;;  %v323_v56 = vsel %vm255_vm2, %v312_v52, %v314_v50  ;;  %v3216_v49 = vld [vmem:[%s4485_s4] ss:$0 sm:$0xff] }
  0x9b   : > { %v321_v57 = vsel %vm253_vm1, %v320_v54, %v310_v51  ;;  %v324_v58 = vsel %vm257_vm3, %v323_v56, %v316_v53  ;;  %v3217_v56 = vld [vmem:[%s4482_s1 + $0x50] sm:$0xff] }
  0x9c   : > { %v322_v59 = vsel %vm255_vm2, %v321_v57, %v312_v52  ;;  %v325_v60 = vsel %vm259_vm4, %v324_v58, %v318_v55  ;;  %v3218_v57 = vld [vmem:[%s4482_s1 + $0x60] sm:$0xff] }
  0x9d   : > { %3421 = vmatprep.mubr.msk.f32.mxu1 %vm337_vm8, %v322_v59  ;;  %v419_v61 = vrot.slane %v322_v59, 1  ;;  %v420_v62 = vrot.slane %v325_v60, 1  ;;  %v503_v63 = vrot.slane %v322_v59, 2  ;;  %v504_v0 = vrot.slane %v325_v60, 2 }
  0x9e   : > { %3422 = vmatmul.mubr.msk.f32.vlgmr.msra.gmra.mrb[0].mxu1 %vm337_vm8, %v325_v60  ;;  %v587_v4 = vrot.slane %v322_v59, 3  ;;  %v588_v5 = vrot.slane %v325_v60, 3  ;;  %v671_v8 = vrot.slane %v322_v59, 4  ;;  %v672_v9 = vrot.slane %v325_v60, 4 }
  0x9f   : > { %v421_v1 = vsel %vm263_vm6, %v419_v61, %v420_v62  ;;  %v505_v3 = vsel %vm261_vm5, %v503_v63, %v504_v0  ;;  %3649 = vmatpush3.bf16.msra.mxu1 %v3648_v13  ;;  %3448 = vmatprep.mubr.msk.f32.mxu1 %vm3877_vm9, %v3878_v15 }
  0xa0   : > { %3426 = vmatprep.mubr.msk.f32.mxu0 %vm337_vm8, %v421_v1  ;;  %v589_v7 = vsel %vm259_vm4, %v587_v4, %v588_v5  ;;  %v673_v10 = vsel %vm257_vm3, %v671_v8, %v672_v9  ;;  %3650 = vmatprep.subr.bf16.mxu1 %v3876_v14 }
  0xa1   : > { %3427 = vmatmul.mubr.msk.f32.vlgmr.msra.gmra.mrb[0].mxu0 %vm337_vm8, %v420_v62 }
  0xa2   : > { %3430 = vmatpush3.msra.mxu0 %v328_v21  ;;  %3431 = vmatprep.mubr.msk.f32.mxu0 %vm337_vm8, %v505_v3 }
  0xa3   : > { %3434 = vmatprep.subr.mxu0 %v329_v2 }
  0xa9   : > { %3432 = vmatmul.mubr.msk.f32.vlgmr.msra.gmra.mrb[0].mxu0 %vm337_vm8, %v504_v0 }
  0xaa   : > { %3435 = vmatpush3.msra.mxu0 %v329_v2  ;;  %3436 = vmatprep.mubr.msk.f32.mxu0 %vm337_vm8, %v589_v7 }
  0xab   : > { %3439 = vmatprep.subr.mxu0 %v330_v6 }
  0xb1   : > { %3437 = vmatmul.mubr.msk.f32.vlgmr.msra.gmra.mrb[0].mxu0 %vm337_vm8, %v588_v5 }
  0xb2   : > { %3440 = vmatpush3.msra.mxu0 %v330_v6  ;;  %3441 = vmatprep.mubr.msk.f32.mxu0 %vm337_vm8, %v673_v10 }
  0xb3   : > { %3656 = vmatprep.subr.bf16.mxu0 %v3876_v14 }
  0xb9   : > { %3442 = vmatmul.mubr.msk.f32.vlgmr.msra.gmra.mrb[0].mxu0 %vm337_vm8, %v672_v9 }
  0xba   : > { %3494 = vmatprep.mubr.msk.f32.mxu0 %vm3877_vm9, %v3878_v15 }
 0x171   : > { %v3423_v16 = vpop.f32.mrb[0].mxu1 }
 0x172   : > { %v410_v17 = vpop.f32.mrb[1].mxu1 }
 0x18c   : > { %v3443_v18 = vpop.f32.mrb[0].mxu0 }
 0x18d   : > { %v3731_v20 = vadd.f32 %v3443_v18, %v3423_v16  ;;  %v744_v21 = vpop.f32.mrb[1].mxu0 }
 0x18e   : > { %v3732_v22 = vadd.f32 %v744_v21, %v410_v17  ;;  %v3220_v17 = vld [vmem:[%s4482_s1 + $0x80] sm:$0xff]  ;;  %v3221_v21 = vld [vmem:[%s4482_s1 + $0x90] sm:$0xff] }
 0x18f   : > { %v761_v23 = vadd.f32 %v3731_v20, %v3212_v19 }
 0x190   : > { %v760_v27 = vadd.f32 %v3732_v22, %v3212_v19 }
 0x191   : > { %vm763_vm10 = vcmp.gt.f32.partialorder %v761_v23, 0.0  ;;  %v765_v28 = vmul.f32 0.01, %v761_v23 }
 0x192   : > { %vm762_vm11 = vcmp.gt.f32.partialorder %v760_v27, 0.0  ;;  %v764_v29 = vmul.f32 0.01, %v760_v27 }
 0x193   : > { %v767_v31 = vsel %vm763_vm10, %v761_v23, %v765_v28  ;;  %v3223_v28 = vld [vmem:[%s4484_s3 + $0x68] sm:$0xff] }
 0x194   : > { %v844_v34 = vrot.slane %v767_v31, 1  ;;  %v920_v35 = vrot.slane %v767_v31, 2  ;;  %v766_v36 = vsel %vm762_vm11, %v760_v27, %v764_v29  ;;  %v3222_v27 = vld [vmem:[%s4484_s3 + $0x60] sm:$0xff] }
 0x195   : > { %3449 = vmatmul.mubr.msk.f32.vlgmr.msra.gmra.mrb[2].mxu1 %vm768_vm12, %v766_v36  ;;  %v843_v37 = vrot.slane %v766_v36, 1  ;;  %v919_v38 = vrot.slane %v766_v36, 2  ;;  %v3657_v29 = vpack.c.bf16 %v3223_v28, %v3222_v27 }
 0x196   : > { %3652 = vmatpush3.bf16.msra.mxu1 %v3651_v30  ;;  %3455 = vmatprep.mubr.msk.f32.mxu1 %vm3877_vm9, %v3878_v15  ;;  %v3238_v30 = vld [vmem:[%s4483_s2 + $0x1] ss:$0 sm:$0xff] }
 0x197   : > { %3653 = vmatprep.subr.bf16.mxu1 %v3876_v14  ;;  %v845_v40 = vsel %vm263_vm6, %v843_v37, %v844_v34  ;;  %v921_v41 = vsel %vm261_vm5, %v919_v38, %v920_v35  ;;  %3658 = vmatpush3.bf16.msra.mxu0 %v3657_v29  ;;  %v3224_v34 = vld [vmem:[%s4484_s3 + $0x80] sm:$0xff]  ;;  %v3225_v35 = vld [vmem:[%s4484_s3 + $0x88] sm:$0xff] }
 0x198   : > { %3659 = vmatprep.subr.bf16.mxu0 %v3876_v14 }
 0x199   : > { %3456 = vmatmul.mubr.msk.f32.vlgmr.msra.gmra.mrb[4].mxu1 %vm768_vm12, %v845_v40 }
 0x19a   : > { %3655 = vmatpush3.bf16.msra.mxu1 %v3654_v39  ;;  %3462 = vmatprep.mubr.msk.f32.mxu1 %vm3877_vm9, %v3878_v15  ;;  %v3660_v39 = vpack.c.bf16 %v3225_v35, %v3224_v34  ;;  %v3247_v34 = vld [vmem:[%s4482_s1 + $0xc0] sm:$0xff]  ;;  %v3248_v35 = vld [vmem:[%s4482_s1 + $0xc8] sm:$0xff] }
 0x19b   : > { %3465 = vmatprep.subr.mxu1 %v3217_v56 }
 0x19d   : > { %3463 = vmatmul.mubr.msk.f32.vlgmr.msra.gmra.mrb[6].mxu1 %vm768_vm12, %v921_v41  ;;  %v3226_v41 = vld [vmem:[%s4484_s3 + $0xa0] sm:$0xff] }
 0x19e   : > { %3466 = vmatpush3.msra.mxu1 %v3217_v56 }
 0x19f   : > { %3470 = vmatprep.subr.mxu1 %v3218_v57 }
 0x268   : > { %v838_v42 = vpop.f32.mrb[2].mxu1 }
 0x269   : > { %v3450_v43 = vpop.f32.mrb[3].mxu1 }
 0x26c   : > { %v914_v44 = vpop.f32.mrb[4].mxu1 }
 0x26d   : > { %v918_v45 = vadd.f32 %v914_v44, %v838_v42  ;;  %v3457_v47 = vpop.f32.mrb[5].mxu1  ;;  %v3227_v42 = vld [vmem:[%s4484_s3 + $0xa8] sm:$0xff] }
 0x270   : > { %v990_v48 = vpop.f32.mrb[6].mxu1 }
 0x271   : > { %v994_v50 = vadd.f32 %v990_v48, %v918_v45  ;;  %v3464_v51 = vpop.f32.mrb[7].mxu1 }
 0x273   : > { %v1000_v52 = vadd.f32 %v3216_v49, %v994_v50  ;;  %v3663_v49 = vpack.c.bf16 %v3227_v42, %v3226_v41  ;;  %v3250_v41 = vld [vmem:[%s4482_s1 + $0xd8] sm:$0xff] }
 0x275   : > { %3799 = vtanh.f32 %v1000_v52 }
 0x27f   : > { %v3800_v53 = vpop.eup %3799 }
 0x280   : > { %v1002_v54 = vmul.f32 1.442695, %v3800_v53 }
 0x282   : > { %3801 = vpow2.f32 %v1002_v54 }
 0x28c   : > { %v3802_v55 = vpop.eup %3801 }
 0x28d   : > { %1006 = vrot.lane.b32.xlu0 %v3802_v55, %s3879_s6  ;;  %v4101_v60 = vmul.f32 %v3802_v55, %v3998_v24 }
 0x2ff   : > { %v1007_v58 = vpop.permute.xlu0 %1006 }
 0x300   : > { %v4096_v59 = vmul.f32 %v1007_v58, %v4017_v46  ;;  %v3242_v58 = vld [vmem:[%s4485_s4 + $0x1] ss:$0 sm:$0xff] }
 0x302   : > { %1011 = vrot.lane.b32.xlu1 %v4096_v59, %s3875_s16 }
 0x374   : > { %v1012_v61 = vpop.permute.xlu1 %1011 }
 0x375   : > { %v1014_v62 = vsel %vm305_vm7, %v4101_v60, %v1012_v61 }
 0x376   : > { %v1016_v63 = vrot.slane %v1014_v62, 7  ;;  %v1022_v0 = vrot.slane %v1014_v62, 4  ;;  %v1018_v1 = vrot.slane %v1014_v62, 6  ;;  %v1020_v2 = vrot.slane %v1014_v62, 5 }
 0x377   : > { %v1024_v3 = vrot.slane %v1014_v62, 3  ;;  %v1026_v5 = vrot.slane %v1014_v62, 2 }
 0x378   : > { %v1028_v4 = vsel %vm251_vm0, %v1014_v62, %v1016_v63  ;;  %v1031_v46 = vsel %vm255_vm2, %v1020_v2, %v1022_v0 }
 0x379   : > { %v1029_v6 = vsel %vm253_vm1, %v1028_v4, %v1018_v1  ;;  %v1032_v7 = vsel %vm257_vm3, %v1031_v46, %v1024_v3  ;;  %v3244_v46 = vld [vmem:[%s4482_s1 + $0xa8] sm:$0xff] }
 0x37a   : > { %v1030_v24 = vsel %vm255_vm2, %v1029_v6, %v1020_v2  ;;  %v1033_v8 = vsel %vm259_vm4, %v1032_v7, %v1026_v5  ;;  %v3243_v5 = vld [vmem:[%s4482_s1 + $0xa0] sm:$0xff] }
 0x37b   : > { %3467 = vmatprep.mubr.msk.f32.mxu1 %vm337_vm8, %v1030_v24  ;;  %v1128_v9 = vrot.slane %v1030_v24, 1  ;;  %v1129_v10 = vrot.slane %v1033_v8, 1  ;;  %v1212_v13 = vrot.slane %v1030_v24, 2  ;;  %v1213_v16 = vrot.slane %v1033_v8, 2 }
 0x37c   : > { %3468 = vmatmul.mubr.msk.f32.vlgmr.msra.gmra.mrb[8].mxu1 %vm337_vm8, %v1033_v8  ;;  %v1296_v19 = vrot.slane %v1030_v24, 3  ;;  %v1297_v20 = vrot.slane %v1033_v8, 3  ;;  %v1380_v23 = vrot.slane %v1030_v24, 4  ;;  %v1381_v25 = vrot.slane %v1033_v8, 4 }
 0x37d   : > { %3471 = vmatpush3.msra.mxu1 %v3218_v57  ;;  %v1130_v12 = vsel %vm263_vm6, %v1128_v9, %v1129_v10  ;;  %v1214_v18 = vsel %vm261_vm5, %v1212_v13, %v1213_v16  ;;  %v3666_v6 = vpack.c.bf16 %v3244_v46, %v3243_v5  ;;  %v3255_v5 = vld [vmem:[%s4484_s3 + $0xd0] sm:$0xff]  ;;  %v3256_v46 = vld [vmem:[%s4484_s3 + $0xd8] sm:$0xff] }
 0x37e   : > { %3472 = vmatprep.mubr.msk.f32.mxu1 %vm337_vm8, %v1130_v12  ;;  %3475 = vmatprep.subr.mxu1 %v3219_v11  ;;  %v1298_v22 = vsel %vm259_vm4, %v1296_v19, %v1297_v20  ;;  %v1382_v26 = vsel %vm257_vm3, %v1380_v23, %v1381_v25 }
 0x384   : > { %3473 = vmatmul.mubr.msk.f32.vlgmr.msra.gmra.mrb[8].mxu1 %vm337_vm8, %v1129_v10 }
 0x385   : > { %3476 = vmatpush3.msra.mxu1 %v3219_v11  ;;  %3477 = vmatprep.mubr.msk.f32.mxu1 %vm337_vm8, %v1214_v18 }
 0x386   : > { %3480 = vmatprep.subr.mxu1 %v3220_v17 }
 0x38c   : > { %3478 = vmatmul.mubr.msk.f32.vlgmr.msra.gmra.mrb[8].mxu1 %vm337_vm8, %v1213_v16 }
 0x38d   : > { %3481 = vmatpush3.msra.mxu1 %v3220_v17  ;;  %3482 = vmatprep.mubr.msk.f32.mxu1 %vm337_vm8, %v1298_v22 }
 0x38e   : > { %3485 = vmatprep.subr.mxu1 %v3221_v21 }
 0x394   : > { %3483 = vmatmul.mubr.msk.f32.vlgmr.msra.gmra.mrb[8].mxu1 %vm337_vm8, %v1297_v20 }
 0x395   : > { %3486 = vmatpush3.msra.mxu1 %v3221_v21  ;;  %3487 = vmatprep.mubr.msk.f32.mxu1 %vm337_vm8, %v1382_v26 }
 0x396   : > { %3668 = vmatprep.subr.bf16.mxu1 %v3876_v14 }
 0x39c   : > { %3488 = vmatmul.mubr.msk.f32.vlgmr.msra.gmra.mrb[8].mxu1 %vm337_vm8, %v1381_v25 }
 0x39d   : > { %3522 = vmatprep.mubr.msk.f32.mxu1 %vm3877_vm9, %v3878_v15 }
 0x46f   : > { %v3489_v31 = vpop.f32.mrb[8].mxu1 }
 0x470   : > { %v1470_v32 = vadd.f32 %v3489_v31, %v3238_v30  ;;  %v1453_v33 = vpop.f32.mrb[9].mxu1 }
 0x471   : > { %v1469_v36 = vadd.f32 %v3238_v30, %v1453_v33 }
 0x472   : > { %vm1472_vm13 = vcmp.gt.f32.partialorder %v1470_v32, 0.0  ;;  %v1474_v37 = vmul.f32 0.01, %v1470_v32 }
 0x473   : > { %vm1471_vm14 = vcmp.gt.f32.partialorder %v1469_v36, 0.0  ;;  %v1473_v38 = vmul.f32 0.01, %v1469_v36 }
 0x474   : > { %v1476_v40 = vsel %vm1472_vm13, %v1470_v32, %v1474_v37 }
 0x475   : > { %v1552_v43 = vrot.slane %v1476_v40, 1  ;;  %v1628_v44 = vrot.slane %v1476_v40, 2  ;;  %v1475_v45 = vsel %vm1471_vm14, %v1469_v36, %v1473_v38  ;;  %v3249_v40 = vld [vmem:[%s4482_s1 + $0xd0] sm:$0xff] }
 0x476   : > { %v1551_v47 = vrot.slane %v1475_v45, 1  ;;  %v1627_v48 = vrot.slane %v1475_v45, 2  ;;  %3495 = vmatmul.mubr.msk.f32.vlgmr.msra.gmra.mrb[2].mxu0 %vm768_vm12, %v1475_v45 }
 0x477   : > { %3661 = vmatpush3.bf16.msra.mxu0 %v3660_v39  ;;  %3501 = vmatprep.mubr.msk.f32.mxu0 %vm3877_vm9, %v3878_v15 }
 0x478   : > { %3662 = vmatprep.subr.bf16.mxu0 %v3876_v14  ;;  %v1553_v50 = vsel %vm263_vm6, %v1551_v47, %v1552_v43  ;;  %v1629_v51 = vsel %vm261_vm5, %v1627_v48, %v1628_v44  ;;  %v3672_v44 = vpack.c.bf16 %v3248_v35, %v3247_v34  ;;  %v3251_v47 = vld [vmem:[%s4482_s1 + $0xe0] sm:$0xff]  ;;  %v3252_v48 = vld [vmem:[%s4482_s1 + $0xe8] sm:$0xff] }
 0x47a   : > { %3502 = vmatmul.mubr.msk.f32.vlgmr.msra.gmra.mrb[4].mxu0 %vm768_vm12, %v1553_v50  ;;  %v3675_v50 = vpack.c.bf16 %v3250_v41, %v3249_v40 }
 0x47b   : > { %3664 = vmatpush3.bf16.msra.mxu0 %v3663_v49  ;;  %3508 = vmatprep.mubr.msk.f32.mxu0 %vm3877_vm9, %v3878_v15 }
 0x47c   : > { %3665 = vmatprep.subr.bf16.mxu0 %v3876_v14 }
 0x47e   : > { %3509 = vmatmul.mubr.msk.f32.vlgmr.msra.gmra.mrb[6].mxu0 %vm768_vm12, %v1629_v51 }
 0x47f   : > { %3515 = vmatprep.mubr.msk.f32.mxu0 %vm3877_vm9, %v3878_v15  ;;  %3667 = vmatpush3.bf16.msra.mxu0 %v3666_v6  ;;  %v3259_v6 = vld [vmem:[%s4484_s3 + $0xf0] sm:$0xff] }
 0x480   : > { %3671 = vmatprep.subr.bf16.mxu0 %v3876_v14 }
 0x549   : > { %v1546_v52 = vpop.f32.mrb[2].mxu0 }
 0x54a   : > { %v3496_v53 = vpop.f32.mrb[3].mxu0 }
 0x54b   : > { %v3678_v53 = vpack.c.bf16 %v3252_v48, %v3251_v47 }
 0x54d   : > { %v1622_v54 = vpop.f32.mrb[4].mxu0 }
 0x54e   : > { %v1626_v55 = vadd.f32 %v1622_v54, %v1546_v52  ;;  %v3503_v56 = vpop.f32.mrb[5].mxu0 }
 0x551   : > { %v1698_v57 = vpop.f32.mrb[6].mxu0 }
 0x552   : > { %v1702_v61 = vadd.f32 %v1698_v57, %v1626_v55  ;;  %v3510_v62 = vpop.f32.mrb[7].mxu0 }
 0x554   : > { %v1708_v63 = vadd.f32 %v3242_v58, %v1702_v61 }
 0x556   : > { %3803 = vtanh.f32 %v1708_v63  ;;  %v3253_v63 = vld [vmem:[%s4484_s3 + $0xc0] sm:$0xff] }
 0x560   : > { %v3804_v0 = vpop.eup %3803 }
 0x561   : > { %1712 = vrot.lane.b32.xlu1 %v3804_v0, %s3879_s6  ;;  %v1710_v1 = vadd.f32 %v3804_v0, %v4096_v59  ;;  %v3245_v59 = vld [vmem:[%s4482_s1 + $0xb0] sm:$0xff]  ;;  %v3254_v0 = vld [vmem:[%s4484_s3 + $0xc8] sm:$0xff] }
 0x563   : > { %1716 = vst.msk [vmem:[#allocation2] sm:$0xff] %vm305_vm7, %v1710_v1  ;;  %v3681_v1 = vpack.c.bf16 %v3254_v0, %v3253_v63  ;;  %vm2185_vm7 = vcmask 261120  }
 0x5d3   : > { %v1713_v2 = vpop.permute.xlu1 %1712 }
 0x5d4   : > { %v1715_v3 = vsub.f32 %v4101_v60, %v1713_v2  ;;  %v3246_v60 = vld [vmem:[%s4482_s1 + $0xb8] sm:$0xff]  ;;  %v3257_v2 = vld [vmem:[%s4484_s3 + $0xe0] sm:$0xff] }
 0x5d5   : > { %v3669_v7 = vpack.c.bf16 %v3246_v60, %v3245_v59  ;;  %v3684_v59 = vpack.c.bf16 %v3256_v46, %v3255_v5  ;;  %v3260_v60 = vld [vmem:[%s4484_s3 + $0xf8] sm:$0xff] }
 0x5d6   : > { %1718 = vrot.lane.b32.xlu0 %v1715_v3, %s3875_s16  ;;  %s3880_s16 = smov 8   ;;  %v3258_v3 = vld [vmem:[%s4484_s3 + $0xe8] sm:$0xff] }
 0x5d7   : > { %3670 = vmatpush3.bf16.msra.mxu1 %v3669_v7  ;;  %v3690_v7 = vpack.c.bf16 %v3260_v60, %v3259_v6  ;;  %v3284_v6 = vld [vmem:[%s4482_s1 + $0x138] sm:$0xff] }
 0x5d8   : > { %3674 = vmatprep.subr.bf16.mxu1 %v3876_v14 }
 0x648   : > { %v1719_v4 = vpop.permute.xlu0 %1718 }
 0x649   : > { %1722 = vst.msk [vmem:[#allocation2] sm:$0xff] %vm1721_vm15, %v1719_v4  ;;  %v3687_v4 = vpack.c.bf16 %v3258_v3, %v3257_v2  ;;  %v3277_v3 = vld [vmem:[%s4482_s1 + $0x100] sm:$0xff] }
 0x650   : > { %v1740_v24 = vld [vmem:[#allocation2 + $0x3] sm:$0x1]  ;;  %v1741_v8 = vld [vmem:[#allocation2 + $0x5] sm:$0x1]  ;;  %v1742_v9 = vld [vmem:[#allocation2 + $0x7] sm:$0x1] }
 0x651   : > { %v1744_v10 = vrot.slane %v1740_v24, 7  ;;  %v1747_v11 = vrot.slane %v1741_v8, 6  ;;  %v1739_v12 = vld [vmem:[#allocation2 + $0x1] sm:$0x1]  ;;  %v1750_v13 = vrot.slane %v1742_v9, 5 }
 0x652   : > { %v1724_v19 = vld [vmem:[#allocation2 + $0x2] sm:$0x1]  ;;  %v1725_v20 = vld [vmem:[#allocation2 + $0x4] sm:$0x1]  ;;  %v1723_v22 = vld [vmem:[#allocation2] sm:$0x1] }
 0x653   : > { %v1752_v16 = vsel %vm251_vm0, %v1739_v12, %v1744_v10  ;;  %v1728_v21 = vrot.slane %v1724_v19, 7  ;;  %v1731_v23 = vrot.slane %v1725_v20, 6  ;;  %v1726_v26 = vld [vmem:[#allocation2 + $0x6] sm:$0x1] }
 0x654   : > { %v1753_v17 = vsel %vm253_vm1, %v1752_v16, %v1747_v11  ;;  %v1734_v28 = vrot.slane %v1726_v26, 5  ;;  %v3261_v26 = vld [vmem:[%s4484_s3 + $0x100] sm:$0xff] }
 0x655   : > { %v4197_v18 = vsel %vm255_vm2, %v1753_v17, %v1750_v13  ;;  %v1736_v25 = vsel %vm251_vm0, %v1723_v22, %v1728_v21  ;;  %v3270_v22 = vld [vmem:[%s4483_s2 + $0x2] ss:$0 sm:$0xff] }
 0x656   : > { %1756 = vrot.lane.b32.xlu1 %v4197_v18, %s3880_s16  ;;  %v1737_v27 = vsel %vm253_vm1, %v1736_v25, %v1731_v23 }
 0x657   : > { %v4204_v30 = vsel %vm255_vm2, %v1737_v27, %v1734_v28  ;;  %v3262_v27 = vld [vmem:[%s4484_s3 + $0x108] sm:$0xff] }
 0x6c8   : > { %v1757_v29 = vpop.permute.xlu1 %1756 }
 0x6c9   : > { %v1759_v31 = vsel %vm337_vm8, %v4204_v30, %v1757_v29 }
 0x6ca   : > { %v1761_v32 = vrot.slane %v1759_v31, 7  ;;  %v1763_v33 = vrot.slane %v1759_v31, 6  ;;  %v1769_v36 = vrot.slane %v1759_v31, 3  ;;  %v1771_v37 = vrot.slane %v1759_v31, 2 }
 0x6cb   : > { %v1765_v38 = vrot.slane %v1759_v31, 5  ;;  %v1767_v42 = vrot.slane %v1759_v31, 4 }
 0x6cc   : > { %v1773_v39 = vsel %vm251_vm0, %v1759_v31, %v1761_v32  ;;  %v1777_v52 = vsel %vm251_vm0, %v1769_v36, %v1771_v37  ;;  %v3693_v31 = vpack.c.bf16 %v3262_v27, %v3261_v26  ;;  %v3263_v32 = vld [vmem:[%s4484_s3 + $0x110] sm:$0xff]  ;;  %v3285_v27 = vld [vmem:[%s4484_s3 + $0x120] sm:$0xff] }
 0x6cd   : > { %v1774_v43 = vsel %vm253_vm1, %v1773_v39, %v1763_v33  ;;  %v2025_v56 = vrot.slane %v1777_v52, 3  ;;  %v2101_v61 = vrot.slane %v1777_v52, 4  ;;  %v3264_v33 = vld [vmem:[%s4484_s3 + $0x118] sm:$0xff]  ;;  %v3275_v52 = vld [vmem:[%s4482_s1 + $0xf0] sm:$0xff] }
 0x6ce   : > { %v1775_v45 = vsel %vm255_vm2, %v1774_v43, %v1765_v38  ;;  %v3696_v36 = vpack.c.bf16 %v3264_v33, %v3263_v32  ;;  %v3290_v32 = vld [vmem:[%s4484_s3 + $0x148] sm:$0xff] }
 0x6cf   : > { %v1776_v49 = vsel %vm263_vm6, %v1775_v45, %v1767_v42 }
 0x6d0   : > { %3516 = vmatmul.mubr.msk.f32.vlgmr.msra.gmra.mrb[8].mxu0 %vm768_vm12, %v1776_v49  ;;  %v1875_v51 = vrot.slane %v1776_v49, 1  ;;  %v2024_v54 = vrot.slane %v1776_v49, 3  ;;  %v1949_v55 = vrot.slane %v1776_v49, 2  ;;  %v2100_v57 = vrot.slane %v1776_v49, 4 }
 0x6d1   : > { %3673 = vmatpush3.bf16.msra.mxu0 %v3672_v44  ;;  %3529 = vmatprep.mubr.msk.f32.mxu0 %vm3877_vm9, %v3878_v15  ;;  %v3274_v44 = vld [vmem:[%s4485_s4 + $0x2] ss:$0 sm:$0xff] }
 0x6d2   : > { %3523 = vmatmul.mubr.msk.f32.vlgmr.msra.gmra.mrb[10].mxu1 %vm768_vm12, %v1875_v51  ;;  %3677 = vmatprep.subr.bf16.mxu0 %v3876_v14  ;;  %v2026_v58 = vsel %vm259_vm4, %v2024_v54, %v2025_v56  ;;  %v2102_v62 = vsel %vm257_vm3, %v2100_v57, %v2101_v61  ;;  %v3279_v54 = vld [vmem:[%s4482_s1 + $0x110] sm:$0xff]  ;;  %v3280_v56 = vld [vmem:[%s4482_s1 + $0x118] sm:$0xff] }
 0x6d3   : > { %3676 = vmatpush3.bf16.msra.mxu1 %v3675_v50  ;;  %3536 = vmatprep.mubr.msk.f32.mxu1 %vm3877_vm9, %v3878_v15  ;;  %v3705_v57 = vpack.c.bf16 %v3280_v56, %v3279_v54  ;;  %v3302_v54 = vld [vmem:[%s4483_s2 + $0x3] ss:$0 sm:$0xff] }
 0x6d4   : > { %3530 = vmatmul.mubr.msk.f32.vlgmr.msra.gmra.mrb[10].mxu0 %vm768_vm12, %v1949_v55  ;;  %3680 = vmatprep.subr.bf16.mxu1 %v3876_v14  ;;  %v3293_v56 = vld [vmem:[%s4484_s3 + $0x160] sm:$0xff] }
 0x6d5   : > { %3679 = vmatpush3.bf16.msra.mxu0 %v3678_v53  ;;  %3543 = vmatprep.mubr.msk.f32.mxu0 %vm3877_vm9, %v3878_v15  ;;  %v3276_v53 = vld [vmem:[%s4482_s1 + $0xf8] sm:$0xff] }
 0x6d6   : > { %3537 = vmatmul.mubr.msk.f32.vlgmr.msra.gmra.mrb[12].mxu1 %vm768_vm12, %v2026_v58  ;;  %3686 = vmatprep.subr.bf16.mxu0 %v3876_v14  ;;  %v3699_v55 = vpack.c.bf16 %v3276_v53, %v3275_v52 }
 0x6d7   : > { %3554 = vmatprep.mubr.msk.f32.mxu1 %vm3877_vm9, %v3878_v15  ;;  %3682 = vmatpush3.bf16.msra.mxu1 %v3681_v1 }
 0x6d8   : > { %3544 = vmatmul.mubr.msk.f32.vlgmr.msra.gmra.mrb[12].mxu0 %vm768_vm12, %v2102_v62  ;;  %3683 = vmatprep.subr.bf16.mxu1 %v3876_v14 }
 0x6d9   : > { %3565 = vmatprep.mubr.msk.f32.mxu0 %vm3877_vm9, %v3878_v15  ;;  %3688 = vmatpush3.bf16.msra.mxu0 %v3687_v4 }
 0x6da   : > { %3689 = vmatprep.subr.bf16.mxu0 %v3876_v14 }
 0x6db   : > { %3685 = vmatpush3.bf16.msra.mxu1 %v3684_v59  ;;  %v3283_v59 = vld [vmem:[%s4482_s1 + $0x130] sm:$0xff] }
 0x6dc   : > { %3692 = vmatprep.subr.bf16.mxu1 %v3876_v14 }
 0x6dd   : > { %3691 = vmatpush3.bf16.msra.mxu0 %v3690_v7 }
 0x6de   : > { %3698 = vmatprep.subr.bf16.mxu0 %v3876_v14 }
 0x7a3   : > { %v1871_v24 = vpop.f32.mrb[8].mxu0 }
 0x7a4   : > { %v3517_v8 = vpop.f32.mrb[9].mxu0 }
 0x7a5   : > { %v1944_v9 = vpop.f32.mrb[10].mxu1 }
 0x7a6   : > { %v1948_v10 = vadd.f32 %v1944_v9, %v1871_v24  ;;  %v3524_v11 = vpop.f32.mrb[11].mxu1  ;;  %v3281_v9 = vld [vmem:[%s4482_s1 + $0x120] sm:$0xff] }
 0x7a7   : > { %v2018_v12 = vpop.f32.mrb[10].mxu0 }
 0x7a8   : > { %v2022_v13 = vadd.f32 %v2018_v12, %v1948_v10  ;;  %v3531_v16 = vpop.f32.mrb[11].mxu0  ;;  %v3282_v10 = vld [vmem:[%s4482_s1 + $0x128] sm:$0xff]  ;;  %v3711_v12 = vpack.c.bf16 %v3284_v6, %v3283_v59 }
 0x7a9   : > { %v2095_v17 = vpop.f32.mrb[12].mxu1 }
 0x7aa   : > { %v2099_v19 = vadd.f32 %v2095_v17, %v2022_v13  ;;  %v3538_v20 = vpop.f32.mrb[13].mxu1  ;;  %v3708_v17 = vpack.c.bf16 %v3282_v10, %v3281_v9 }
 0x7ab   : > { %v2171_v21 = vpop.f32.mrb[12].mxu0 }
 0x7ac   : > { %v2175_v23 = vadd.f32 %v2171_v21, %v2099_v19  ;;  %v3545_v25 = vpop.f32.mrb[13].mxu0 }
 0x7ae   : > { %v2181_v28 = vadd.f32 %v3270_v22, %v2175_v23 }
 0x7b0   : > { %vm2182_vm5 = vcmp.gt.f32.partialorder %v2181_v28, 0.0  ;;  %v2183_v29 = vmul.f32 0.01, %v2181_v28 }
 0x7b2   : > { %v2184_v34 = vsel %vm2182_vm5, %v2181_v28, %v2183_v29  ;;  %v3286_v28 = vld [vmem:[%s4484_s3 + $0x128] sm:$0xff] }
 0x7b3   : > { %3555 = vmatmul.mubr.msk.f32.vlgmr.msra.gmra.mrb[14].mxu1 %vm2185_vm7, %v2184_v34  ;;  %v2259_v35 = vrot.slane %v2184_v34, 1  ;;  %v2333_v37 = vrot.slane %v2184_v34, 2  ;;  %v3714_v29 = vpack.c.bf16 %v3286_v28, %v3285_v27  ;;  %v3287_v34 = vld [vmem:[%s4484_s3 + $0x130] sm:$0xff] }
 0x7b4   : > { %3694 = vmatpush3.bf16.msra.mxu1 %v3693_v31  ;;  %3576 = vmatprep.mubr.msk.f32.mxu1 %vm3877_vm9, %v3878_v15  ;;  %v3289_v31 = vld [vmem:[%s4484_s3 + $0x140] sm:$0xff] }
 0x7b5   : > { %3566 = vmatmul.mubr.msk.f32.vlgmr.msra.gmra.mrb[14].mxu0 %vm2185_vm7, %v2259_v35  ;;  %3695 = vmatprep.subr.bf16.mxu1 %v3876_v14  ;;  %v3720_v33 = vpack.c.bf16 %v3290_v32, %v3289_v31  ;;  %v3288_v35 = vld [vmem:[%s4484_s3 + $0x138] sm:$0xff] }
 0x7b6   : > { %3583 = vmatprep.mubr.msk.f32.mxu0 %vm3877_vm9, %v3878_v15  ;;  %3700 = vmatpush3.bf16.msra.mxu0 %v3699_v55 }
 0x7b7   : > { %3701 = vmatprep.subr.bf16.mxu0 %v3876_v14 }
 0x7b8   : > { %3697 = vmatpush3.bf16.msra.mxu1 %v3696_v36  ;;  %v3717_v36 = vpack.c.bf16 %v3288_v35, %v3287_v34 }
 0x7b9   : > { %3704 = vmatprep.subr.bf16.mxu1 %v3876_v14 }
 0x7bb   : > { %3577 = vmatmul.mubr.msk.f32.vlgmr.msra.gmra.mrb[16].mxu1 %vm2185_vm7, %v2333_v37  ;;  %v3291_v37 = vld [vmem:[%s4484_s3 + $0x150] sm:$0xff] }
 0x7bc   : > { %3597 = vmatprep.mubr.msk.f32.mxu1 %vm3877_vm9, %v3878_v15  ;;  %3706 = vmatpush3.bf16.msra.mxu1 %v3705_v57  ;;  %v3294_v57 = vld [vmem:[%s4484_s3 + $0x168] sm:$0xff] }
 0x7bd   : > { %3710 = vmatprep.subr.bf16.mxu1 %v3876_v14 }
 0x886   : > { %v2255_v38 = vpop.f32.mrb[14].mxu1 }
 0x887   : > { %v3556_v39 = vpop.f32.mrb[15].mxu1 }
 0x888   : > { %v2328_v40 = vpop.f32.mrb[14].mxu0 }
 0x889   : > { %v2332_v41 = vadd.f32 %v2328_v40, %v2255_v38  ;;  %v3567_v42 = vpop.f32.mrb[15].mxu0  ;;  %v3292_v38 = vld [vmem:[%s4484_s3 + $0x158] sm:$0xff] }
 0x88a   : > { %v3723_v39 = vpack.c.bf16 %v3292_v38, %v3291_v37 }
 0x88e   : > { %v2402_v43 = vpop.f32.mrb[16].mxu1 }
 0x88f   : > { %v2406_v45 = vadd.f32 %v2402_v43, %v2332_v41  ;;  %v3578_v47 = vpop.f32.mrb[17].mxu1 }
 0x891   : > { %v2412_v48 = vadd.f32 %v3274_v44, %v2406_v45 }
 0x893   : > { %3805 = vtanh.f32 %v2412_v48 }
 0x89d   : > { %v3806_v49 = vpop.eup %3805 }
 0x89e   : > { %v2414_v50 = vmul.f32 1.442695, %v3806_v49 }
 0x8a0   : > { %3807 = vpow2.f32 %v2414_v50 }
 0x8aa   : > { %v3808_v51 = vpop.eup %3807 }
 0x8ab   : > { %2418 = vrot.lane.b32.xlu0 %v3808_v51, %s3881_s8  ;;  %v4329_v62 = vmul.f32 %v3808_v51, %v4197_v18 }
 0x91d   : > { %v2419_v58 = vpop.permute.xlu0 %2418 }
 0x91e   : > { %v4324_v61 = vmul.f32 %v2419_v58, %v4204_v30  ;;  %v3278_v30 = vld [vmem:[%s4482_s1 + $0x108] sm:$0xff] }
 0x91f   : > { %v3702_v24 = vpack.c.bf16 %v3278_v30, %v3277_v3 }
 0x920   : > { %2423 = vrot.lane.b32.xlu1 %v4324_v61, %s3880_s16 }
 0x992   : > { %v2424_v63 = vpop.permute.xlu1 %2423 }
 0x993   : > { %v2426_v0 = vsel %vm337_vm8, %v4329_v62, %v2424_v63 }
 0x994   : > { %v2428_v1 = vrot.slane %v2426_v0, 7  ;;  %v2430_v2 = vrot.slane %v2426_v0, 6  ;;  %v2436_v4 = vrot.slane %v2426_v0, 3  ;;  %v2438_v5 = vrot.slane %v2426_v0, 2 }
 0x995   : > { %v2432_v46 = vrot.slane %v2426_v0, 5  ;;  %v2434_v60 = vrot.slane %v2426_v0, 4 }
 0x996   : > { %v2440_v18 = vsel %vm251_vm0, %v2426_v0, %v2428_v1  ;;  %v2444_v16 = vsel %vm251_vm0, %v2436_v4, %v2438_v5  ;;  %v3726_v0 = vpack.c.bf16 %v3294_v57, %v3293_v56  ;;  %v3295_v1 = vld [vmem:[%s4484_s3 + $0x170] sm:$0xff] }
 0x997   : > { %v2441_v7 = vsel %vm253_vm1, %v2440_v18, %v2430_v2  ;;  %v2768_v21 = vrot.slane %v2444_v16, 4  ;;  %v2692_v25 = vrot.slane %v2444_v16, 3  ;;  %v3296_v2 = vld [vmem:[%s4484_s3 + $0x178] sm:$0xff]  ;;  %vm3117_vm1 = vcmask 195584  }
 0x998   : > { %v2442_v8 = vsel %vm255_vm2, %v2441_v7, %v2432_v46  ;;  %v3729_v4 = vpack.c.bf16 %v3296_v2, %v3295_v1  ;;  %vm3120_vm2 = vcmask 326656  }
 0x999   : > { %v2443_v11 = vsel %vm263_vm6, %v2442_v8, %v2434_v60  ;;  %vm3126_vm6 = vcmask 516096  }
 0x99a   : > { %3584 = vmatmul.mubr.msk.f32.vlgmr.msra.gmra.mrb[16].mxu0 %vm768_vm12, %v2443_v11  ;;  %v2616_v13 = vrot.slane %v2443_v11, 2  ;;  %v2767_v19 = vrot.slane %v2443_v11, 4  ;;  %v2542_v20 = vrot.slane %v2443_v11, 1  ;;  %v2691_v22 = vrot.slane %v2443_v11, 3 }
 0x99b   : > { %3703 = vmatpush3.bf16.msra.mxu0 %v3702_v24  ;;  %3590 = vmatprep.mubr.msk.f32.mxu0 %vm3877_vm9, %v3878_v15  ;;  %v3306_v24 = vld [vmem:[%s4485_s4 + $0x3] ss:$0 sm:$0xff] }
 0x99c   : > { %3598 = vmatmul.mubr.msk.f32.vlgmr.msra.gmra.mrb[18].mxu1 %vm768_vm12, %v2616_v13  ;;  %3707 = vmatprep.subr.bf16.mxu0 %v3876_v14  ;;  %v2769_v23 = vsel %vm257_vm3, %v2767_v19, %v2768_v21  ;;  %v2693_v26 = vsel %vm259_vm4, %v2691_v22, %v2692_v25  ;;  %vm3122_vm3 = vcmask 392192   ;;  %vm3124_vm4 = vcmask 457728  }
 0x99d   : > { %3712 = vmatpush3.bf16.msra.mxu1 %v3711_v12  ;;  %3611 = vmatprep.mubr.msk.f32.mxu1 %vm3877_vm9, %v3878_v15 }
 0x99e   : > { %3591 = vmatmul.mubr.msk.f32.vlgmr.msra.gmra.mrb[18].mxu0 %vm768_vm12, %v2542_v20  ;;  %3719 = vmatprep.subr.bf16.mxu1 %v3876_v14 }
 0x99f   : > { %3709 = vmatpush3.bf16.msra.mxu0 %v3708_v17  ;;  %3604 = vmatprep.mubr.msk.f32.mxu0 %vm3877_vm9, %v3878_v15 }
 0x9a0   : > { %3612 = vmatmul.mubr.msk.f32.vlgmr.msra.gmra.mrb[20].mxu1 %vm768_vm12, %v2769_v23  ;;  %3713 = vmatprep.subr.bf16.mxu0 %v3876_v14 }
 0x9a1   : > { %3633 = vmatprep.mubr.msk.f32.mxu1 %vm3877_vm9, %v3878_v15  ;;  %3721 = vmatpush3.bf16.msra.mxu1 %v3720_v33 }
 0x9a2   : > { %3605 = vmatmul.mubr.msk.f32.vlgmr.msra.gmra.mrb[20].mxu0 %vm768_vm12, %v2693_v26  ;;  %3722 = vmatprep.subr.bf16.mxu1 %v3876_v14 }
 0x9a3   : > { %3622 = vmatprep.mubr.msk.f32.mxu0 %vm3877_vm9, %v3878_v15  ;;  %3715 = vmatpush3.bf16.msra.mxu0 %v3714_v29 }
 0x9a4   : > { %3716 = vmatprep.subr.bf16.mxu0 %v3876_v14 }
 0x9a5   : > { %3724 = vmatpush3.bf16.msra.mxu1 %v3723_v39 }
 0x9a7   : > { %3718 = vmatpush3.bf16.msra.mxu0 %v3717_v36 }
 0x9a8   : > { %3725 = vmatprep.subr.bf16.mxu0 %v3876_v14 }
 0xa6d   : > { %v2538_v40 = vpop.f32.mrb[16].mxu0 }
 0xa6e   : > { %v3585_v41 = vpop.f32.mrb[17].mxu0 }
 0xa6f   : > { %v2685_v42 = vpop.f32.mrb[18].mxu1 }
 0xa70   : > { %v3599_v43 = vpop.f32.mrb[19].mxu1 }
 0xa71   : > { %v2611_v44 = vpop.f32.mrb[18].mxu0 }
 0xa72   : > { %v2615_v45 = vadd.f32 %v2611_v44, %v2538_v40  ;;  %v3592_v47 = vpop.f32.mrb[19].mxu0 }
 0xa73   : > { %v2838_v48 = vpop.f32.mrb[20].mxu1 }
 0xa74   : > { %v3613_v49 = vpop.f32.mrb[21].mxu1  ;;  %v2689_v50 = vadd.f32 %v2685_v42, %v2615_v45 }
 0xa75   : > { %v2762_v51 = vpop.f32.mrb[20].mxu0 }
 0xa76   : > { %v2766_v52 = vadd.f32 %v2762_v51, %v2689_v50  ;;  %v3606_v53 = vpop.f32.mrb[21].mxu0 }
 0xa78   : > { %v2842_v55 = vadd.f32 %v2838_v48, %v2766_v52 }
 0xa7a   : > { %v2848_v58 = vadd.f32 %v3302_v54, %v2842_v55 }
 0xa7c   : > { %v2850_v63 = vmul.f32 0.01, %v2848_v58  ;;  %vm2849_vm0 = vcmp.gt.f32.partialorder %v2848_v58, 0.0 }
 0xa7e   : > { %v2851_v3 = vsel %vm2849_vm0, %v2848_v58, %v2850_v63 }
 0xa7f   : > { %3623 = vmatmul.mubr.msk.f32.vlgmr.msra.gmra.mrb[22].mxu0 %vm2185_vm7, %v2851_v3  ;;  %v2925_v30 = vrot.slane %v2851_v3, 1  ;;  %v2999_v5 = vrot.slane %v2851_v3, 2 }
 0xa80   : > { %3727 = vmatpush3.bf16.msra.mxu0 %v3726_v0  ;;  %3644 = vmatprep.mubr.msk.f32.mxu0 %vm3877_vm9, %v3878_v15 }
 0xa81   : > { %3634 = vmatmul.mubr.msk.f32.vlgmr.msra.gmra.mrb[22].mxu1 %vm2185_vm7, %v2925_v30  ;;  %3728 = vmatprep.subr.bf16.mxu0 %v3876_v14 }
 0xa84   : > { %3730 = vmatpush3.bf16.msra.mxu0 %v3729_v4 }
 0xa87   : > { %3645 = vmatmul.mubr.msk.f32.vlgmr.msra.gmra.mrb[24].mxu0 %vm2185_vm7, %v2999_v5 }
 0xb52   : > { %v2921_v46 = vpop.f32.mrb[22].mxu0 }
 0xb53   : > { %v3624_v18 = vpop.f32.mrb[23].mxu0 }
 0xb54   : > { %v2994_v59 = vpop.f32.mrb[22].mxu1 }
 0xb55   : > { %v2998_v6 = vadd.f32 %v2994_v59, %v2921_v46  ;;  %v3635_v60 = vpop.f32.mrb[23].mxu1 }
 0xb5a   : > { %v3068_v7 = vpop.f32.mrb[24].mxu0 }
 0xb5b   : > { %v3072_v8 = vadd.f32 %v3068_v7, %v2998_v6  ;;  %v3646_v15 = vpop.f32.mrb[25].mxu0 }
 0xb5d   : > { %v3078_v9 = vadd.f32 %v3306_v24, %v3072_v8 }
 0xb5f   : > { %3809 = vtanh.f32 %v3078_v9 }
 0xb69   : > { %v3810_v10 = vpop.eup %3809 }
 0xb6a   : > { %3082 = vrot.lane.b32.xlu0 %v3810_v10, %s3881_s8  ;;  %v3080_v14 = vadd.f32 %v3810_v10, %v4324_v61  ;;  %s3886_s8 = smov 40  }
 0xb6c   : > { %v3091_v11 = vrot.slane %v3080_v14, 1  ;;  %v3099_v12 = vrot.slane %v3080_v14, 2  ;;  %v3107_v13 = vrot.slane %v3080_v14, 3 }
 0xb6e   : > { %3092 = vrot.lane.b32.xlu0 %v3091_v11, %s3882_s14  ;;  %s3817_s14 = scalar_lea.vmem %s3816_s13, 32 }
 0xb6f   : > { %p3819_p1 = scmp.lt.s32.totalorder %s3817_s14, %s3811_s11 }
 0xb71   : > { %p3820_p2 = por %p3819_p1, %p3818_p0 }
 0xb72   : > { %3100 = vrot.lane.b32.xlu0 %v3099_v12, %s3883_s15 }
 0xb73   : > { %p3821_p3 = pnand %p3820_p2, %p3814_p13 }
 0xb76   : > { %3108 = vrot.lane.b32.xlu0 %v3107_v13, %s3884_s17 }
 0xbdc   : > { %v3083_v16 = vpop.permute.xlu0 %3082 }
 0xbdd   : > { %v3085_v17 = vsub.f32 %v4329_v62, %v3083_v16 }
 0xbdf   : > { %3087 = vrot.lane.b32.xlu1 %v3085_v17, %s3880_s16  ;;  %v3095_v19 = vrot.slane %v3085_v17, 1  ;;  %v3103_v20 = vrot.slane %v3085_v17, 2  ;;  %v3111_v61 = vrot.slane %v3085_v17, 3  ;;  %s3307_s16 = sshll.u32 %s3940_s22, 4  ;;  %s3129_s22 = scalar_lea.sflag [#allocation4], %s215_s26 }
 0xbe0   : > { %v3093_v21 = vpop.permute.xlu0 %3092  ;;  %s4439_s10 = scalar_lea.hbm %s4486_s5, %s3307_s16 }
 0xbe3   : > { %3096 = vrot.lane.b32.xlu1 %v3095_v19, %s3885_s23 }
 0xbe4   : > { %v3101_v26 = vpop.permute.xlu0 %3100 }
 0xbe7   : > { %3104 = vrot.lane.b32.xlu1 %v3103_v20, %s3886_s8 }
 0xbe8   : > { %v3109_v32 = vpop.permute.xlu0 %3108 }
 0xbeb   : > { %3112 = vrot.lane.b32.xlu1 %v3111_v61, %s3887_s25 }
 0xc51   : > { %v3088_v22 = vpop.permute.xlu1 %3087 }
 0xc52   : > { %v3115_v23 = vsel %vm337_vm8, %v3080_v14, %v3088_v22 }
 0xc53   : > { %v3116_v62 = vsel %vm768_vm12, %v3115_v23, %v3093_v21 }
 0xc55   : > { %v3097_v25 = vpop.permute.xlu1 %3096 }
 0xc56   : > { %v3118_v27 = vsel %vm3117_vm1, %v3116_v62, %v3097_v25 }
 0xc57   : > { %v3119_v29 = vsel %vm2185_vm7, %v3118_v27, %v3101_v26 }
 0xc59   : > { %v3105_v28 = vpop.permute.xlu1 %3104 }
 0xc5a   : > { %v3121_v31 = vsel %vm3120_vm2, %v3119_v29, %v3105_v28 }
 0xc5b   : > { %v3123_v34 = vsel %vm3122_vm3, %v3121_v31, %v3109_v32 }
 0xc5d   : > { %v3113_v33 = vpop.permute.xlu1 %3112 }
 0xc5e   : > { %v3125_v35 = vsel %vm3124_vm4, %v3123_v34, %v3113_v33 }
 0xc5f   : > { %3127 = vst.msk [vmem:[%s216_s30] sm:$0x1] %vm3126_vm6, %v3125_v35 }
 0xc60   : > { %3824 = shalt.err (!%p3821_p3)
}
 0xc61   : > { %s3825_s15 = scalar_lea.hbm %s4439_s10, 16  ;;  %s3829_s8 = scalar_lea.hbm %s4486_s5, 32 }
 0xc62   : > { %p3826_p4 = scmp.ne.s32.totalorder %s4439_s10, %s3825_s15  ;;  %p3830_p9 = scmp.lt.u32.totalorder %s4439_s10, %s4486_s5 }
 0xc63   : > { %p3831_p10 = scmp.lt.u32.totalorder %s3829_s8, %s3825_s15  ;;  %p3833_p12 = scmp.lt.u32.totalorder %s3825_s15, %s4439_s10 }
 0xc64   : > { %p3827_p7 = pnand %p3826_p4, %p3957_p5 }
 0xc65   : > { %p3832_p11 = por %p3831_p10, %p3830_p9 }
 0xc66   : > { %p3828_p8 = pneg %p3827_p7 }
 0xc67   : > { %p3834_p13 = por %p3833_p12, %p3832_p11 }
 0xc69   : > { %p3835_p0 = pnand %p3834_p13, %p3828_p8 }
 0xc6b   : > { %3838 = shalt.err (!%p3835_p0)
}
 0xc6c   : > { %3747 = dma.vmem_to_hbm [thread:$0]  (%p3957_p5), %s4441_s7, 16, %s4439_s10, %s3129_s22  }
 0xc6d PF: > { %p3753_p1 = scmp.ge.s32.totalorder %s3873_s21, 2  ;;  %s3153_s16 = sand.u32 1, %s3861_s18  }
 0xc6e   : > { %s3154_s30 = scalar_lea.sflag [#allocation4], %s3153_s16 }
 0xc6f   : > { %p3750_p2 = pnand %p3753_p1, %p3961_p6 }
 0xc71   : > { %3856 = dma.done.wait (!%p3750_p2), %s3154_s30, 16  }
 0xc72   : > { %3858 = vsyncadd (!%p3750_p2), %s3154_s30, 4294967280  ;;  %p15_p3 = scmp.ge.s32.totalorder %s3944_s24, 4   ;;  %s4489_s18 = smov %s3865_s19 }
 0xc73   : > { %s4490_s19 = smov %s3869_s20  ;;  %s4491_s20 = smov %s3955_s27 }
 0xc74   : > { %s4492_s21 = smov %s3944_s24  ;;  %17 = sbr.rel (!%p15_p3) target bundleno = 3 (0x3), region = 81 }
 0xc7b   :  { %3158 = vsyncpa [#allocation4], 1 }
 0xc7c   :  { %3160 = vsyncpa [#allocation4 + $0x1], 1 }

</bundles_post_ra>
